<compile_context>
chip_gen: v7x
topology: tpu7x:2x2x1
jax: 0.10.0
libtpu: 0.0.40
codegen_flags: <defaults>
</compile_context>

<pallas_src>
import numpy as np
import jax
import jax.numpy as jnp
from jax.experimental import pallas as pl
from jax.experimental.pallas import tpu as pltpu

SEQ = 30      # sequence length (fixed by Attention3dBlock Linear(30,30) and reshape(-1,1500))
IN = 10       # LSTM input_size
HID = 50      # LSTM hidden_size
HC = 20       # handcrafted feature size
OUT1 = 50     # head MLP hidden
OUT2 = 10     # head MLP output
GATE_PAD = 128  # one 128-lane block per LSTM gate (i, f, g, o)


# ---------------------------------------------------------------------------
# Single fused kernel
# ---------------------------------------------------------------------------
def fused_kernel(x_ref, wih_ref, whh_ref, b_ref,
                 watt_ref, batt_ref,
                 w1r_ref, b1_ref, w2_ref, b2_ref,
                 hc_ref, wh_ref, bh_ref,
                 out_ref, xproj_scr, hs_scr):
    # x_ref:      (T*BP, D)   time-major rows, row index = t*BP + b (rows b>=B are zero pad)
    # wih_ref:    (D, 4*128)  gate input weights, gate k in lanes [k*128, k*128+H)
    # whh_ref:    (H, 4*128)  gate recurrent weights (same lane layout)
    # b_ref:      (1, 4*128)  fused bias (b_ih + b_hh), same lane layout
    # watt_ref:   (T, T)      attention Linear(30,30) weight W[s, t]; batt_ref: (T, 1)
    # w1r_ref:    (T, H, O1)  head Linear(1500,50) weight reshaped per-timestep
    # b1/w2/b2:   head MLP;   hc/wh/bh: handcrafted branch
    # out_ref:    (B, 2*O2)
    # xproj_scr:  (T*BP, 4*128) VMEM scratch for the hoisted input projection
    # hs_scr:     (T, BP, H)    VMEM scratch: hidden states, then attention output in place
    T, BP, H = hs_scr.shape
    B = hc_ref.shape[0]
    O1 = w1r_ref.shape[2]
    O2 = w2_ref.shape[1]

    # ---- hoisted LSTM input projection -> VMEM scratch (bias folded in once) --------
    # Chunked over time so the intermediate value stays a few tens of vregs.
    wih = wih_ref[...]
    bias = b_ref[...]
    TCH = 8  # timesteps per chunk
    for t0 in range(0, T, TCH):
        t1 = min(t0 + TCH, T)
        r0, r1 = t0 * BP, t1 * BP
        xproj_scr[r0:r1, :] = (
            jnp.dot(x_ref[r0:r1, :], wih, preferred_element_type=jnp.float32) + bias)

    # ---- LSTM recurrence (the serial critical path) ----------------------------------
    whh = whh_ref[...]                               # (H, 4*128), resident across the loop
    h = jnp.zeros((BP, H), jnp.float32)
    c = jnp.zeros((BP, H), jnp.float32)
    for t in range(T):                               # static unroll (T=30)
        gates = xproj_scr[t * BP:(t + 1) * BP, :] + jnp.dot(
            h, whh, preferred_element_type=jnp.float32)            # (BP, 4*128)
        # lane-aligned gate slices: offsets 0 / 128 / 256 / 384, width H=50
        i_g = jax.nn.sigmoid(gates[:, 0 * GATE_PAD:0 * GATE_PAD + H])
        f_g = jax.nn.sigmoid(gates[:, 1 * GATE_PAD:1 * GATE_PAD + H])
        g_g = jnp.tanh(gates[:, 2 * GATE_PAD:2 * GATE_PAD + H])
        o_g = jax.nn.sigmoid(gates[:, 3 * GATE_PAD:3 * GATE_PAD + H])
        c = f_g * c + i_g * g_g
        h = o_g * jnp.tanh(c)
        hs_scr[t] = h                                # full-sublane (BP, H) store

    # ---- Attention3dBlock: q[s,h] = sum_t W[s,t] x[t,h] + bias[s]; softmax over s;
    #      elementwise multiply; written back in place (rows b>=B keep raw h, unused). --
    watt = watt_ref[...]
    batt = batt_ref[...]
    for b in range(B):                               # tiny static loop over real batch
        xb = hs_scr[:, b, :]                                         # (T, H)
        q = jnp.dot(watt, xb, preferred_element_type=jnp.float32) + batt
        e = jnp.exp(q - jnp.max(q, axis=0, keepdims=True))
        probs = e / jnp.sum(e, axis=0, keepdims=True)                # exact softmax
        hs_scr[:, b, :] = probs * xb                                 # attention output

    # ---- Head MLP: Linear(1500,50)+ReLU -> (Dropout=id) -> Linear(50,10)+ReLU --------
    # Linear(1500,50) decomposed over timesteps: sum_t att[t](BP,H) @ W1[t](H,O1).
    def head_step(t, acc):
        return acc + jnp.dot(hs_scr[t], w1r_ref[t], preferred_element_type=jnp.float32)

    acc = jax.lax.fori_loop(0, T, head_step, jnp.zeros((BP, O1), jnp.float32))
    h1 = jnp.maximum(acc + b1_ref[...], 0.0)
    # TODO(synk): Dropout(p=0.2) layers are identity in eval mode; training dropout not implemented.
    h2 = jnp.maximum(
        jnp.dot(h1, w2_ref[...], preferred_element_type=jnp.float32) + b2_ref[...], 0.0)

    # ---- Handcrafted branch: Linear(20,10)+ReLU ---------------------------------------
    y = jnp.maximum(
        jnp.dot(hc_ref[...], wh_ref[...], preferred_element_type=jnp.float32) + bh_ref[...],
        0.0)

    # ---- concat(head, handcrafted) written directly into lane slices ------------------
    out_ref[:, :O2] = h2[:B, :]
    out_ref[:, O2:] = y


# ---------------------------------------------------------------------------
# Wrapper: layout plumbing only (time-major rows, batch padded to a sublane group)
# ---------------------------------------------------------------------------
@jax.jit
def lstm_model_forward(kparams, inputs, handcrafted_feature):
    B, T, D = inputs.shape
    BP = ((B + 7) // 8) * 8                           # pad batch to full sublanes
    x_tm = jnp.transpose(inputs, (1, 0, 2))           # (T, B, D)
    x_tm = jnp.pad(x_tm, ((0, 0), (0, BP - B), (0, 0)))
    x2d = x_tm.reshape(T * BP, D)                     # row index = t*BP + b

    out = pl.pallas_call(
        fused_kernel,
        out_shape=jax.ShapeDtypeStruct((B, 2 * OUT2), jnp.float32),
        scratch_shapes=[
            pltpu.VMEM((T * BP, 4 * GATE_PAD), jnp.float32),  # hoisted input projection
            pltpu.VMEM((T, BP, HID), jnp.float32),            # hidden states / attention out
        ],
    )(x2d,
      kparams["wih"], kparams["whh"], kparams["b_lstm"],
      kparams["w_att"], kparams["b_att"],
      kparams["w1r"], kparams["b1"], kparams["w2"], kparams["b2"],
      handcrafted_feature, kparams["wh"], kparams["bh"])
    return out


# ---------------------------------------------------------------------------
# Parameters: compact (reference) layout + packing into the kernel's padded layout
# ---------------------------------------------------------------------------
def init_params(key):
    ks = jax.random.split(key, 12)

    def u(k, shape, fan_in):
        bound = 1.0 / np.sqrt(fan_in)
        return jax.random.uniform(k, shape, jnp.float32, -bound, bound)

    p = {}
    p["wih"] = u(ks[0], (IN, 4 * HID), HID)                                   # (10, 200)
    p["whh"] = u(ks[1], (HID, 4 * HID), HID)                                  # (50, 200)
    p["b_lstm"] = u(ks[2], (1, 4 * HID), HID) + u(ks[3], (1, 4 * HID), HID)   # b_ih + b_hh
    p["w_att"] = u(ks[4], (SEQ, SEQ), SEQ)                                    # W[s, t]
    p["b_att"] = u(ks[5], (SEQ, 1), SEQ)
    p["w1r"] = u(ks[6], (SEQ, HID, OUT1), SEQ * HID)                          # Linear(1500,50)
    p["b1"] = u(ks[7], (1, OUT1), SEQ * HID)
    p["w2"] = u(ks[8], (OUT1, OUT2), OUT1)
    p["b2"] = u(ks[9], (1, OUT2), OUT1)
    p["wh"] = u(ks[10], (HC, OUT2), HC)
    p["bh"] = u(ks[11], (1, OUT2), HC)
    return p


def pack_params(p):
    """Pad each LSTM gate block (i, f, g, o) to its own 128-lane block."""
    def pad_gates(w):  # (..., 4*HID) -> (..., 4*GATE_PAD), zeros in lanes HID..127
        blocks = []
        for k in range(4):
            blk = w[..., k * HID:(k + 1) * HID]
            pad = [(0, 0)] * (blk.ndim - 1) + [(0, GATE_PAD - HID)]
            blocks.append(jnp.pad(blk, pad))
        return jnp.concatenate(blocks, axis=-1)

    kp = dict(p)
    kp["wih"] = pad_gates(p["wih"])         # (10, 512)
    kp["whh"] = pad_gates(p["whh"])         # (50, 512)
    kp["b_lstm"] = pad_gates(p["b_lstm"])   # (1, 512)
    return kp


# ---------------------------------------------------------------------------
# Pure-JAX reference (correctness check only), uses compact params
# ---------------------------------------------------------------------------
def reference_forward(params, inputs, hc):
    B = inputs.shape[0]

    def step(carry, x_t):
        h, c = carry
        g = x_t @ params["wih"] + h @ params["whh"] + params["b_lstm"]
        i = jax.nn.sigmoid(g[:, :HID])
        f = jax.nn.sigmoid(g[:, HID:2 * HID])
        gg = jnp.tanh(g[:, 2 * HID:3 * HID])
        o = jax.nn.sigmoid(g[:, 3 * HID:])
        c = f * c + i * gg
        h = o * jnp.tanh(c)
        return (h, c), h

    h0 = jnp.zeros((B, HID), jnp.float32)
    (_, _), hs = jax.lax.scan(step, (h0, h0), jnp.swapaxes(inputs, 0, 1))
    x = jnp.swapaxes(hs, 0, 1)                                        # (B, T, H)

    # Attention3dBlock
    sc = jnp.einsum("st,bth->bsh", params["w_att"], x) + params["b_att"].reshape(1, SEQ, 1)
    pr = jax.nn.softmax(sc, axis=1)                                   # softmax over s
    x = pr * x                                                        # (B, T, H)

    flat = x.reshape(B, SEQ * HID)
    w1 = params["w1r"].reshape(SEQ * HID, OUT1)
    h1 = jax.nn.relu(flat @ w1 + params["b1"])
    h2 = jax.nn.relu(h1 @ params["w2"] + params["b2"])
    y = jax.nn.relu(hc @ params["wh"] + params["bh"])
    return jnp.concatenate([h2, y], axis=1)


if __name__ == "__main__":
    B = 2
    key = jax.random.PRNGKey(0)
    k_in, k_hc, k_p = jax.random.split(key, 3)
    inputs = jax.random.normal(k_in, (B, SEQ, IN), jnp.float32)       # (2, 30, 10)
    handcrafted = jax.random.normal(k_hc, (B, HC), jnp.float32)       # (2, 20)
    params = init_params(k_p)
    kparams = pack_params(params)

    out = jax.block_until_ready(lstm_model_forward(kparams, inputs, handcrafted))
    ref = jax.block_until_ready(reference_forward(params, inputs, handcrafted))

    assert out.shape == (B, 2 * OUT2), out.shape
    np.testing.assert_allclose(np.asarray(out), np.asarray(ref), rtol=2e-3, atol=2e-3)
    print("KERNEL_OK")
</pallas_src>

<mosaic_0001>
module attributes {stable_mosaic.version = 11 : i64} {
  func.func @fused_kernel(%arg0: memref<240x10xf32, #tpu.memory_space<vmem>>, %arg1: memref<10x512xf32, #tpu.memory_space<vmem>>, %arg2: memref<50x512xf32, #tpu.memory_space<vmem>>, %arg3: memref<1x512xf32, #tpu.memory_space<vmem>>, %arg4: memref<30x30xf32, #tpu.memory_space<vmem>>, %arg5: memref<30x1xf32, #tpu.memory_space<vmem>>, %arg6: memref<30x50x50xf32, #tpu.memory_space<vmem>>, %arg7: memref<1x50xf32, #tpu.memory_space<vmem>>, %arg8: memref<50x10xf32, #tpu.memory_space<vmem>>, %arg9: memref<1x10xf32, #tpu.memory_space<vmem>>, %arg10: memref<2x20xf32, #tpu.memory_space<vmem>>, %arg11: memref<20x10xf32, #tpu.memory_space<vmem>>, %arg12: memref<1x10xf32, #tpu.memory_space<vmem>>, %arg13: memref<2x20xf32, #tpu.memory_space<vmem>>, %arg14: memref<240x512xf32, #tpu.memory_space<vmem>>, %arg15: memref<30x8x50xf32, #tpu.memory_space<vmem>>) attributes {dimension_semantics = [], scalar_prefetch = 0 : i64, scratch_operands = 2 : i64, tpu.core_type = #tpu.core_type<tc>} {
    %c0 = arith.constant 0 : index
    %c0_0 = arith.constant 0 : index
    %0 = vector.load %arg1[%c0, %c0_0] : memref<10x512xf32, #tpu.memory_space<vmem>>, vector<10x512xf32>
    %c0_1 = arith.constant 0 : index
    %c0_2 = arith.constant 0 : index
    %1 = vector.load %arg3[%c0_1, %c0_2] : memref<1x512xf32, #tpu.memory_space<vmem>>, vector<1x512xf32>
    %c0_3 = arith.constant 0 : index
    %c0_4 = arith.constant 0 : index
    %2 = vector.load %arg0[%c0_3, %c0_4] : memref<240x10xf32, #tpu.memory_space<vmem>>, vector<64x10xf32>
    %cst = arith.constant dense<0.000000e+00> : vector<64x512xf32>
    %3 = tpu.matmul %2, %0, %cst {dimension_numbers = #tpu.dot_dimension_numbers<[1], [0], [0], [1], [0, 0, 1, 1], [], []>} : vector<64x10xf32>, vector<10x512xf32>, vector<64x512xf32> -> vector<64x512xf32>
    %4 = vector.broadcast %1 : vector<1x512xf32> to vector<64x512xf32>
    %5 = arith.addf %3, %4 : vector<64x512xf32>
    %c0_5 = arith.constant 0 : index
    %c0_6 = arith.constant 0 : index
    %6 = vector.load %arg14[%c0_5, %c0_6] : memref<240x512xf32, #tpu.memory_space<vmem>>, vector<64x512xf32>
    tpu.vector_store %arg14[%c0_5, %c0_6], %5 {strides = array<i32>} : memref<240x512xf32, #tpu.memory_space<vmem>>, vector<64x512xf32>,
    %c64 = arith.constant 64 : index
    %c0_7 = arith.constant 0 : index
    %7 = vector.load %arg0[%c64, %c0_7] : memref<240x10xf32, #tpu.memory_space<vmem>>, vector<64x10xf32>
    %cst_8 = arith.constant dense<0.000000e+00> : vector<64x512xf32>
    %8 = tpu.matmul %7, %0, %cst_8 {dimension_numbers = #tpu.dot_dimension_numbers<[1], [0], [0], [1], [0, 0, 1, 1], [], []>} : vector<64x10xf32>, vector<10x512xf32>, vector<64x512xf32> -> vector<64x512xf32>
    %9 = vector.broadcast %1 : vector<1x512xf32> to vector<64x512xf32>
    %10 = arith.addf %8, %9 : vector<64x512xf32>
    %c64_9 = arith.constant 64 : index
    %c0_10 = arith.constant 0 : index
    %11 = vector.load %arg14[%c64_9, %c0_10] : memref<240x512xf32, #tpu.memory_space<vmem>>, vector<64x512xf32>
    tpu.vector_store %arg14[%c64_9, %c0_10], %10 {strides = array<i32>} : memref<240x512xf32, #tpu.memory_space<vmem>>, vector<64x512xf32>,
    %c128 = arith.constant 128 : index
    %c0_11 = arith.constant 0 : index
    %12 = vector.load %arg0[%c128, %c0_11] : memref<240x10xf32, #tpu.memory_space<vmem>>, vector<64x10xf32>
    %cst_12 = arith.constant dense<0.000000e+00> : vector<64x512xf32>
    %13 = tpu.matmul %12, %0, %cst_12 {dimension_numbers = #tpu.dot_dimension_numbers<[1], [0], [0], [1], [0, 0, 1, 1], [], []>} : vector<64x10xf32>, vector<10x512xf32>, vector<64x512xf32> -> vector<64x512xf32>
    %14 = vector.broadcast %1 : vector<1x512xf32> to vector<64x512xf32>
    %15 = arith.addf %13, %14 : vector<64x512xf32>
    %c128_13 = arith.constant 128 : index
    %c0_14 = arith.constant 0 : index
    %16 = vector.load %arg14[%c128_13, %c0_14] : memref<240x512xf32, #tpu.memory_space<vmem>>, vector<64x512xf32>
    tpu.vector_store %arg14[%c128_13, %c0_14], %15 {strides = array<i32>} : memref<240x512xf32, #tpu.memory_space<vmem>>, vector<64x512xf32>,
    %c192 = arith.constant 192 : index
    %c0_15 = arith.constant 0 : index
    %17 = vector.load %arg0[%c192, %c0_15] : memref<240x10xf32, #tpu.memory_space<vmem>>, vector<48x10xf32>
    %cst_16 = arith.constant dense<0.000000e+00> : vector<48x512xf32>
    %18 = tpu.matmul %17, %0, %cst_16 {dimension_numbers = #tpu.dot_dimension_numbers<[1], [0], [0], [1], [0, 0, 1, 1], [], []>} : vector<48x10xf32>, vector<10x512xf32>, vector<48x512xf32> -> vector<48x512xf32>
    %19 = vector.broadcast %1 : vector<1x512xf32> to vector<48x512xf32>
    %20 = arith.addf %18, %19 : vector<48x512xf32>
    %c192_17 = arith.constant 192 : index
    %c0_18 = arith.constant 0 : index
    %21 = vector.load %arg14[%c192_17, %c0_18] : memref<240x512xf32, #tpu.memory_space<vmem>>, vector<48x512xf32>
    tpu.vector_store %arg14[%c192_17, %c0_18], %20 {strides = array<i32>} : memref<240x512xf32, #tpu.memory_space<vmem>>, vector<48x512xf32>,
    %c0_19 = arith.constant 0 : index
    %c0_20 = arith.constant 0 : index
    %22 = vector.load %arg2[%c0_19, %c0_20] : memref<50x512xf32, #tpu.memory_space<vmem>>, vector<50x512xf32>
    %cst_21 = arith.constant 0.000000e+00 : f32
    %23 = vector.broadcast %cst_21 : f32 to vector<8x50xf32>
    %cst_22 = arith.constant 0.000000e+00 : f32
    %24 = vector.broadcast %cst_22 : f32 to vector<8x50xf32>
    %c0_23 = arith.constant 0 : index
    %c0_24 = arith.constant 0 : index
    %25 = vector.load %arg14[%c0_23, %c0_24] : memref<240x512xf32, #tpu.memory_space<vmem>>, vector<8x512xf32>
    %cst_25 = arith.constant dense<0.000000e+00> : vector<8x512xf32>
    %26 = tpu.matmul %23, %22, %cst_25 {dimension_numbers = #tpu.dot_dimension_numbers<[1], [0], [0], [1], [0, 0, 1, 1], [], []>} : vector<8x50xf32>, vector<50x512xf32>, vector<8x512xf32> -> vector<8x512xf32>
    %27 = arith.addf %25, %26 : vector<8x512xf32>
    %28 = vector.extract_strided_slice %27 {offsets = [0, 0], sizes = [8, 50], strides = [1, 1]} : vector<8x512xf32> to vector<8x50xf32>
    %29 = arith.negf %28 : vector<8x50xf32>
    %30 = math.exp %29 : vector<8x50xf32>
    %cst_26 = arith.constant 1.000000e+00 : f32
    %31 = vector.broadcast %cst_26 : f32 to vector<8x50xf32>
    %32 = arith.addf %31, %30 : vector<8x50xf32>
    %33 = arith.divf %31, %32 : vector<8x50xf32>
    %34 = vector.extract_strided_slice %27 {offsets = [0, 128], sizes = [8, 50], strides = [1, 1]} : vector<8x512xf32> to vector<8x50xf32>
    %35 = arith.negf %34 : vector<8x50xf32>
    %36 = math.exp %35 : vector<8x50xf32>
    %cst_27 = arith.constant 1.000000e+00 : f32
    %37 = vector.broadcast %cst_27 : f32 to vector<8x50xf32>
    %38 = arith.addf %37, %36 : vector<8x50xf32>
    %39 = arith.divf %37, %38 : vector<8x50xf32>
    %40 = vector.extract_strided_slice %27 {offsets = [0, 256], sizes = [8, 50], strides = [1, 1]} : vector<8x512xf32> to vector<8x50xf32>
    %41 = math.tanh %40 : vector<8x50xf32>
    %42 = vector.extract_strided_slice %27 {offsets = [0, 384], sizes = [8, 50], strides = [1, 1]} : vector<8x512xf32> to vector<8x50xf32>
    %43 = arith.negf %42 : vector<8x50xf32>
    %44 = math.exp %43 : vector<8x50xf32>
    %cst_28 = arith.constant 1.000000e+00 : f32
    %45 = vector.broadcast %cst_28 : f32 to vector<8x50xf32>
    %46 = arith.addf %45, %44 : vector<8x50xf32>
    %47 = arith.divf %45, %46 : vector<8x50xf32>
    %48 = arith.mulf %39, %24 : vector<8x50xf32>
    %49 = arith.mulf %33, %41 : vector<8x50xf32>
    %50 = arith.addf %48, %49 : vector<8x50xf32>
    %51 = math.tanh %50 : vector<8x50xf32>
    %52 = arith.mulf %47, %51 : vector<8x50xf32>
    %c0_29 = arith.constant 0 : index
    %c0_30 = arith.constant 0 : index
    %c0_31 = arith.constant 0 : index
    %53 = vector.load %arg15[%c0_29, %c0_30, %c0_31] : memref<30x8x50xf32, #tpu.memory_space<vmem>>, vector<1x8x50xf32>
    %54 = vector.shape_cast %53 : vector<1x8x50xf32> to vector<8x50xf32>
    %55 = vector.shape_cast %52 : vector<8x50xf32> to vector<1x8x50xf32>
    tpu.vector_store %arg15[%c0_29, %c0_30, %c0_31], %55 {strides = array<i32>} : memref<30x8x50xf32, #tpu.memory_space<vmem>>, vector<1x8x50xf32>,
    %c8 = arith.constant 8 : index
    %c0_32 = arith.constant 0 : index
    %56 = vector.load %arg14[%c8, %c0_32] : memref<240x512xf32, #tpu.memory_space<vmem>>, vector<8x512xf32>
    %cst_33 = arith.constant dense<0.000000e+00> : vector<8x512xf32>
    %57 = tpu.matmul %52, %22, %cst_33 {dimension_numbers = #tpu.dot_dimension_numbers<[1], [0], [0], [1], [0, 0, 1, 1], [], []>} : vector<8x50xf32>, vector<50x512xf32>, vector<8x512xf32> -> vector<8x512xf32>
    %58 = arith.addf %56, %57 : vector<8x512xf32>
    %59 = vector.extract_strided_slice %58 {offsets = [0, 0], sizes = [8, 50], strides = [1, 1]} : vector<8x512xf32> to vector<8x50xf32>
    %60 = arith.negf %59 : vector<8x50xf32>
    %61 = math.exp %60 : vector<8x50xf32>
    %cst_34 = arith.constant 1.000000e+00 : f32
    %62 = vector.broadcast %cst_34 : f32 to vector<8x50xf32>
    %63 = arith.addf %62, %61 : vector<8x50xf32>
    %64 = arith.divf %62, %63 : vector<8x50xf32>
    %65 = vector.extract_strided_slice %58 {offsets = [0, 128], sizes = [8, 50], strides = [1, 1]} : vector<8x512xf32> to vector<8x50xf32>
    %66 = arith.negf %65 : vector<8x50xf32>
    %67 = math.exp %66 : vector<8x50xf32>
    %cst_35 = arith.constant 1.000000e+00 : f32
    %68 = vector.broadcast %cst_35 : f32 to vector<8x50xf32>
    %69 = arith.addf %68, %67 : vector<8x50xf32>
    %70 = arith.divf %68, %69 : vector<8x50xf32>
    %71 = vector.extract_strided_slice %58 {offsets = [0, 256], sizes = [8, 50], strides = [1, 1]} : vector<8x512xf32> to vector<8x50xf32>
    %72 = math.tanh %71 : vector<8x50xf32>
    %73 = vector.extract_strided_slice %58 {offsets = [0, 384], sizes = [8, 50], strides = [1, 1]} : vector<8x512xf32> to vector<8x50xf32>
    %74 = arith.negf %73 : vector<8x50xf32>
    %75 = math.exp %74 : vector<8x50xf32>
    %cst_36 = arith.constant 1.000000e+00 : f32
    %76 = vector.broadcast %cst_36 : f32 to vector<8x50xf32>
    %77 = arith.addf %76, %75 : vector<8x50xf32>
    %78 = arith.divf %76, %77 : vector<8x50xf32>
    %79 = arith.mulf %70, %50 : vector<8x50xf32>
    %80 = arith.mulf %64, %72 : vector<8x50xf32>
    %81 = arith.addf %79, %80 : vector<8x50xf32>
    %82 = math.tanh %81 : vector<8x50xf32>
    %83 = arith.mulf %78, %82 : vector<8x50xf32>
    %c1 = arith.constant 1 : index
    %c0_37 = arith.constant 0 : index
    %c0_38 = arith.constant 0 : index
    %84 = vector.load %arg15[%c1, %c0_37, %c0_38] : memref<30x8x50xf32, #tpu.memory_space<vmem>>, vector<1x8x50xf32>
    %85 = vector.shape_cast %84 : vector<1x8x50xf32> to vector<8x50xf32>
    %86 = vector.shape_cast %83 : vector<8x50xf32> to vector<1x8x50xf32>
    tpu.vector_store %arg15[%c1, %c0_37, %c0_38], %86 {strides = array<i32>} : memref<30x8x50xf32, #tpu.memory_space<vmem>>, vector<1x8x50xf32>,
    %c16 = arith.constant 16 : index
    %c0_39 = arith.constant 0 : index
    %87 = vector.load %arg14[%c16, %c0_39] : memref<240x512xf32, #tpu.memory_space<vmem>>, vector<8x512xf32>
    %cst_40 = arith.constant dense<0.000000e+00> : vector<8x512xf32>
    %88 = tpu.matmul %83, %22, %cst_40 {dimension_numbers = #tpu.dot_dimension_numbers<[1], [0], [0], [1], [0, 0, 1, 1], [], []>} : vector<8x50xf32>, vector<50x512xf32>, vector<8x512xf32> -> vector<8x512xf32>
    %89 = arith.addf %87, %88 : vector<8x512xf32>
    %90 = vector.extract_strided_slice %89 {offsets = [0, 0], sizes = [8, 50], strides = [1, 1]} : vector<8x512xf32> to vector<8x50xf32>
    %91 = arith.negf %90 : vector<8x50xf32>
    %92 = math.exp %91 : vector<8x50xf32>
    %cst_41 = arith.constant 1.000000e+00 : f32
    %93 = vector.broadcast %cst_41 : f32 to vector<8x50xf32>
    %94 = arith.addf %93, %92 : vector<8x50xf32>
    %95 = arith.divf %93, %94 : vector<8x50xf32>
    %96 = vector.extract_strided_slice %89 {offsets = [0, 128], sizes = [8, 50], strides = [1, 1]} : vector<8x512xf32> to vector<8x50xf32>
    %97 = arith.negf %96 : vector<8x50xf32>
    %98 = math.exp %97 : vector<8x50xf32>
    %cst_42 = arith.constant 1.000000e+00 : f32
    %99 = vector.broadcast %cst_42 : f32 to vector<8x50xf32>
    %100 = arith.addf %99, %98 : vector<8x50xf32>
    %101 = arith.divf %99, %100 : vector<8x50xf32>
    %102 = vector.extract_strided_slice %89 {offsets = [0, 256], sizes = [8, 50], strides = [1, 1]} : vector<8x512xf32> to vector<8x50xf32>
    %103 = math.tanh %102 : vector<8x50xf32>
    %104 = vector.extract_strided_slice %89 {offsets = [0, 384], sizes = [8, 50], strides = [1, 1]} : vector<8x512xf32> to vector<8x50xf32>
    %105 = arith.negf %104 : vector<8x50xf32>
    %106 = math.exp %105 : vector<8x50xf32>
    %cst_43 = arith.constant 1.000000e+00 : f32
    %107 = vector.broadcast %cst_43 : f32 to vector<8x50xf32>
    %108 = arith.addf %107, %106 : vector<8x50xf32>
    %109 = arith.divf %107, %108 : vector<8x50xf32>
    %110 = arith.mulf %101, %81 : vector<8x50xf32>
    %111 = arith.mulf %95, %103 : vector<8x50xf32>
    %112 = arith.addf %110, %111 : vector<8x50xf32>
    %113 = math.tanh %112 : vector<8x50xf32>
    %114 = arith.mulf %109, %113 : vector<8x50xf32>
    %c2 = arith.constant 2 : index
    %c0_44 = arith.constant 0 : index
    %c0_45 = arith.constant 0 : index
    %115 = vector.load %arg15[%c2, %c0_44, %c0_45] : memref<30x8x50xf32, #tpu.memory_space<vmem>>, vector<1x8x50xf32>
    %116 = vector.shape_cast %115 : vector<1x8x50xf32> to vector<8x50xf32>
    %117 = vector.shape_cast %114 : vector<8x50xf32> to vector<1x8x50xf32>
    tpu.vector_store %arg15[%c2, %c0_44, %c0_45], %117 {strides = array<i32>} : memref<30x8x50xf32, #tpu.memory_space<vmem>>, vector<1x8x50xf32>,
    %c24 = arith.constant 24 : index
    %c0_46 = arith.constant 0 : index
    %118 = vector.load %arg14[%c24, %c0_46] : memref<240x512xf32, #tpu.memory_space<vmem>>, vector<8x512xf32>
    %cst_47 = arith.constant dense<0.000000e+00> : vector<8x512xf32>
    %119 = tpu.matmul %114, %22, %cst_47 {dimension_numbers = #tpu.dot_dimension_numbers<[1], [0], [0], [1], [0, 0, 1, 1], [], []>} : vector<8x50xf32>, vector<50x512xf32>, vector<8x512xf32> -> vector<8x512xf32>
    %120 = arith.addf %118, %119 : vector<8x512xf32>
    %121 = vector.extract_strided_slice %120 {offsets = [0, 0], sizes = [8, 50], strides = [1, 1]} : vector<8x512xf32> to vector<8x50xf32>
    %122 = arith.negf %121 : vector<8x50xf32>
    %123 = math.exp %122 : vector<8x50xf32>
    %cst_48 = arith.constant 1.000000e+00 : f32
    %124 = vector.broadcast %cst_48 : f32 to vector<8x50xf32>
    %125 = arith.addf %124, %123 : vector<8x50xf32>
    %126 = arith.divf %124, %125 : vector<8x50xf32>
    %127 = vector.extract_strided_slice %120 {offsets = [0, 128], sizes = [8, 50], strides = [1, 1]} : vector<8x512xf32> to vector<8x50xf32>
    %128 = arith.negf %127 : vector<8x50xf32>
    %129 = math.exp %128 : vector<8x50xf32>
    %cst_49 = arith.constant 1.000000e+00 : f32
    %130 = vector.broadcast %cst_49 : f32 to vector<8x50xf32>
    %131 = arith.addf %130, %129 : vector<8x50xf32>
    %132 = arith.divf %130, %131 : vector<8x50xf32>
    %133 = vector.extract_strided_slice %120 {offsets = [0, 256], sizes = [8, 50], strides = [1, 1]} : vector<8x512xf32> to vector<8x50xf32>
    %134 = math.tanh %133 : vector<8x50xf32>
    %135 = vector.extract_strided_slice %120 {offsets = [0, 384], sizes = [8, 50], strides = [1, 1]} : vector<8x512xf32> to vector<8x50xf32>
    %136 = arith.negf %135 : vector<8x50xf32>
    %137 = math.exp %136 : vector<8x50xf32>
    %cst_50 = arith.constant 1.000000e+00 : f32
    %138 = vector.broadcast %cst_50 : f32 to vector<8x50xf32>
    %139 = arith.addf %138, %137 : vector<8x50xf32>
    %140 = arith.divf %138, %139 : vector<8x50xf32>
    %141 = arith.mulf %132, %112 : vector<8x50xf32>
    %142 = arith.mulf %126, %134 : vector<8x50xf32>
    %143 = arith.addf %141, %142 : vector<8x50xf32>
    %144 = math.tanh %143 : vector<8x50xf32>
    %145 = arith.mulf %140, %144 : vector<8x50xf32>
    %c3 = arith.constant 3 : index
    %c0_51 = arith.constant 0 : index
    %c0_52 = arith.constant 0 : index
    %146 = vector.load %arg15[%c3, %c0_51, %c0_52] : memref<30x8x50xf32, #tpu.memory_space<vmem>>, vector<1x8x50xf32>
    %147 = vector.shape_cast %146 : vector<1x8x50xf32> to vector<8x50xf32>
    %148 = vector.shape_cast %145 : vector<8x50xf32> to vector<1x8x50xf32>
    tpu.vector_store %arg15[%c3, %c0_51, %c0_52], %148 {strides = array<i32>} : memref<30x8x50xf32, #tpu.memory_space<vmem>>, vector<1x8x50xf32>,
    %c32 = arith.constant 32 : index
    %c0_53 = arith.constant 0 : index
    %149 = vector.load %arg14[%c32, %c0_53] : memref<240x512xf32, #tpu.memory_space<vmem>>, vector<8x512xf32>
    %cst_54 = arith.constant dense<0.000000e+00> : vector<8x512xf32>
    %150 = tpu.matmul %145, %22, %cst_54 {dimension_numbers = #tpu.dot_dimension_numbers<[1], [0], [0], [1], [0, 0, 1, 1], [], []>} : vector<8x50xf32>, vector<50x512xf32>, vector<8x512xf32> -> vector<8x512xf32>
    %151 = arith.addf %149, %150 : vector<8x512xf32>
    %152 = vector.extract_strided_slice %151 {offsets = [0, 0], sizes = [8, 50], strides = [1, 1]} : vector<8x512xf32> to vector<8x50xf32>
    %153 = arith.negf %152 : vector<8x50xf32>
    %154 = math.exp %153 : vector<8x50xf32>
    %cst_55 = arith.constant 1.000000e+00 : f32
    %155 = vector.broadcast %cst_55 : f32 to vector<8x50xf32>
    %156 = arith.addf %155, %154 : vector<8x50xf32>
    %157 = arith.divf %155, %156 : vector<8x50xf32>
    %158 = vector.extract_strided_slice %151 {offsets = [0, 128], sizes = [8, 50], strides = [1, 1]} : vector<8x512xf32> to vector<8x50xf32>
    %159 = arith.negf %158 : vector<8x50xf32>
    %160 = math.exp %159 : vector<8x50xf32>
    %cst_56 = arith.constant 1.000000e+00 : f32
    %161 = vector.broadcast %cst_56 : f32 to vector<8x50xf32>
    %162 = arith.addf %161, %160 : vector<8x50xf32>
    %163 = arith.divf %161, %162 : vector<8x50xf32>
    %164 = vector.extract_strided_slice %151 {offsets = [0, 256], sizes = [8, 50], strides = [1, 1]} : vector<8x512xf32> to vector<8x50xf32>
    %165 = math.tanh %164 : vector<8x50xf32>
    %166 = vector.extract_strided_slice %151 {offsets = [0, 384], sizes = [8, 50], strides = [1, 1]} : vector<8x512xf32> to vector<8x50xf32>
    %167 = arith.negf %166 : vector<8x50xf32>
    %168 = math.exp %167 : vector<8x50xf32>
    %cst_57 = arith.constant 1.000000e+00 : f32
    %169 = vector.broadcast %cst_57 : f32 to vector<8x50xf32>
    %170 = arith.addf %169, %168 : vector<8x50xf32>
    %171 = arith.divf %169, %170 : vector<8x50xf32>
    %172 = arith.mulf %163, %143 : vector<8x50xf32>
    %173 = arith.mulf %157, %165 : vector<8x50xf32>
    %174 = arith.addf %172, %173 : vector<8x50xf32>
    %175 = math.tanh %174 : vector<8x50xf32>
    %176 = arith.mulf %171, %175 : vector<8x50xf32>
    %c4 = arith.constant 4 : index
    %c0_58 = arith.constant 0 : index
    %c0_59 = arith.constant 0 : index
    %177 = vector.load %arg15[%c4, %c0_58, %c0_59] : memref<30x8x50xf32, #tpu.memory_space<vmem>>, vector<1x8x50xf32>
    %178 = vector.shape_cast %177 : vector<1x8x50xf32> to vector<8x50xf32>
    %179 = vector.shape_cast %176 : vector<8x50xf32> to vector<1x8x50xf32>
    tpu.vector_store %arg15[%c4, %c0_58, %c0_59], %179 {strides = array<i32>} : memref<30x8x50xf32, #tpu.memory_space<vmem>>, vector<1x8x50xf32>,
    %c40 = arith.constant 40 : index
    %c0_60 = arith.constant 0 : index
    %180 = vector.load %arg14[%c40, %c0_60] : memref<240x512xf32, #tpu.memory_space<vmem>>, vector<8x512xf32>
    %cst_61 = arith.constant dense<0.000000e+00> : vector<8x512xf32>
    %181 = tpu.matmul %176, %22, %cst_61 {dimension_numbers = #tpu.dot_dimension_numbers<[1], [0], [0], [1], [0, 0, 1, 1], [], []>} : vector<8x50xf32>, vector<50x512xf32>, vector<8x512xf32> -> vector<8x512xf32>
    %182 = arith.addf %180, %181 : vector<8x512xf32>
    %183 = vector.extract_strided_slice %182 {offsets = [0, 0], sizes = [8, 50], strides = [1, 1]} : vector<8x512xf32> to vector<8x50xf32>
    %184 = arith.negf %183 : vector<8x50xf32>
    %185 = math.exp %184 : vector<8x50xf32>
    %cst_62 = arith.constant 1.000000e+00 : f32
    %186 = vector.broadcast %cst_62 : f32 to vector<8x50xf32>
    %187 = arith.addf %186, %185 : vector<8x50xf32>
    %188 = arith.divf %186, %187 : vector<8x50xf32>
    %189 = vector.extract_strided_slice %182 {offsets = [0, 128], sizes = [8, 50], strides = [1, 1]} : vector<8x512xf32> to vector<8x50xf32>
    %190 = arith.negf %189 : vector<8x50xf32>
    %191 = math.exp %190 : vector<8x50xf32>
    %cst_63 = arith.constant 1.000000e+00 : f32
    %192 = vector.broadcast %cst_63 : f32 to vector<8x50xf32>
    %193 = arith.addf %192, %191 : vector<8x50xf32>
    %194 = arith.divf %192, %193 : vector<8x50xf32>
    %195 = vector.extract_strided_slice %182 {offsets = [0, 256], sizes = [8, 50], strides = [1, 1]} : vector<8x512xf32> to vector<8x50xf32>
    %196 = math.tanh %195 : vector<8x50xf32>
    %197 = vector.extract_strided_slice %182 {offsets = [0, 384], sizes = [8, 50], strides = [1, 1]} : vector<8x512xf32> to vector<8x50xf32>
    %198 = arith.negf %197 : vector<8x50xf32>
    %199 = math.exp %198 : vector<8x50xf32>
    %cst_64 = arith.constant 1.000000e+00 : f32
    %200 = vector.broadcast %cst_64 : f32 to vector<8x50xf32>
    %201 = arith.addf %200, %199 : vector<8x50xf32>
    %202 = arith.divf %200, %201 : vector<8x50xf32>
    %203 = arith.mulf %194, %174 : vector<8x50xf32>
    %204 = arith.mulf %188, %196 : vector<8x50xf32>
    %205 = arith.addf %203, %204 : vector<8x50xf32>
    %206 = math.tanh %205 : vector<8x50xf32>
    %207 = arith.mulf %202, %206 : vector<8x50xf32>
    %c5 = arith.constant 5 : index
    %c0_65 = arith.constant 0 : index
    %c0_66 = arith.constant 0 : index
    %208 = vector.load %arg15[%c5, %c0_65, %c0_66] : memref<30x8x50xf32, #tpu.memory_space<vmem>>, vector<1x8x50xf32>
    %209 = vector.shape_cast %208 : vector<1x8x50xf32> to vector<8x50xf32>
    %210 = vector.shape_cast %207 : vector<8x50xf32> to vector<1x8x50xf32>
    tpu.vector_store %arg15[%c5, %c0_65, %c0_66], %210 {strides = array<i32>} : memref<30x8x50xf32, #tpu.memory_space<vmem>>, vector<1x8x50xf32>,
    %c48 = arith.constant 48 : index
    %c0_67 = arith.constant 0 : index
    %211 = vector.load %arg14[%c48, %c0_67] : memref<240x512xf32, #tpu.memory_space<vmem>>, vector<8x512xf32>
    %cst_68 = arith.constant dense<0.000000e+00> : vector<8x512xf32>
    %212 = tpu.matmul %207, %22, %cst_68 {dimension_numbers = #tpu.dot_dimension_numbers<[1], [0], [0], [1], [0, 0, 1, 1], [], []>} : vector<8x50xf32>, vector<50x512xf32>, vector<8x512xf32> -> vector<8x512xf32>
    %213 = arith.addf %211, %212 : vector<8x512xf32>
    %214 = vector.extract_strided_slice %213 {offsets = [0, 0], sizes = [8, 50], strides = [1, 1]} : vector<8x512xf32> to vector<8x50xf32>
    %215 = arith.negf %214 : vector<8x50xf32>
    %216 = math.exp %215 : vector<8x50xf32>
    %cst_69 = arith.constant 1.000000e+00 : f32
    %217 = vector.broadcast %cst_69 : f32 to vector<8x50xf32>
    %218 = arith.addf %217, %216 : vector<8x50xf32>
    %219 = arith.divf %217, %218 : vector<8x50xf32>
    %220 = vector.extract_strided_slice %213 {offsets = [0, 128], sizes = [8, 50], strides = [1, 1]} : vector<8x512xf32> to vector<8x50xf32>
    %221 = arith.negf %220 : vector<8x50xf32>
    %222 = math.exp %221 : vector<8x50xf32>
    %cst_70 = arith.constant 1.000000e+00 : f32
    %223 = vector.broadcast %cst_70 : f32 to vector<8x50xf32>
    %224 = arith.addf %223, %222 : vector<8x50xf32>
    %225 = arith.divf %223, %224 : vector<8x50xf32>
    %226 = vector.extract_strided_slice %213 {offsets = [0, 256], sizes = [8, 50], strides = [1, 1]} : vector<8x512xf32> to vector<8x50xf32>
    %227 = math.tanh %226 : vector<8x50xf32>
    %228 = vector.extract_strided_slice %213 {offsets = [0, 384], sizes = [8, 50], strides = [1, 1]} : vector<8x512xf32> to vector<8x50xf32>
    %229 = arith.negf %228 : vector<8x50xf32>
    %230 = math.exp %229 : vector<8x50xf32>
    %cst_71 = arith.constant 1.000000e+00 : f32
    %231 = vector.broadcast %cst_71 : f32 to vector<8x50xf32>
    %232 = arith.addf %231, %230 : vector<8x50xf32>
    %233 = arith.divf %231, %232 : vector<8x50xf32>
    %234 = arith.mulf %225, %205 : vector<8x50xf32>
    %235 = arith.mulf %219, %227 : vector<8x50xf32>
    %236 = arith.addf %234, %235 : vector<8x50xf32>
    %237 = math.tanh %236 : vector<8x50xf32>
    %238 = arith.mulf %233, %237 : vector<8x50xf32>
    %c6 = arith.constant 6 : index
    %c0_72 = arith.constant 0 : index
    %c0_73 = arith.constant 0 : index
    %239 = vector.load %arg15[%c6, %c0_72, %c0_73] : memref<30x8x50xf32, #tpu.memory_space<vmem>>, vector<1x8x50xf32>
    %240 = vector.shape_cast %239 : vector<1x8x50xf32> to vector<8x50xf32>
    %241 = vector.shape_cast %238 : vector<8x50xf32> to vector<1x8x50xf32>
    tpu.vector_store %arg15[%c6, %c0_72, %c0_73], %241 {strides = array<i32>} : memref<30x8x50xf32, #tpu.memory_space<vmem>>, vector<1x8x50xf32>,
    %c56 = arith.constant 56 : index
    %c0_74 = arith.constant 0 : index
    %242 = vector.load %arg14[%c56, %c0_74] : memref<240x512xf32, #tpu.memory_space<vmem>>, vector<8x512xf32>
    %cst_75 = arith.constant dense<0.000000e+00> : vector<8x512xf32>
    %243 = tpu.matmul %238, %22, %cst_75 {dimension_numbers = #tpu.dot_dimension_numbers<[1], [0], [0], [1], [0, 0, 1, 1], [], []>} : vector<8x50xf32>, vector<50x512xf32>, vector<8x512xf32> -> vector<8x512xf32>
    %244 = arith.addf %242, %243 : vector<8x512xf32>
    %245 = vector.extract_strided_slice %244 {offsets = [0, 0], sizes = [8, 50], strides = [1, 1]} : vector<8x512xf32> to vector<8x50xf32>
    %246 = arith.negf %245 : vector<8x50xf32>
    %247 = math.exp %246 : vector<8x50xf32>
    %cst_76 = arith.constant 1.000000e+00 : f32
    %248 = vector.broadcast %cst_76 : f32 to vector<8x50xf32>
    %249 = arith.addf %248, %247 : vector<8x50xf32>
    %250 = arith.divf %248, %249 : vector<8x50xf32>
    %251 = vector.extract_strided_slice %244 {offsets = [0, 128], sizes = [8, 50], strides = [1, 1]} : vector<8x512xf32> to vector<8x50xf32>
    %252 = arith.negf %251 : vector<8x50xf32>
    %253 = math.exp %252 : vector<8x50xf32>
    %cst_77 = arith.constant 1.000000e+00 : f32
    %254 = vector.broadcast %cst_77 : f32 to vector<8x50xf32>
    %255 = arith.addf %254, %253 : vector<8x50xf32>
    %256 = arith.divf %254, %255 : vector<8x50xf32>
    %257 = vector.extract_strided_slice %244 {offsets = [0, 256], sizes = [8, 50], strides = [1, 1]} : vector<8x512xf32> to vector<8x50xf32>
    %258 = math.tanh %257 : vector<8x50xf32>
    %259 = vector.extract_strided_slice %244 {offsets = [0, 384], sizes = [8, 50], strides = [1, 1]} : vector<8x512xf32> to vector<8x50xf32>
    %260 = arith.negf %259 : vector<8x50xf32>
    %261 = math.exp %260 : vector<8x50xf32>
    %cst_78 = arith.constant 1.000000e+00 : f32
    %262 = vector.broadcast %cst_78 : f32 to vector<8x50xf32>
    %263 = arith.addf %262, %261 : vector<8x50xf32>
    %264 = arith.divf %262, %263 : vector<8x50xf32>
    %265 = arith.mulf %256, %236 : vector<8x50xf32>
    %266 = arith.mulf %250, %258 : vector<8x50xf32>
    %267 = arith.addf %265, %266 : vector<8x50xf32>
    %268 = math.tanh %267 : vector<8x50xf32>
    %269 = arith.mulf %264, %268 : vector<8x50xf32>
    %c7 = arith.constant 7 : index
    %c0_79 = arith.constant 0 : index
    %c0_80 = arith.constant 0 : index
    %270 = vector.load %arg15[%c7, %c0_79, %c0_80] : memref<30x8x50xf32, #tpu.memory_space<vmem>>, vector<1x8x50xf32>
    %271 = vector.shape_cast %270 : vector<1x8x50xf32> to vector<8x50xf32>
    %272 = vector.shape_cast %269 : vector<8x50xf32> to vector<1x8x50xf32>
    tpu.vector_store %arg15[%c7, %c0_79, %c0_80], %272 {strides = array<i32>} : memref<30x8x50xf32, #tpu.memory_space<vmem>>, vector<1x8x50xf32>,
    %c64_81 = arith.constant 64 : index
    %c0_82 = arith.constant 0 : index
    %273 = vector.load %arg14[%c64_81, %c0_82] : memref<240x512xf32, #tpu.memory_space<vmem>>, vector<8x512xf32>
    %cst_83 = arith.constant dense<0.000000e+00> : vector<8x512xf32>
    %274 = tpu.matmul %269, %22, %cst_83 {dimension_numbers = #tpu.dot_dimension_numbers<[1], [0], [0], [1], [0, 0, 1, 1], [], []>} : vector<8x50xf32>, vector<50x512xf32>, vector<8x512xf32> -> vector<8x512xf32>
    %275 = arith.addf %273, %274 : vector<8x512xf32>
    %276 = vector.extract_strided_slice %275 {offsets = [0, 0], sizes = [8, 50], strides = [1, 1]} : vector<8x512xf32> to vector<8x50xf32>
    %277 = arith.negf %276 : vector<8x50xf32>
    %278 = math.exp %277 : vector<8x50xf32>
    %cst_84 = arith.constant 1.000000e+00 : f32
    %279 = vector.broadcast %cst_84 : f32 to vector<8x50xf32>
    %280 = arith.addf %279, %278 : vector<8x50xf32>
    %281 = arith.divf %279, %280 : vector<8x50xf32>
    %282 = vector.extract_strided_slice %275 {offsets = [0, 128], sizes = [8, 50], strides = [1, 1]} : vector<8x512xf32> to vector<8x50xf32>
    %283 = arith.negf %282 : vector<8x50xf32>
    %284 = math.exp %283 : vector<8x50xf32>
    %cst_85 = arith.constant 1.000000e+00 : f32
    %285 = vector.broadcast %cst_85 : f32 to vector<8x50xf32>
    %286 = arith.addf %285, %284 : vector<8x50xf32>
    %287 = arith.divf %285, %286 : vector<8x50xf32>
    %288 = vector.extract_strided_slice %275 {offsets = [0, 256], sizes = [8, 50], strides = [1, 1]} : vector<8x512xf32> to vector<8x50xf32>
    %289 = math.tanh %288 : vector<8x50xf32>
    %290 = vector.extract_strided_slice %275 {offsets = [0, 384], sizes = [8, 50], strides = [1, 1]} : vector<8x512xf32> to vector<8x50xf32>
    %291 = arith.negf %290 : vector<8x50xf32>
    %292 = math.exp %291 : vector<8x50xf32>
    %cst_86 = arith.constant 1.000000e+00 : f32
    %293 = vector.broadcast %cst_86 : f32 to vector<8x50xf32>
    %294 = arith.addf %293, %292 : vector<8x50xf32>
    %295 = arith.divf %293, %294 : vector<8x50xf32>
    %296 = arith.mulf %287, %267 : vector<8x50xf32>
    %297 = arith.mulf %281, %289 : vector<8x50xf32>
    %298 = arith.addf %296, %297 : vector<8x50xf32>
    %299 = math.tanh %298 : vector<8x50xf32>
    %300 = arith.mulf %295, %299 : vector<8x50xf32>
    %c8_87 = arith.constant 8 : index
    %c0_88 = arith.constant 0 : index
    %c0_89 = arith.constant 0 : index
    %301 = vector.load %arg15[%c8_87, %c0_88, %c0_89] : memref<30x8x50xf32, #tpu.memory_space<vmem>>, vector<1x8x50xf32>
    %302 = vector.shape_cast %301 : vector<1x8x50xf32> to vector<8x50xf32>
    %303 = vector.shape_cast %300 : vector<8x50xf32> to vector<1x8x50xf32>
    tpu.vector_store %arg15[%c8_87, %c0_88, %c0_89], %303 {strides = array<i32>} : memref<30x8x50xf32, #tpu.memory_space<vmem>>, vector<1x8x50xf32>,
    %c72 = arith.constant 72 : index
    %c0_90 = arith.constant 0 : index
    %304 = vector.load %arg14[%c72, %c0_90] : memref<240x512xf32, #tpu.memory_space<vmem>>, vector<8x512xf32>
    %cst_91 = arith.constant dense<0.000000e+00> : vector<8x512xf32>
    %305 = tpu.matmul %300, %22, %cst_91 {dimension_numbers = #tpu.dot_dimension_numbers<[1], [0], [0], [1], [0, 0, 1, 1], [], []>} : vector<8x50xf32>, vector<50x512xf32>, vector<8x512xf32> -> vector<8x512xf32>
    %306 = arith.addf %304, %305 : vector<8x512xf32>
    %307 = vector.extract_strided_slice %306 {offsets = [0, 0], sizes = [8, 50], strides = [1, 1]} : vector<8x512xf32> to vector<8x50xf32>
    %308 = arith.negf %307 : vector<8x50xf32>
    %309 = math.exp %308 : vector<8x50xf32>
    %cst_92 = arith.constant 1.000000e+00 : f32
    %310 = vector.broadcast %cst_92 : f32 to vector<8x50xf32>
    %311 = arith.addf %310, %309 : vector<8x50xf32>
    %312 = arith.divf %310, %311 : vector<8x50xf32>
    %313 = vector.extract_strided_slice %306 {offsets = [0, 128], sizes = [8, 50], strides = [1, 1]} : vector<8x512xf32> to vector<8x50xf32>
    %314 = arith.negf %313 : vector<8x50xf32>
    %315 = math.exp %314 : vector<8x50xf32>
    %cst_93 = arith.constant 1.000000e+00 : f32
    %316 = vector.broadcast %cst_93 : f32 to vector<8x50xf32>
    %317 = arith.addf %316, %315 : vector<8x50xf32>
    %318 = arith.divf %316, %317 : vector<8x50xf32>
    %319 = vector.extract_strided_slice %306 {offsets = [0, 256], sizes = [8, 50], strides = [1, 1]} : vector<8x512xf32> to vector<8x50xf32>
    %320 = math.tanh %319 : vector<8x50xf32>
    %321 = vector.extract_strided_slice %306 {offsets = [0, 384], sizes = [8, 50], strides = [1, 1]} : vector<8x512xf32> to vector<8x50xf32>
    %322 = arith.negf %321 : vector<8x50xf32>
    %323 = math.exp %322 : vector<8x50xf32>
    %cst_94 = arith.constant 1.000000e+00 : f32
    %324 = vector.broadcast %cst_94 : f32 to vector<8x50xf32>
    %325 = arith.addf %324, %323 : vector<8x50xf32>
    %326 = arith.divf %324, %325 : vector<8x50xf32>
    %327 = arith.mulf %318, %298 : vector<8x50xf32>
    %328 = arith.mulf %312, %320 : vector<8x50xf32>
    %329 = arith.addf %327, %328 : vector<8x50xf32>
    %330 = math.tanh %329 : vector<8x50xf32>
    %331 = arith.mulf %326, %330 : vector<8x50xf32>
    %c9 = arith.constant 9 : index
    %c0_95 = arith.constant 0 : index
    %c0_96 = arith.constant 0 : index
    %332 = vector.load %arg15[%c9, %c0_95, %c0_96] : memref<30x8x50xf32, #tpu.memory_space<vmem>>, vector<1x8x50xf32>
    %333 = vector.shape_cast %332 : vector<1x8x50xf32> to vector<8x50xf32>
    %334 = vector.shape_cast %331 : vector<8x50xf32> to vector<1x8x50xf32>
    tpu.vector_store %arg15[%c9, %c0_95, %c0_96], %334 {strides = array<i32>} : memref<30x8x50xf32, #tpu.memory_space<vmem>>, vector<1x8x50xf32>,
    %c80 = arith.constant 80 : index
    %c0_97 = arith.constant 0 : index
    %335 = vector.load %arg14[%c80, %c0_97] : memref<240x512xf32, #tpu.memory_space<vmem>>, vector<8x512xf32>
    %cst_98 = arith.constant dense<0.000000e+00> : vector<8x512xf32>
    %336 = tpu.matmul %331, %22, %cst_98 {dimension_numbers = #tpu.dot_dimension_numbers<[1], [0], [0], [1], [0, 0, 1, 1], [], []>} : vector<8x50xf32>, vector<50x512xf32>, vector<8x512xf32> -> vector<8x512xf32>
    %337 = arith.addf %335, %336 : vector<8x512xf32>
    %338 = vector.extract_strided_slice %337 {offsets = [0, 0], sizes = [8, 50], strides = [1, 1]} : vector<8x512xf32> to vector<8x50xf32>
    %339 = arith.negf %338 : vector<8x50xf32>
    %340 = math.exp %339 : vector<8x50xf32>
    %cst_99 = arith.constant 1.000000e+00 : f32
    %341 = vector.broadcast %cst_99 : f32 to vector<8x50xf32>
    %342 = arith.addf %341, %340 : vector<8x50xf32>
    %343 = arith.divf %341, %342 : vector<8x50xf32>
    %344 = vector.extract_strided_slice %337 {offsets = [0, 128], sizes = [8, 50], strides = [1, 1]} : vector<8x512xf32> to vector<8x50xf32>
    %345 = arith.negf %344 : vector<8x50xf32>
    %346 = math.exp %345 : vector<8x50xf32>
    %cst_100 = arith.constant 1.000000e+00 : f32
    %347 = vector.broadcast %cst_100 : f32 to vector<8x50xf32>
    %348 = arith.addf %347, %346 : vector<8x50xf32>
    %349 = arith.divf %347, %348 : vector<8x50xf32>
    %350 = vector.extract_strided_slice %337 {offsets = [0, 256], sizes = [8, 50], strides = [1, 1]} : vector<8x512xf32> to vector<8x50xf32>
    %351 = math.tanh %350 : vector<8x50xf32>
    %352 = vector.extract_strided_slice %337 {offsets = [0, 384], sizes = [8, 50], strides = [1, 1]} : vector<8x512xf32> to vector<8x50xf32>
    %353 = arith.negf %352 : vector<8x50xf32>
    %354 = math.exp %353 : vector<8x50xf32>
    %cst_101 = arith.constant 1.000000e+00 : f32
    %355 = vector.broadcast %cst_101 : f32 to vector<8x50xf32>
    %356 = arith.addf %355, %354 : vector<8x50xf32>
    %357 = arith.divf %355, %356 : vector<8x50xf32>
    %358 = arith.mulf %349, %329 : vector<8x50xf32>
    %359 = arith.mulf %343, %351 : vector<8x50xf32>
    %360 = arith.addf %358, %359 : vector<8x50xf32>
    %361 = math.tanh %360 : vector<8x50xf32>
    %362 = arith.mulf %357, %361 : vector<8x50xf32>
    %c10 = arith.constant 10 : index
    %c0_102 = arith.constant 0 : index
    %c0_103 = arith.constant 0 : index
    %363 = vector.load %arg15[%c10, %c0_102, %c0_103] : memref<30x8x50xf32, #tpu.memory_space<vmem>>, vector<1x8x50xf32>
    %364 = vector.shape_cast %363 : vector<1x8x50xf32> to vector<8x50xf32>
    %365 = vector.shape_cast %362 : vector<8x50xf32> to vector<1x8x50xf32>
    tpu.vector_store %arg15[%c10, %c0_102, %c0_103], %365 {strides = array<i32>} : memref<30x8x50xf32, #tpu.memory_space<vmem>>, vector<1x8x50xf32>,
    %c88 = arith.constant 88 : index
    %c0_104 = arith.constant 0 : index
    %366 = vector.load %arg14[%c88, %c0_104] : memref<240x512xf32, #tpu.memory_space<vmem>>, vector<8x512xf32>
    %cst_105 = arith.constant dense<0.000000e+00> : vector<8x512xf32>
    %367 = tpu.matmul %362, %22, %cst_105 {dimension_numbers = #tpu.dot_dimension_numbers<[1], [0], [0], [1], [0, 0, 1, 1], [], []>} : vector<8x50xf32>, vector<50x512xf32>, vector<8x512xf32> -> vector<8x512xf32>
    %368 = arith.addf %366, %367 : vector<8x512xf32>
    %369 = vector.extract_strided_slice %368 {offsets = [0, 0], sizes = [8, 50], strides = [1, 1]} : vector<8x512xf32> to vector<8x50xf32>
    %370 = arith.negf %369 : vector<8x50xf32>
    %371 = math.exp %370 : vector<8x50xf32>
    %cst_106 = arith.constant 1.000000e+00 : f32
    %372 = vector.broadcast %cst_106 : f32 to vector<8x50xf32>
    %373 = arith.addf %372, %371 : vector<8x50xf32>
    %374 = arith.divf %372, %373 : vector<8x50xf32>
    %375 = vector.extract_strided_slice %368 {offsets = [0, 128], sizes = [8, 50], strides = [1, 1]} : vector<8x512xf32> to vector<8x50xf32>
    %376 = arith.negf %375 : vector<8x50xf32>
    %377 = math.exp %376 : vector<8x50xf32>
    %cst_107 = arith.constant 1.000000e+00 : f32
    %378 = vector.broadcast %cst_107 : f32 to vector<8x50xf32>
    %379 = arith.addf %378, %377 : vector<8x50xf32>
    %380 = arith.divf %378, %379 : vector<8x50xf32>
    %381 = vector.extract_strided_slice %368 {offsets = [0, 256], sizes = [8, 50], strides = [1, 1]} : vector<8x512xf32> to vector<8x50xf32>
    %382 = math.tanh %381 : vector<8x50xf32>
    %383 = vector.extract_strided_slice %368 {offsets = [0, 384], sizes = [8, 50], strides = [1, 1]} : vector<8x512xf32> to vector<8x50xf32>
    %384 = arith.negf %383 : vector<8x50xf32>
    %385 = math.exp %384 : vector<8x50xf32>
    %cst_108 = arith.constant 1.000000e+00 : f32
    %386 = vector.broadcast %cst_108 : f32 to vector<8x50xf32>
    %387 = arith.addf %386, %385 : vector<8x50xf32>
    %388 = arith.divf %386, %387 : vector<8x50xf32>
    %389 = arith.mulf %380, %360 : vector<8x50xf32>
    %390 = arith.mulf %374, %382 : vector<8x50xf32>
    %391 = arith.addf %389, %390 : vector<8x50xf32>
    %392 = math.tanh %391 : vector<8x50xf32>
    %393 = arith.mulf %388, %392 : vector<8x50xf32>
    %c11 = arith.constant 11 : index
    %c0_109 = arith.constant 0 : index
    %c0_110 = arith.constant 0 : index
    %394 = vector.load %arg15[%c11, %c0_109, %c0_110] : memref<30x8x50xf32, #tpu.memory_space<vmem>>, vector<1x8x50xf32>
    %395 = vector.shape_cast %394 : vector<1x8x50xf32> to vector<8x50xf32>
    %396 = vector.shape_cast %393 : vector<8x50xf32> to vector<1x8x50xf32>
    tpu.vector_store %arg15[%c11, %c0_109, %c0_110], %396 {strides = array<i32>} : memref<30x8x50xf32, #tpu.memory_space<vmem>>, vector<1x8x50xf32>,
    %c96 = arith.constant 96 : index
    %c0_111 = arith.constant 0 : index
    %397 = vector.load %arg14[%c96, %c0_111] : memref<240x512xf32, #tpu.memory_space<vmem>>, vector<8x512xf32>
    %cst_112 = arith.constant dense<0.000000e+00> : vector<8x512xf32>
    %398 = tpu.matmul %393, %22, %cst_112 {dimension_numbers = #tpu.dot_dimension_numbers<[1], [0], [0], [1], [0, 0, 1, 1], [], []>} : vector<8x50xf32>, vector<50x512xf32>, vector<8x512xf32> -> vector<8x512xf32>
    %399 = arith.addf %397, %398 : vector<8x512xf32>
    %400 = vector.extract_strided_slice %399 {offsets = [0, 0], sizes = [8, 50], strides = [1, 1]} : vector<8x512xf32> to vector<8x50xf32>
    %401 = arith.negf %400 : vector<8x50xf32>
    %402 = math.exp %401 : vector<8x50xf32>
    %cst_113 = arith.constant 1.000000e+00 : f32
    %403 = vector.broadcast %cst_113 : f32 to vector<8x50xf32>
    %404 = arith.addf %403, %402 : vector<8x50xf32>
    %405 = arith.divf %403, %404 : vector<8x50xf32>
    %406 = vector.extract_strided_slice %399 {offsets = [0, 128], sizes = [8, 50], strides = [1, 1]} : vector<8x512xf32> to vector<8x50xf32>
    %407 = arith.negf %406 : vector<8x50xf32>
    %408 = math.exp %407 : vector<8x50xf32>
    %cst_114 = arith.constant 1.000000e+00 : f32
    %409 = vector.broadcast %cst_114 : f32 to vector<8x50xf32>
    %410 = arith.addf %409, %408 : vector<8x50xf32>
    %411 = arith.divf %409, %410 : vector<8x50xf32>
    %412 = vector.extract_strided_slice %399 {offsets = [0, 256], sizes = [8, 50], strides = [1, 1]} : vector<8x512xf32> to vector<8x50xf32>
    %413 = math.tanh %412 : vector<8x50xf32>
    %414 = vector.extract_strided_slice %399 {offsets = [0, 384], sizes = [8, 50], strides = [1, 1]} : vector<8x512xf32> to vector<8x50xf32>
    %415 = arith.negf %414 : vector<8x50xf32>
    %416 = math.exp %415 : vector<8x50xf32>
    %cst_115 = arith.constant 1.000000e+00 : f32
    %417 = vector.broadcast %cst_115 : f32 to vector<8x50xf32>
    %418 = arith.addf %417, %416 : vector<8x50xf32>
    %419 = arith.divf %417, %418 : vector<8x50xf32>
    %420 = arith.mulf %411, %391 : vector<8x50xf32>
    %421 = arith.mulf %405, %413 : vector<8x50xf32>
    %422 = arith.addf %420, %421 : vector<8x50xf32>
    %423 = math.tanh %422 : vector<8x50xf32>
    %424 = arith.mulf %419, %423 : vector<8x50xf32>
    %c12 = arith.constant 12 : index
    %c0_116 = arith.constant 0 : index
    %c0_117 = arith.constant 0 : index
    %425 = vector.load %arg15[%c12, %c0_116, %c0_117] : memref<30x8x50xf32, #tpu.memory_space<vmem>>, vector<1x8x50xf32>
    %426 = vector.shape_cast %425 : vector<1x8x50xf32> to vector<8x50xf32>
    %427 = vector.shape_cast %424 : vector<8x50xf32> to vector<1x8x50xf32>
    tpu.vector_store %arg15[%c12, %c0_116, %c0_117], %427 {strides = array<i32>} : memref<30x8x50xf32, #tpu.memory_space<vmem>>, vector<1x8x50xf32>,
    %c104 = arith.constant 104 : index
    %c0_118 = arith.constant 0 : index
    %428 = vector.load %arg14[%c104, %c0_118] : memref<240x512xf32, #tpu.memory_space<vmem>>, vector<8x512xf32>
    %cst_119 = arith.constant dense<0.000000e+00> : vector<8x512xf32>
    %429 = tpu.matmul %424, %22, %cst_119 {dimension_numbers = #tpu.dot_dimension_numbers<[1], [0], [0], [1], [0, 0, 1, 1], [], []>} : vector<8x50xf32>, vector<50x512xf32>, vector<8x512xf32> -> vector<8x512xf32>
    %430 = arith.addf %428, %429 : vector<8x512xf32>
    %431 = vector.extract_strided_slice %430 {offsets = [0, 0], sizes = [8, 50], strides = [1, 1]} : vector<8x512xf32> to vector<8x50xf32>
    %432 = arith.negf %431 : vector<8x50xf32>
    %433 = math.exp %432 : vector<8x50xf32>
    %cst_120 = arith.constant 1.000000e+00 : f32
    %434 = vector.broadcast %cst_120 : f32 to vector<8x50xf32>
    %435 = arith.addf %434, %433 : vector<8x50xf32>
    %436 = arith.divf %434, %435 : vector<8x50xf32>
    %437 = vector.extract_strided_slice %430 {offsets = [0, 128], sizes = [8, 50], strides = [1, 1]} : vector<8x512xf32> to vector<8x50xf32>
    %438 = arith.negf %437 : vector<8x50xf32>
    %439 = math.exp %438 : vector<8x50xf32>
    %cst_121 = arith.constant 1.000000e+00 : f32
    %440 = vector.broadcast %cst_121 : f32 to vector<8x50xf32>
    %441 = arith.addf %440, %439 : vector<8x50xf32>
    %442 = arith.divf %440, %441 : vector<8x50xf32>
    %443 = vector.extract_strided_slice %430 {offsets = [0, 256], sizes = [8, 50], strides = [1, 1]} : vector<8x512xf32> to vector<8x50xf32>
    %444 = math.tanh %443 : vector<8x50xf32>
    %445 = vector.extract_strided_slice %430 {offsets = [0, 384], sizes = [8, 50], strides = [1, 1]} : vector<8x512xf32> to vector<8x50xf32>
    %446 = arith.negf %445 : vector<8x50xf32>
    %447 = math.exp %446 : vector<8x50xf32>
    %cst_122 = arith.constant 1.000000e+00 : f32
    %448 = vector.broadcast %cst_122 : f32 to vector<8x50xf32>
    %449 = arith.addf %448, %447 : vector<8x50xf32>
    %450 = arith.divf %448, %449 : vector<8x50xf32>
    %451 = arith.mulf %442, %422 : vector<8x50xf32>
    %452 = arith.mulf %436, %444 : vector<8x50xf32>
    %453 = arith.addf %451, %452 : vector<8x50xf32>
    %454 = math.tanh %453 : vector<8x50xf32>
    %455 = arith.mulf %450, %454 : vector<8x50xf32>
    %c13 = arith.constant 13 : index
    %c0_123 = arith.constant 0 : index
    %c0_124 = arith.constant 0 : index
    %456 = vector.load %arg15[%c13, %c0_123, %c0_124] : memref<30x8x50xf32, #tpu.memory_space<vmem>>, vector<1x8x50xf32>
    %457 = vector.shape_cast %456 : vector<1x8x50xf32> to vector<8x50xf32>
    %458 = vector.shape_cast %455 : vector<8x50xf32> to vector<1x8x50xf32>
    tpu.vector_store %arg15[%c13, %c0_123, %c0_124], %458 {strides = array<i32>} : memref<30x8x50xf32, #tpu.memory_space<vmem>>, vector<1x8x50xf32>,
    %c112 = arith.constant 112 : index
    %c0_125 = arith.constant 0 : index
    %459 = vector.load %arg14[%c112, %c0_125] : memref<240x512xf32, #tpu.memory_space<vmem>>, vector<8x512xf32>
    %cst_126 = arith.constant dense<0.000000e+00> : vector<8x512xf32>
    %460 = tpu.matmul %455, %22, %cst_126 {dimension_numbers = #tpu.dot_dimension_numbers<[1], [0], [0], [1], [0, 0, 1, 1], [], []>} : vector<8x50xf32>, vector<50x512xf32>, vector<8x512xf32> -> vector<8x512xf32>
    %461 = arith.addf %459, %460 : vector<8x512xf32>
    %462 = vector.extract_strided_slice %461 {offsets = [0, 0], sizes = [8, 50], strides = [1, 1]} : vector<8x512xf32> to vector<8x50xf32>
    %463 = arith.negf %462 : vector<8x50xf32>
    %464 = math.exp %463 : vector<8x50xf32>
    %cst_127 = arith.constant 1.000000e+00 : f32
    %465 = vector.broadcast %cst_127 : f32 to vector<8x50xf32>
    %466 = arith.addf %465, %464 : vector<8x50xf32>
    %467 = arith.divf %465, %466 : vector<8x50xf32>
    %468 = vector.extract_strided_slice %461 {offsets = [0, 128], sizes = [8, 50], strides = [1, 1]} : vector<8x512xf32> to vector<8x50xf32>
    %469 = arith.negf %468 : vector<8x50xf32>
    %470 = math.exp %469 : vector<8x50xf32>
    %cst_128 = arith.constant 1.000000e+00 : f32
    %471 = vector.broadcast %cst_128 : f32 to vector<8x50xf32>
    %472 = arith.addf %471, %470 : vector<8x50xf32>
    %473 = arith.divf %471, %472 : vector<8x50xf32>
    %474 = vector.extract_strided_slice %461 {offsets = [0, 256], sizes = [8, 50], strides = [1, 1]} : vector<8x512xf32> to vector<8x50xf32>
    %475 = math.tanh %474 : vector<8x50xf32>
    %476 = vector.extract_strided_slice %461 {offsets = [0, 384], sizes = [8, 50], strides = [1, 1]} : vector<8x512xf32> to vector<8x50xf32>
    %477 = arith.negf %476 : vector<8x50xf32>
    %478 = math.exp %477 : vector<8x50xf32>
    %cst_129 = arith.constant 1.000000e+00 : f32
    %479 = vector.broadcast %cst_129 : f32 to vector<8x50xf32>
    %480 = arith.addf %479, %478 : vector<8x50xf32>
    %481 = arith.divf %479, %480 : vector<8x50xf32>
    %482 = arith.mulf %473, %453 : vector<8x50xf32>
    %483 = arith.mulf %467, %475 : vector<8x50xf32>
    %484 = arith.addf %482, %483 : vector<8x50xf32>
    %485 = math.tanh %484 : vector<8x50xf32>
    %486 = arith.mulf %481, %485 : vector<8x50xf32>
    %c14 = arith.constant 14 : index
    %c0_130 = arith.constant 0 : index
    %c0_131 = arith.constant 0 : index
    %487 = vector.load %arg15[%c14, %c0_130, %c0_131] : memref<30x8x50xf32, #tpu.memory_space<vmem>>, vector<1x8x50xf32>
    %488 = vector.shape_cast %487 : vector<1x8x50xf32> to vector<8x50xf32>
    %489 = vector.shape_cast %486 : vector<8x50xf32> to vector<1x8x50xf32>
    tpu.vector_store %arg15[%c14, %c0_130, %c0_131], %489 {strides = array<i32>} : memref<30x8x50xf32, #tpu.memory_space<vmem>>, vector<1x8x50xf32>,
    %c120 = arith.constant 120 : index
    %c0_132 = arith.constant 0 : index
    %490 = vector.load %arg14[%c120, %c0_132] : memref<240x512xf32, #tpu.memory_space<vmem>>, vector<8x512xf32>
    %cst_133 = arith.constant dense<0.000000e+00> : vector<8x512xf32>
    %491 = tpu.matmul %486, %22, %cst_133 {dimension_numbers = #tpu.dot_dimension_numbers<[1], [0], [0], [1], [0, 0, 1, 1], [], []>} : vector<8x50xf32>, vector<50x512xf32>, vector<8x512xf32> -> vector<8x512xf32>
    %492 = arith.addf %490, %491 : vector<8x512xf32>
    %493 = vector.extract_strided_slice %492 {offsets = [0, 0], sizes = [8, 50], strides = [1, 1]} : vector<8x512xf32> to vector<8x50xf32>
    %494 = arith.negf %493 : vector<8x50xf32>
    %495 = math.exp %494 : vector<8x50xf32>
    %cst_134 = arith.constant 1.000000e+00 : f32
    %496 = vector.broadcast %cst_134 : f32 to vector<8x50xf32>
    %497 = arith.addf %496, %495 : vector<8x50xf32>
    %498 = arith.divf %496, %497 : vector<8x50xf32>
    %499 = vector.extract_strided_slice %492 {offsets = [0, 128], sizes = [8, 50], strides = [1, 1]} : vector<8x512xf32> to vector<8x50xf32>
    %500 = arith.negf %499 : vector<8x50xf32>
    %501 = math.exp %500 : vector<8x50xf32>
    %cst_135 = arith.constant 1.000000e+00 : f32
    %502 = vector.broadcast %cst_135 : f32 to vector<8x50xf32>
    %503 = arith.addf %502, %501 : vector<8x50xf32>
    %504 = arith.divf %502, %503 : vector<8x50xf32>
    %505 = vector.extract_strided_slice %492 {offsets = [0, 256], sizes = [8, 50], strides = [1, 1]} : vector<8x512xf32> to vector<8x50xf32>
    %506 = math.tanh %505 : vector<8x50xf32>
    %507 = vector.extract_strided_slice %492 {offsets = [0, 384], sizes = [8, 50], strides = [1, 1]} : vector<8x512xf32> to vector<8x50xf32>
    %508 = arith.negf %507 : vector<8x50xf32>
    %509 = math.exp %508 : vector<8x50xf32>
    %cst_136 = arith.constant 1.000000e+00 : f32
    %510 = vector.broadcast %cst_136 : f32 to vector<8x50xf32>
    %511 = arith.addf %510, %509 : vector<8x50xf32>
    %512 = arith.divf %510, %511 : vector<8x50xf32>
    %513 = arith.mulf %504, %484 : vector<8x50xf32>
    %514 = arith.mulf %498, %506 : vector<8x50xf32>
    %515 = arith.addf %513, %514 : vector<8x50xf32>
    %516 = math.tanh %515 : vector<8x50xf32>
    %517 = arith.mulf %512, %516 : vector<8x50xf32>
    %c15 = arith.constant 15 : index
    %c0_137 = arith.constant 0 : index
    %c0_138 = arith.constant 0 : index
    %518 = vector.load %arg15[%c15, %c0_137, %c0_138] : memref<30x8x50xf32, #tpu.memory_space<vmem>>, vector<1x8x50xf32>
    %519 = vector.shape_cast %518 : vector<1x8x50xf32> to vector<8x50xf32>
    %520 = vector.shape_cast %517 : vector<8x50xf32> to vector<1x8x50xf32>
    tpu.vector_store %arg15[%c15, %c0_137, %c0_138], %520 {strides = array<i32>} : memref<30x8x50xf32, #tpu.memory_space<vmem>>, vector<1x8x50xf32>,
    %c128_139 = arith.constant 128 : index
    %c0_140 = arith.constant 0 : index
    %521 = vector.load %arg14[%c128_139, %c0_140] : memref<240x512xf32, #tpu.memory_space<vmem>>, vector<8x512xf32>
    %cst_141 = arith.constant dense<0.000000e+00> : vector<8x512xf32>
    %522 = tpu.matmul %517, %22, %cst_141 {dimension_numbers = #tpu.dot_dimension_numbers<[1], [0], [0], [1], [0, 0, 1, 1], [], []>} : vector<8x50xf32>, vector<50x512xf32>, vector<8x512xf32> -> vector<8x512xf32>
    %523 = arith.addf %521, %522 : vector<8x512xf32>
    %524 = vector.extract_strided_slice %523 {offsets = [0, 0], sizes = [8, 50], strides = [1, 1]} : vector<8x512xf32> to vector<8x50xf32>
    %525 = arith.negf %524 : vector<8x50xf32>
    %526 = math.exp %525 : vector<8x50xf32>
    %cst_142 = arith.constant 1.000000e+00 : f32
    %527 = vector.broadcast %cst_142 : f32 to vector<8x50xf32>
    %528 = arith.addf %527, %526 : vector<8x50xf32>
    %529 = arith.divf %527, %528 : vector<8x50xf32>
    %530 = vector.extract_strided_slice %523 {offsets = [0, 128], sizes = [8, 50], strides = [1, 1]} : vector<8x512xf32> to vector<8x50xf32>
    %531 = arith.negf %530 : vector<8x50xf32>
    %532 = math.exp %531 : vector<8x50xf32>
    %cst_143 = arith.constant 1.000000e+00 : f32
    %533 = vector.broadcast %cst_143 : f32 to vector<8x50xf32>
    %534 = arith.addf %533, %532 : vector<8x50xf32>
    %535 = arith.divf %533, %534 : vector<8x50xf32>
    %536 = vector.extract_strided_slice %523 {offsets = [0, 256], sizes = [8, 50], strides = [1, 1]} : vector<8x512xf32> to vector<8x50xf32>
    %537 = math.tanh %536 : vector<8x50xf32>
    %538 = vector.extract_strided_slice %523 {offsets = [0, 384], sizes = [8, 50], strides = [1, 1]} : vector<8x512xf32> to vector<8x50xf32>
    %539 = arith.negf %538 : vector<8x50xf32>
    %540 = math.exp %539 : vector<8x50xf32>
    %cst_144 = arith.constant 1.000000e+00 : f32
    %541 = vector.broadcast %cst_144 : f32 to vector<8x50xf32>
    %542 = arith.addf %541, %540 : vector<8x50xf32>
    %543 = arith.divf %541, %542 : vector<8x50xf32>
    %544 = arith.mulf %535, %515 : vector<8x50xf32>
    %545 = arith.mulf %529, %537 : vector<8x50xf32>
    %546 = arith.addf %544, %545 : vector<8x50xf32>
    %547 = math.tanh %546 : vector<8x50xf32>
    %548 = arith.mulf %543, %547 : vector<8x50xf32>
    %c16_145 = arith.constant 16 : index
    %c0_146 = arith.constant 0 : index
    %c0_147 = arith.constant 0 : index
    %549 = vector.load %arg15[%c16_145, %c0_146, %c0_147] : memref<30x8x50xf32, #tpu.memory_space<vmem>>, vector<1x8x50xf32>
    %550 = vector.shape_cast %549 : vector<1x8x50xf32> to vector<8x50xf32>
    %551 = vector.shape_cast %548 : vector<8x50xf32> to vector<1x8x50xf32>
    tpu.vector_store %arg15[%c16_145, %c0_146, %c0_147], %551 {strides = array<i32>} : memref<30x8x50xf32, #tpu.memory_space<vmem>>, vector<1x8x50xf32>,
    %c136 = arith.constant 136 : index
    %c0_148 = arith.constant 0 : index
    %552 = vector.load %arg14[%c136, %c0_148] : memref<240x512xf32, #tpu.memory_space<vmem>>, vector<8x512xf32>
    %cst_149 = arith.constant dense<0.000000e+00> : vector<8x512xf32>
    %553 = tpu.matmul %548, %22, %cst_149 {dimension_numbers = #tpu.dot_dimension_numbers<[1], [0], [0], [1], [0, 0, 1, 1], [], []>} : vector<8x50xf32>, vector<50x512xf32>, vector<8x512xf32> -> vector<8x512xf32>
    %554 = arith.addf %552, %553 : vector<8x512xf32>
    %555 = vector.extract_strided_slice %554 {offsets = [0, 0], sizes = [8, 50], strides = [1, 1]} : vector<8x512xf32> to vector<8x50xf32>
    %556 = arith.negf %555 : vector<8x50xf32>
    %557 = math.exp %556 : vector<8x50xf32>
    %cst_150 = arith.constant 1.000000e+00 : f32
    %558 = vector.broadcast %cst_150 : f32 to vector<8x50xf32>
    %559 = arith.addf %558, %557 : vector<8x50xf32>
    %560 = arith.divf %558, %559 : vector<8x50xf32>
    %561 = vector.extract_strided_slice %554 {offsets = [0, 128], sizes = [8, 50], strides = [1, 1]} : vector<8x512xf32> to vector<8x50xf32>
    %562 = arith.negf %561 : vector<8x50xf32>
    %563 = math.exp %562 : vector<8x50xf32>
    %cst_151 = arith.constant 1.000000e+00 : f32
    %564 = vector.broadcast %cst_151 : f32 to vector<8x50xf32>
    %565 = arith.addf %564, %563 : vector<8x50xf32>
    %566 = arith.divf %564, %565 : vector<8x50xf32>
    %567 = vector.extract_strided_slice %554 {offsets = [0, 256], sizes = [8, 50], strides = [1, 1]} : vector<8x512xf32> to vector<8x50xf32>
    %568 = math.tanh %567 : vector<8x50xf32>
    %569 = vector.extract_strided_slice %554 {offsets = [0, 384], sizes = [8, 50], strides = [1, 1]} : vector<8x512xf32> to vector<8x50xf32>
    %570 = arith.negf %569 : vector<8x50xf32>
    %571 = math.exp %570 : vector<8x50xf32>
    %cst_152 = arith.constant 1.000000e+00 : f32
    %572 = vector.broadcast %cst_152 : f32 to vector<8x50xf32>
    %573 = arith.addf %572, %571 : vector<8x50xf32>
    %574 = arith.divf %572, %573 : vector<8x50xf32>
    %575 = arith.mulf %566, %546 : vector<8x50xf32>
    %576 = arith.mulf %560, %568 : vector<8x50xf32>
    %577 = arith.addf %575, %576 : vector<8x50xf32>
    %578 = math.tanh %577 : vector<8x50xf32>
    %579 = arith.mulf %574, %578 : vector<8x50xf32>
    %c17 = arith.constant 17 : index
    %c0_153 = arith.constant 0 : index
    %c0_154 = arith.constant 0 : index
    %580 = vector.load %arg15[%c17, %c0_153, %c0_154] : memref<30x8x50xf32, #tpu.memory_space<vmem>>, vector<1x8x50xf32>
    %581 = vector.shape_cast %580 : vector<1x8x50xf32> to vector<8x50xf32>
    %582 = vector.shape_cast %579 : vector<8x50xf32> to vector<1x8x50xf32>
    tpu.vector_store %arg15[%c17, %c0_153, %c0_154], %582 {strides = array<i32>} : memref<30x8x50xf32, #tpu.memory_space<vmem>>, vector<1x8x50xf32>,
    %c144 = arith.constant 144 : index
    %c0_155 = arith.constant 0 : index
    %583 = vector.load %arg14[%c144, %c0_155] : memref<240x512xf32, #tpu.memory_space<vmem>>, vector<8x512xf32>
    %cst_156 = arith.constant dense<0.000000e+00> : vector<8x512xf32>
    %584 = tpu.matmul %579, %22, %cst_156 {dimension_numbers = #tpu.dot_dimension_numbers<[1], [0], [0], [1], [0, 0, 1, 1], [], []>} : vector<8x50xf32>, vector<50x512xf32>, vector<8x512xf32> -> vector<8x512xf32>
    %585 = arith.addf %583, %584 : vector<8x512xf32>
    %586 = vector.extract_strided_slice %585 {offsets = [0, 0], sizes = [8, 50], strides = [1, 1]} : vector<8x512xf32> to vector<8x50xf32>
    %587 = arith.negf %586 : vector<8x50xf32>
    %588 = math.exp %587 : vector<8x50xf32>
    %cst_157 = arith.constant 1.000000e+00 : f32
    %589 = vector.broadcast %cst_157 : f32 to vector<8x50xf32>
    %590 = arith.addf %589, %588 : vector<8x50xf32>
    %591 = arith.divf %589, %590 : vector<8x50xf32>
    %592 = vector.extract_strided_slice %585 {offsets = [0, 128], sizes = [8, 50], strides = [1, 1]} : vector<8x512xf32> to vector<8x50xf32>
    %593 = arith.negf %592 : vector<8x50xf32>
    %594 = math.exp %593 : vector<8x50xf32>
    %cst_158 = arith.constant 1.000000e+00 : f32
    %595 = vector.broadcast %cst_158 : f32 to vector<8x50xf32>
    %596 = arith.addf %595, %594 : vector<8x50xf32>
    %597 = arith.divf %595, %596 : vector<8x50xf32>
    %598 = vector.extract_strided_slice %585 {offsets = [0, 256], sizes = [8, 50], strides = [1, 1]} : vector<8x512xf32> to vector<8x50xf32>
    %599 = math.tanh %598 : vector<8x50xf32>
    %600 = vector.extract_strided_slice %585 {offsets = [0, 384], sizes = [8, 50], strides = [1, 1]} : vector<8x512xf32> to vector<8x50xf32>
    %601 = arith.negf %600 : vector<8x50xf32>
    %602 = math.exp %601 : vector<8x50xf32>
    %cst_159 = arith.constant 1.000000e+00 : f32
    %603 = vector.broadcast %cst_159 : f32 to vector<8x50xf32>
    %604 = arith.addf %603, %602 : vector<8x50xf32>
    %605 = arith.divf %603, %604 : vector<8x50xf32>
    %606 = arith.mulf %597, %577 : vector<8x50xf32>
    %607 = arith.mulf %591, %599 : vector<8x50xf32>
    %608 = arith.addf %606, %607 : vector<8x50xf32>
    %609 = math.tanh %608 : vector<8x50xf32>
    %610 = arith.mulf %605, %609 : vector<8x50xf32>
    %c18 = arith.constant 18 : index
    %c0_160 = arith.constant 0 : index
    %c0_161 = arith.constant 0 : index
    %611 = vector.load %arg15[%c18, %c0_160, %c0_161] : memref<30x8x50xf32, #tpu.memory_space<vmem>>, vector<1x8x50xf32>
    %612 = vector.shape_cast %611 : vector<1x8x50xf32> to vector<8x50xf32>
    %613 = vector.shape_cast %610 : vector<8x50xf32> to vector<1x8x50xf32>
    tpu.vector_store %arg15[%c18, %c0_160, %c0_161], %613 {strides = array<i32>} : memref<30x8x50xf32, #tpu.memory_space<vmem>>, vector<1x8x50xf32>,
    %c152 = arith.constant 152 : index
    %c0_162 = arith.constant 0 : index
    %614 = vector.load %arg14[%c152, %c0_162] : memref<240x512xf32, #tpu.memory_space<vmem>>, vector<8x512xf32>
    %cst_163 = arith.constant dense<0.000000e+00> : vector<8x512xf32>
    %615 = tpu.matmul %610, %22, %cst_163 {dimension_numbers = #tpu.dot_dimension_numbers<[1], [0], [0], [1], [0, 0, 1, 1], [], []>} : vector<8x50xf32>, vector<50x512xf32>, vector<8x512xf32> -> vector<8x512xf32>
    %616 = arith.addf %614, %615 : vector<8x512xf32>
    %617 = vector.extract_strided_slice %616 {offsets = [0, 0], sizes = [8, 50], strides = [1, 1]} : vector<8x512xf32> to vector<8x50xf32>
    %618 = arith.negf %617 : vector<8x50xf32>
    %619 = math.exp %618 : vector<8x50xf32>
    %cst_164 = arith.constant 1.000000e+00 : f32
    %620 = vector.broadcast %cst_164 : f32 to vector<8x50xf32>
    %621 = arith.addf %620, %619 : vector<8x50xf32>
    %622 = arith.divf %620, %621 : vector<8x50xf32>
    %623 = vector.extract_strided_slice %616 {offsets = [0, 128], sizes = [8, 50], strides = [1, 1]} : vector<8x512xf32> to vector<8x50xf32>
    %624 = arith.negf %623 : vector<8x50xf32>
    %625 = math.exp %624 : vector<8x50xf32>
    %cst_165 = arith.constant 1.000000e+00 : f32
    %626 = vector.broadcast %cst_165 : f32 to vector<8x50xf32>
    %627 = arith.addf %626, %625 : vector<8x50xf32>
    %628 = arith.divf %626, %627 : vector<8x50xf32>
    %629 = vector.extract_strided_slice %616 {offsets = [0, 256], sizes = [8, 50], strides = [1, 1]} : vector<8x512xf32> to vector<8x50xf32>
    %630 = math.tanh %629 : vector<8x50xf32>
    %631 = vector.extract_strided_slice %616 {offsets = [0, 384], sizes = [8, 50], strides = [1, 1]} : vector<8x512xf32> to vector<8x50xf32>
    %632 = arith.negf %631 : vector<8x50xf32>
    %633 = math.exp %632 : vector<8x50xf32>
    %cst_166 = arith.constant 1.000000e+00 : f32
    %634 = vector.broadcast %cst_166 : f32 to vector<8x50xf32>
    %635 = arith.addf %634, %633 : vector<8x50xf32>
    %636 = arith.divf %634, %635 : vector<8x50xf32>
    %637 = arith.mulf %628, %608 : vector<8x50xf32>
    %638 = arith.mulf %622, %630 : vector<8x50xf32>
    %639 = arith.addf %637, %638 : vector<8x50xf32>
    %640 = math.tanh %639 : vector<8x50xf32>
    %641 = arith.mulf %636, %640 : vector<8x50xf32>
    %c19 = arith.constant 19 : index
    %c0_167 = arith.constant 0 : index
    %c0_168 = arith.constant 0 : index
    %642 = vector.load %arg15[%c19, %c0_167, %c0_168] : memref<30x8x50xf32, #tpu.memory_space<vmem>>, vector<1x8x50xf32>
    %643 = vector.shape_cast %642 : vector<1x8x50xf32> to vector<8x50xf32>
    %644 = vector.shape_cast %641 : vector<8x50xf32> to vector<1x8x50xf32>
    tpu.vector_store %arg15[%c19, %c0_167, %c0_168], %644 {strides = array<i32>} : memref<30x8x50xf32, #tpu.memory_space<vmem>>, vector<1x8x50xf32>,
    %c160 = arith.constant 160 : index
    %c0_169 = arith.constant 0 : index
    %645 = vector.load %arg14[%c160, %c0_169] : memref<240x512xf32, #tpu.memory_space<vmem>>, vector<8x512xf32>
    %cst_170 = arith.constant dense<0.000000e+00> : vector<8x512xf32>
    %646 = tpu.matmul %641, %22, %cst_170 {dimension_numbers = #tpu.dot_dimension_numbers<[1], [0], [0], [1], [0, 0, 1, 1], [], []>} : vector<8x50xf32>, vector<50x512xf32>, vector<8x512xf32> -> vector<8x512xf32>
    %647 = arith.addf %645, %646 : vector<8x512xf32>
    %648 = vector.extract_strided_slice %647 {offsets = [0, 0], sizes = [8, 50], strides = [1, 1]} : vector<8x512xf32> to vector<8x50xf32>
    %649 = arith.negf %648 : vector<8x50xf32>
    %650 = math.exp %649 : vector<8x50xf32>
    %cst_171 = arith.constant 1.000000e+00 : f32
    %651 = vector.broadcast %cst_171 : f32 to vector<8x50xf32>
    %652 = arith.addf %651, %650 : vector<8x50xf32>
    %653 = arith.divf %651, %652 : vector<8x50xf32>
    %654 = vector.extract_strided_slice %647 {offsets = [0, 128], sizes = [8, 50], strides = [1, 1]} : vector<8x512xf32> to vector<8x50xf32>
    %655 = arith.negf %654 : vector<8x50xf32>
    %656 = math.exp %655 : vector<8x50xf32>
    %cst_172 = arith.constant 1.000000e+00 : f32
    %657 = vector.broadcast %cst_172 : f32 to vector<8x50xf32>
    %658 = arith.addf %657, %656 : vector<8x50xf32>
    %659 = arith.divf %657, %658 : vector<8x50xf32>
    %660 = vector.extract_strided_slice %647 {offsets = [0, 256], sizes = [8, 50], strides = [1, 1]} : vector<8x512xf32> to vector<8x50xf32>
    %661 = math.tanh %660 : vector<8x50xf32>
    %662 = vector.extract_strided_slice %647 {offsets = [0, 384], sizes = [8, 50], strides = [1, 1]} : vector<8x512xf32> to vector<8x50xf32>
    %663 = arith.negf %662 : vector<8x50xf32>
    %664 = math.exp %663 : vector<8x50xf32>
    %cst_173 = arith.constant 1.000000e+00 : f32
    %665 = vector.broadcast %cst_173 : f32 to vector<8x50xf32>
    %666 = arith.addf %665, %664 : vector<8x50xf32>
    %667 = arith.divf %665, %666 : vector<8x50xf32>
    %668 = arith.mulf %659, %639 : vector<8x50xf32>
    %669 = arith.mulf %653, %661 : vector<8x50xf32>
    %670 = arith.addf %668, %669 : vector<8x50xf32>
    %671 = math.tanh %670 : vector<8x50xf32>
    %672 = arith.mulf %667, %671 : vector<8x50xf32>
    %c20 = arith.constant 20 : index
    %c0_174 = arith.constant 0 : index
    %c0_175 = arith.constant 0 : index
    %673 = vector.load %arg15[%c20, %c0_174, %c0_175] : memref<30x8x50xf32, #tpu.memory_space<vmem>>, vector<1x8x50xf32>
    %674 = vector.shape_cast %673 : vector<1x8x50xf32> to vector<8x50xf32>
    %675 = vector.shape_cast %672 : vector<8x50xf32> to vector<1x8x50xf32>
    tpu.vector_store %arg15[%c20, %c0_174, %c0_175], %675 {strides = array<i32>} : memref<30x8x50xf32, #tpu.memory_space<vmem>>, vector<1x8x50xf32>,
    %c168 = arith.constant 168 : index
    %c0_176 = arith.constant 0 : index
    %676 = vector.load %arg14[%c168, %c0_176] : memref<240x512xf32, #tpu.memory_space<vmem>>, vector<8x512xf32>
    %cst_177 = arith.constant dense<0.000000e+00> : vector<8x512xf32>
    %677 = tpu.matmul %672, %22, %cst_177 {dimension_numbers = #tpu.dot_dimension_numbers<[1], [0], [0], [1], [0, 0, 1, 1], [], []>} : vector<8x50xf32>, vector<50x512xf32>, vector<8x512xf32> -> vector<8x512xf32>
    %678 = arith.addf %676, %677 : vector<8x512xf32>
    %679 = vector.extract_strided_slice %678 {offsets = [0, 0], sizes = [8, 50], strides = [1, 1]} : vector<8x512xf32> to vector<8x50xf32>
    %680 = arith.negf %679 : vector<8x50xf32>
    %681 = math.exp %680 : vector<8x50xf32>
    %cst_178 = arith.constant 1.000000e+00 : f32
    %682 = vector.broadcast %cst_178 : f32 to vector<8x50xf32>
    %683 = arith.addf %682, %681 : vector<8x50xf32>
    %684 = arith.divf %682, %683 : vector<8x50xf32>
    %685 = vector.extract_strided_slice %678 {offsets = [0, 128], sizes = [8, 50], strides = [1, 1]} : vector<8x512xf32> to vector<8x50xf32>
    %686 = arith.negf %685 : vector<8x50xf32>
    %687 = math.exp %686 : vector<8x50xf32>
    %cst_179 = arith.constant 1.000000e+00 : f32
    %688 = vector.broadcast %cst_179 : f32 to vector<8x50xf32>
    %689 = arith.addf %688, %687 : vector<8x50xf32>
    %690 = arith.divf %688, %689 : vector<8x50xf32>
    %691 = vector.extract_strided_slice %678 {offsets = [0, 256], sizes = [8, 50], strides = [1, 1]} : vector<8x512xf32> to vector<8x50xf32>
    %692 = math.tanh %691 : vector<8x50xf32>
    %693 = vector.extract_strided_slice %678 {offsets = [0, 384], sizes = [8, 50], strides = [1, 1]} : vector<8x512xf32> to vector<8x50xf32>
    %694 = arith.negf %693 : vector<8x50xf32>
    %695 = math.exp %694 : vector<8x50xf32>
    %cst_180 = arith.constant 1.000000e+00 : f32
    %696 = vector.broadcast %cst_180 : f32 to vector<8x50xf32>
    %697 = arith.addf %696, %695 : vector<8x50xf32>
    %698 = arith.divf %696, %697 : vector<8x50xf32>
    %699 = arith.mulf %690, %670 : vector<8x50xf32>
    %700 = arith.mulf %684, %692 : vector<8x50xf32>
    %701 = arith.addf %699, %700 : vector<8x50xf32>
    %702 = math.tanh %701 : vector<8x50xf32>
    %703 = arith.mulf %698, %702 : vector<8x50xf32>
    %c21 = arith.constant 21 : index
    %c0_181 = arith.constant 0 : index
    %c0_182 = arith.constant 0 : index
    %704 = vector.load %arg15[%c21, %c0_181, %c0_182] : memref<30x8x50xf32, #tpu.memory_space<vmem>>, vector<1x8x50xf32>
    %705 = vector.shape_cast %704 : vector<1x8x50xf32> to vector<8x50xf32>
    %706 = vector.shape_cast %703 : vector<8x50xf32> to vector<1x8x50xf32>
    tpu.vector_store %arg15[%c21, %c0_181, %c0_182], %706 {strides = array<i32>} : memref<30x8x50xf32, #tpu.memory_space<vmem>>, vector<1x8x50xf32>,
    %c176 = arith.constant 176 : index
    %c0_183 = arith.constant 0 : index
    %707 = vector.load %arg14[%c176, %c0_183] : memref<240x512xf32, #tpu.memory_space<vmem>>, vector<8x512xf32>
    %cst_184 = arith.constant dense<0.000000e+00> : vector<8x512xf32>
    %708 = tpu.matmul %703, %22, %cst_184 {dimension_numbers = #tpu.dot_dimension_numbers<[1], [0], [0], [1], [0, 0, 1, 1], [], []>} : vector<8x50xf32>, vector<50x512xf32>, vector<8x512xf32> -> vector<8x512xf32>
    %709 = arith.addf %707, %708 : vector<8x512xf32>
    %710 = vector.extract_strided_slice %709 {offsets = [0, 0], sizes = [8, 50], strides = [1, 1]} : vector<8x512xf32> to vector<8x50xf32>
    %711 = arith.negf %710 : vector<8x50xf32>
    %712 = math.exp %711 : vector<8x50xf32>
    %cst_185 = arith.constant 1.000000e+00 : f32
    %713 = vector.broadcast %cst_185 : f32 to vector<8x50xf32>
    %714 = arith.addf %713, %712 : vector<8x50xf32>
    %715 = arith.divf %713, %714 : vector<8x50xf32>
    %716 = vector.extract_strided_slice %709 {offsets = [0, 128], sizes = [8, 50], strides = [1, 1]} : vector<8x512xf32> to vector<8x50xf32>
    %717 = arith.negf %716 : vector<8x50xf32>
    %718 = math.exp %717 : vector<8x50xf32>
    %cst_186 = arith.constant 1.000000e+00 : f32
    %719 = vector.broadcast %cst_186 : f32 to vector<8x50xf32>
    %720 = arith.addf %719, %718 : vector<8x50xf32>
    %721 = arith.divf %719, %720 : vector<8x50xf32>
    %722 = vector.extract_strided_slice %709 {offsets = [0, 256], sizes = [8, 50], strides = [1, 1]} : vector<8x512xf32> to vector<8x50xf32>
    %723 = math.tanh %722 : vector<8x50xf32>
    %724 = vector.extract_strided_slice %709 {offsets = [0, 384], sizes = [8, 50], strides = [1, 1]} : vector<8x512xf32> to vector<8x50xf32>
    %725 = arith.negf %724 : vector<8x50xf32>
    %726 = math.exp %725 : vector<8x50xf32>
    %cst_187 = arith.constant 1.000000e+00 : f32
    %727 = vector.broadcast %cst_187 : f32 to vector<8x50xf32>
    %728 = arith.addf %727, %726 : vector<8x50xf32>
    %729 = arith.divf %727, %728 : vector<8x50xf32>
    %730 = arith.mulf %721, %701 : vector<8x50xf32>
    %731 = arith.mulf %715, %723 : vector<8x50xf32>
    %732 = arith.addf %730, %731 : vector<8x50xf32>
    %733 = math.tanh %732 : vector<8x50xf32>
    %734 = arith.mulf %729, %733 : vector<8x50xf32>
    %c22 = arith.constant 22 : index
    %c0_188 = arith.constant 0 : index
    %c0_189 = arith.constant 0 : index
    %735 = vector.load %arg15[%c22, %c0_188, %c0_189] : memref<30x8x50xf32, #tpu.memory_space<vmem>>, vector<1x8x50xf32>
    %736 = vector.shape_cast %735 : vector<1x8x50xf32> to vector<8x50xf32>
    %737 = vector.shape_cast %734 : vector<8x50xf32> to vector<1x8x50xf32>
    tpu.vector_store %arg15[%c22, %c0_188, %c0_189], %737 {strides = array<i32>} : memref<30x8x50xf32, #tpu.memory_space<vmem>>, vector<1x8x50xf32>,
    %c184 = arith.constant 184 : index
    %c0_190 = arith.constant 0 : index
    %738 = vector.load %arg14[%c184, %c0_190] : memref<240x512xf32, #tpu.memory_space<vmem>>, vector<8x512xf32>
    %cst_191 = arith.constant dense<0.000000e+00> : vector<8x512xf32>
    %739 = tpu.matmul %734, %22, %cst_191 {dimension_numbers = #tpu.dot_dimension_numbers<[1], [0], [0], [1], [0, 0, 1, 1], [], []>} : vector<8x50xf32>, vector<50x512xf32>, vector<8x512xf32> -> vector<8x512xf32>
    %740 = arith.addf %738, %739 : vector<8x512xf32>
    %741 = vector.extract_strided_slice %740 {offsets = [0, 0], sizes = [8, 50], strides = [1, 1]} : vector<8x512xf32> to vector<8x50xf32>
    %742 = arith.negf %741 : vector<8x50xf32>
    %743 = math.exp %742 : vector<8x50xf32>
    %cst_192 = arith.constant 1.000000e+00 : f32
    %744 = vector.broadcast %cst_192 : f32 to vector<8x50xf32>
    %745 = arith.addf %744, %743 : vector<8x50xf32>
    %746 = arith.divf %744, %745 : vector<8x50xf32>
    %747 = vector.extract_strided_slice %740 {offsets = [0, 128], sizes = [8, 50], strides = [1, 1]} : vector<8x512xf32> to vector<8x50xf32>
    %748 = arith.negf %747 : vector<8x50xf32>
    %749 = math.exp %748 : vector<8x50xf32>
    %cst_193 = arith.constant 1.000000e+00 : f32
    %750 = vector.broadcast %cst_193 : f32 to vector<8x50xf32>
    %751 = arith.addf %750, %749 : vector<8x50xf32>
    %752 = arith.divf %750, %751 : vector<8x50xf32>
    %753 = vector.extract_strided_slice %740 {offsets = [0, 256], sizes = [8, 50], strides = [1, 1]} : vector<8x512xf32> to vector<8x50xf32>
    %754 = math.tanh %753 : vector<8x50xf32>
    %755 = vector.extract_strided_slice %740 {offsets = [0, 384], sizes = [8, 50], strides = [1, 1]} : vector<8x512xf32> to vector<8x50xf32>
    %756 = arith.negf %755 : vector<8x50xf32>
    %757 = math.exp %756 : vector<8x50xf32>
    %cst_194 = arith.constant 1.000000e+00 : f32
    %758 = vector.broadcast %cst_194 : f32 to vector<8x50xf32>
    %759 = arith.addf %758, %757 : vector<8x50xf32>
    %760 = arith.divf %758, %759 : vector<8x50xf32>
    %761 = arith.mulf %752, %732 : vector<8x50xf32>
    %762 = arith.mulf %746, %754 : vector<8x50xf32>
    %763 = arith.addf %761, %762 : vector<8x50xf32>
    %764 = math.tanh %763 : vector<8x50xf32>
    %765 = arith.mulf %760, %764 : vector<8x50xf32>
    %c23 = arith.constant 23 : index
    %c0_195 = arith.constant 0 : index
    %c0_196 = arith.constant 0 : index
    %766 = vector.load %arg15[%c23, %c0_195, %c0_196] : memref<30x8x50xf32, #tpu.memory_space<vmem>>, vector<1x8x50xf32>
    %767 = vector.shape_cast %766 : vector<1x8x50xf32> to vector<8x50xf32>
    %768 = vector.shape_cast %765 : vector<8x50xf32> to vector<1x8x50xf32>
    tpu.vector_store %arg15[%c23, %c0_195, %c0_196], %768 {strides = array<i32>} : memref<30x8x50xf32, #tpu.memory_space<vmem>>, vector<1x8x50xf32>,
    %c192_197 = arith.constant 192 : index
    %c0_198 = arith.constant 0 : index
    %769 = vector.load %arg14[%c192_197, %c0_198] : memref<240x512xf32, #tpu.memory_space<vmem>>, vector<8x512xf32>
    %cst_199 = arith.constant dense<0.000000e+00> : vector<8x512xf32>
    %770 = tpu.matmul %765, %22, %cst_199 {dimension_numbers = #tpu.dot_dimension_numbers<[1], [0], [0], [1], [0, 0, 1, 1], [], []>} : vector<8x50xf32>, vector<50x512xf32>, vector<8x512xf32> -> vector<8x512xf32>
    %771 = arith.addf %769, %770 : vector<8x512xf32>
    %772 = vector.extract_strided_slice %771 {offsets = [0, 0], sizes = [8, 50], strides = [1, 1]} : vector<8x512xf32> to vector<8x50xf32>
    %773 = arith.negf %772 : vector<8x50xf32>
    %774 = math.exp %773 : vector<8x50xf32>
    %cst_200 = arith.constant 1.000000e+00 : f32
    %775 = vector.broadcast %cst_200 : f32 to vector<8x50xf32>
    %776 = arith.addf %775, %774 : vector<8x50xf32>
    %777 = arith.divf %775, %776 : vector<8x50xf32>
    %778 = vector.extract_strided_slice %771 {offsets = [0, 128], sizes = [8, 50], strides = [1, 1]} : vector<8x512xf32> to vector<8x50xf32>
    %779 = arith.negf %778 : vector<8x50xf32>
    %780 = math.exp %779 : vector<8x50xf32>
    %cst_201 = arith.constant 1.000000e+00 : f32
    %781 = vector.broadcast %cst_201 : f32 to vector<8x50xf32>
    %782 = arith.addf %781, %780 : vector<8x50xf32>
    %783 = arith.divf %781, %782 : vector<8x50xf32>
    %784 = vector.extract_strided_slice %771 {offsets = [0, 256], sizes = [8, 50], strides = [1, 1]} : vector<8x512xf32> to vector<8x50xf32>
    %785 = math.tanh %784 : vector<8x50xf32>
    %786 = vector.extract_strided_slice %771 {offsets = [0, 384], sizes = [8, 50], strides = [1, 1]} : vector<8x512xf32> to vector<8x50xf32>
    %787 = arith.negf %786 : vector<8x50xf32>
    %788 = math.exp %787 : vector<8x50xf32>
    %cst_202 = arith.constant 1.000000e+00 : f32
    %789 = vector.broadcast %cst_202 : f32 to vector<8x50xf32>
    %790 = arith.addf %789, %788 : vector<8x50xf32>
    %791 = arith.divf %789, %790 : vector<8x50xf32>
    %792 = arith.mulf %783, %763 : vector<8x50xf32>
    %793 = arith.mulf %777, %785 : vector<8x50xf32>
    %794 = arith.addf %792, %793 : vector<8x50xf32>
    %795 = math.tanh %794 : vector<8x50xf32>
    %796 = arith.mulf %791, %795 : vector<8x50xf32>
    %c24_203 = arith.constant 24 : index
    %c0_204 = arith.constant 0 : index
    %c0_205 = arith.constant 0 : index
    %797 = vector.load %arg15[%c24_203, %c0_204, %c0_205] : memref<30x8x50xf32, #tpu.memory_space<vmem>>, vector<1x8x50xf32>
    %798 = vector.shape_cast %797 : vector<1x8x50xf32> to vector<8x50xf32>
    %799 = vector.shape_cast %796 : vector<8x50xf32> to vector<1x8x50xf32>
    tpu.vector_store %arg15[%c24_203, %c0_204, %c0_205], %799 {strides = array<i32>} : memref<30x8x50xf32, #tpu.memory_space<vmem>>, vector<1x8x50xf32>,
    %c200 = arith.constant 200 : index
    %c0_206 = arith.constant 0 : index
    %800 = vector.load %arg14[%c200, %c0_206] : memref<240x512xf32, #tpu.memory_space<vmem>>, vector<8x512xf32>
    %cst_207 = arith.constant dense<0.000000e+00> : vector<8x512xf32>
    %801 = tpu.matmul %796, %22, %cst_207 {dimension_numbers = #tpu.dot_dimension_numbers<[1], [0], [0], [1], [0, 0, 1, 1], [], []>} : vector<8x50xf32>, vector<50x512xf32>, vector<8x512xf32> -> vector<8x512xf32>
    %802 = arith.addf %800, %801 : vector<8x512xf32>
    %803 = vector.extract_strided_slice %802 {offsets = [0, 0], sizes = [8, 50], strides = [1, 1]} : vector<8x512xf32> to vector<8x50xf32>
    %804 = arith.negf %803 : vector<8x50xf32>
    %805 = math.exp %804 : vector<8x50xf32>
    %cst_208 = arith.constant 1.000000e+00 : f32
    %806 = vector.broadcast %cst_208 : f32 to vector<8x50xf32>
    %807 = arith.addf %806, %805 : vector<8x50xf32>
    %808 = arith.divf %806, %807 : vector<8x50xf32>
    %809 = vector.extract_strided_slice %802 {offsets = [0, 128], sizes = [8, 50], strides = [1, 1]} : vector<8x512xf32> to vector<8x50xf32>
    %810 = arith.negf %809 : vector<8x50xf32>
    %811 = math.exp %810 : vector<8x50xf32>
    %cst_209 = arith.constant 1.000000e+00 : f32
    %812 = vector.broadcast %cst_209 : f32 to vector<8x50xf32>
    %813 = arith.addf %812, %811 : vector<8x50xf32>
    %814 = arith.divf %812, %813 : vector<8x50xf32>
    %815 = vector.extract_strided_slice %802 {offsets = [0, 256], sizes = [8, 50], strides = [1, 1]} : vector<8x512xf32> to vector<8x50xf32>
    %816 = math.tanh %815 : vector<8x50xf32>
    %817 = vector.extract_strided_slice %802 {offsets = [0, 384], sizes = [8, 50], strides = [1, 1]} : vector<8x512xf32> to vector<8x50xf32>
    %818 = arith.negf %817 : vector<8x50xf32>
    %819 = math.exp %818 : vector<8x50xf32>
    %cst_210 = arith.constant 1.000000e+00 : f32
    %820 = vector.broadcast %cst_210 : f32 to vector<8x50xf32>
    %821 = arith.addf %820, %819 : vector<8x50xf32>
    %822 = arith.divf %820, %821 : vector<8x50xf32>
    %823 = arith.mulf %814, %794 : vector<8x50xf32>
    %824 = arith.mulf %808, %816 : vector<8x50xf32>
    %825 = arith.addf %823, %824 : vector<8x50xf32>
    %826 = math.tanh %825 : vector<8x50xf32>
    %827 = arith.mulf %822, %826 : vector<8x50xf32>
    %c25 = arith.constant 25 : index
    %c0_211 = arith.constant 0 : index
    %c0_212 = arith.constant 0 : index
    %828 = vector.load %arg15[%c25, %c0_211, %c0_212] : memref<30x8x50xf32, #tpu.memory_space<vmem>>, vector<1x8x50xf32>
    %829 = vector.shape_cast %828 : vector<1x8x50xf32> to vector<8x50xf32>
    %830 = vector.shape_cast %827 : vector<8x50xf32> to vector<1x8x50xf32>
    tpu.vector_store %arg15[%c25, %c0_211, %c0_212], %830 {strides = array<i32>} : memref<30x8x50xf32, #tpu.memory_space<vmem>>, vector<1x8x50xf32>,
    %c208 = arith.constant 208 : index
    %c0_213 = arith.constant 0 : index
    %831 = vector.load %arg14[%c208, %c0_213] : memref<240x512xf32, #tpu.memory_space<vmem>>, vector<8x512xf32>
    %cst_214 = arith.constant dense<0.000000e+00> : vector<8x512xf32>
    %832 = tpu.matmul %827, %22, %cst_214 {dimension_numbers = #tpu.dot_dimension_numbers<[1], [0], [0], [1], [0, 0, 1, 1], [], []>} : vector<8x50xf32>, vector<50x512xf32>, vector<8x512xf32> -> vector<8x512xf32>
    %833 = arith.addf %831, %832 : vector<8x512xf32>
    %834 = vector.extract_strided_slice %833 {offsets = [0, 0], sizes = [8, 50], strides = [1, 1]} : vector<8x512xf32> to vector<8x50xf32>
    %835 = arith.negf %834 : vector<8x50xf32>
    %836 = math.exp %835 : vector<8x50xf32>
    %cst_215 = arith.constant 1.000000e+00 : f32
    %837 = vector.broadcast %cst_215 : f32 to vector<8x50xf32>
    %838 = arith.addf %837, %836 : vector<8x50xf32>
    %839 = arith.divf %837, %838 : vector<8x50xf32>
    %840 = vector.extract_strided_slice %833 {offsets = [0, 128], sizes = [8, 50], strides = [1, 1]} : vector<8x512xf32> to vector<8x50xf32>
    %841 = arith.negf %840 : vector<8x50xf32>
    %842 = math.exp %841 : vector<8x50xf32>
    %cst_216 = arith.constant 1.000000e+00 : f32
    %843 = vector.broadcast %cst_216 : f32 to vector<8x50xf32>
    %844 = arith.addf %843, %842 : vector<8x50xf32>
    %845 = arith.divf %843, %844 : vector<8x50xf32>
    %846 = vector.extract_strided_slice %833 {offsets = [0, 256], sizes = [8, 50], strides = [1, 1]} : vector<8x512xf32> to vector<8x50xf32>
    %847 = math.tanh %846 : vector<8x50xf32>
    %848 = vector.extract_strided_slice %833 {offsets = [0, 384], sizes = [8, 50], strides = [1, 1]} : vector<8x512xf32> to vector<8x50xf32>
    %849 = arith.negf %848 : vector<8x50xf32>
    %850 = math.exp %849 : vector<8x50xf32>
    %cst_217 = arith.constant 1.000000e+00 : f32
    %851 = vector.broadcast %cst_217 : f32 to vector<8x50xf32>
    %852 = arith.addf %851, %850 : vector<8x50xf32>
    %853 = arith.divf %851, %852 : vector<8x50xf32>
    %854 = arith.mulf %845, %825 : vector<8x50xf32>
    %855 = arith.mulf %839, %847 : vector<8x50xf32>
    %856 = arith.addf %854, %855 : vector<8x50xf32>
    %857 = math.tanh %856 : vector<8x50xf32>
    %858 = arith.mulf %853, %857 : vector<8x50xf32>
    %c26 = arith.constant 26 : index
    %c0_218 = arith.constant 0 : index
    %c0_219 = arith.constant 0 : index
    %859 = vector.load %arg15[%c26, %c0_218, %c0_219] : memref<30x8x50xf32, #tpu.memory_space<vmem>>, vector<1x8x50xf32>
    %860 = vector.shape_cast %859 : vector<1x8x50xf32> to vector<8x50xf32>
    %861 = vector.shape_cast %858 : vector<8x50xf32> to vector<1x8x50xf32>
    tpu.vector_store %arg15[%c26, %c0_218, %c0_219], %861 {strides = array<i32>} : memref<30x8x50xf32, #tpu.memory_space<vmem>>, vector<1x8x50xf32>,
    %c216 = arith.constant 216 : index
    %c0_220 = arith.constant 0 : index
    %862 = vector.load %arg14[%c216, %c0_220] : memref<240x512xf32, #tpu.memory_space<vmem>>, vector<8x512xf32>
    %cst_221 = arith.constant dense<0.000000e+00> : vector<8x512xf32>
    %863 = tpu.matmul %858, %22, %cst_221 {dimension_numbers = #tpu.dot_dimension_numbers<[1], [0], [0], [1], [0, 0, 1, 1], [], []>} : vector<8x50xf32>, vector<50x512xf32>, vector<8x512xf32> -> vector<8x512xf32>
    %864 = arith.addf %862, %863 : vector<8x512xf32>
    %865 = vector.extract_strided_slice %864 {offsets = [0, 0], sizes = [8, 50], strides = [1, 1]} : vector<8x512xf32> to vector<8x50xf32>
    %866 = arith.negf %865 : vector<8x50xf32>
    %867 = math.exp %866 : vector<8x50xf32>
    %cst_222 = arith.constant 1.000000e+00 : f32
    %868 = vector.broadcast %cst_222 : f32 to vector<8x50xf32>
    %869 = arith.addf %868, %867 : vector<8x50xf32>
    %870 = arith.divf %868, %869 : vector<8x50xf32>
    %871 = vector.extract_strided_slice %864 {offsets = [0, 128], sizes = [8, 50], strides = [1, 1]} : vector<8x512xf32> to vector<8x50xf32>
    %872 = arith.negf %871 : vector<8x50xf32>
    %873 = math.exp %872 : vector<8x50xf32>
    %cst_223 = arith.constant 1.000000e+00 : f32
    %874 = vector.broadcast %cst_223 : f32 to vector<8x50xf32>
    %875 = arith.addf %874, %873 : vector<8x50xf32>
    %876 = arith.divf %874, %875 : vector<8x50xf32>
    %877 = vector.extract_strided_slice %864 {offsets = [0, 256], sizes = [8, 50], strides = [1, 1]} : vector<8x512xf32> to vector<8x50xf32>
    %878 = math.tanh %877 : vector<8x50xf32>
    %879 = vector.extract_strided_slice %864 {offsets = [0, 384], sizes = [8, 50], strides = [1, 1]} : vector<8x512xf32> to vector<8x50xf32>
    %880 = arith.negf %879 : vector<8x50xf32>
    %881 = math.exp %880 : vector<8x50xf32>
    %cst_224 = arith.constant 1.000000e+00 : f32
    %882 = vector.broadcast %cst_224 : f32 to vector<8x50xf32>
    %883 = arith.addf %882, %881 : vector<8x50xf32>
    %884 = arith.divf %882, %883 : vector<8x50xf32>
    %885 = arith.mulf %876, %856 : vector<8x50xf32>
    %886 = arith.mulf %870, %878 : vector<8x50xf32>
    %887 = arith.addf %885, %886 : vector<8x50xf32>
    %888 = math.tanh %887 : vector<8x50xf32>
    %889 = arith.mulf %884, %888 : vector<8x50xf32>
    %c27 = arith.constant 27 : index
    %c0_225 = arith.constant 0 : index
    %c0_226 = arith.constant 0 : index
    %890 = vector.load %arg15[%c27, %c0_225, %c0_226] : memref<30x8x50xf32, #tpu.memory_space<vmem>>, vector<1x8x50xf32>
    %891 = vector.shape_cast %890 : vector<1x8x50xf32> to vector<8x50xf32>
    %892 = vector.shape_cast %889 : vector<8x50xf32> to vector<1x8x50xf32>
    tpu.vector_store %arg15[%c27, %c0_225, %c0_226], %892 {strides = array<i32>} : memref<30x8x50xf32, #tpu.memory_space<vmem>>, vector<1x8x50xf32>,
    %c224 = arith.constant 224 : index
    %c0_227 = arith.constant 0 : index
    %893 = vector.load %arg14[%c224, %c0_227] : memref<240x512xf32, #tpu.memory_space<vmem>>, vector<8x512xf32>
    %cst_228 = arith.constant dense<0.000000e+00> : vector<8x512xf32>
    %894 = tpu.matmul %889, %22, %cst_228 {dimension_numbers = #tpu.dot_dimension_numbers<[1], [0], [0], [1], [0, 0, 1, 1], [], []>} : vector<8x50xf32>, vector<50x512xf32>, vector<8x512xf32> -> vector<8x512xf32>
    %895 = arith.addf %893, %894 : vector<8x512xf32>
    %896 = vector.extract_strided_slice %895 {offsets = [0, 0], sizes = [8, 50], strides = [1, 1]} : vector<8x512xf32> to vector<8x50xf32>
    %897 = arith.negf %896 : vector<8x50xf32>
    %898 = math.exp %897 : vector<8x50xf32>
    %cst_229 = arith.constant 1.000000e+00 : f32
    %899 = vector.broadcast %cst_229 : f32 to vector<8x50xf32>
    %900 = arith.addf %899, %898 : vector<8x50xf32>
    %901 = arith.divf %899, %900 : vector<8x50xf32>
    %902 = vector.extract_strided_slice %895 {offsets = [0, 128], sizes = [8, 50], strides = [1, 1]} : vector<8x512xf32> to vector<8x50xf32>
    %903 = arith.negf %902 : vector<8x50xf32>
    %904 = math.exp %903 : vector<8x50xf32>
    %cst_230 = arith.constant 1.000000e+00 : f32
    %905 = vector.broadcast %cst_230 : f32 to vector<8x50xf32>
    %906 = arith.addf %905, %904 : vector<8x50xf32>
    %907 = arith.divf %905, %906 : vector<8x50xf32>
    %908 = vector.extract_strided_slice %895 {offsets = [0, 256], sizes = [8, 50], strides = [1, 1]} : vector<8x512xf32> to vector<8x50xf32>
    %909 = math.tanh %908 : vector<8x50xf32>
    %910 = vector.extract_strided_slice %895 {offsets = [0, 384], sizes = [8, 50], strides = [1, 1]} : vector<8x512xf32> to vector<8x50xf32>
    %911 = arith.negf %910 : vector<8x50xf32>
    %912 = math.exp %911 : vector<8x50xf32>
    %cst_231 = arith.constant 1.000000e+00 : f32
    %913 = vector.broadcast %cst_231 : f32 to vector<8x50xf32>
    %914 = arith.addf %913, %912 : vector<8x50xf32>
    %915 = arith.divf %913, %914 : vector<8x50xf32>
    %916 = arith.mulf %907, %887 : vector<8x50xf32>
    %917 = arith.mulf %901, %909 : vector<8x50xf32>
    %918 = arith.addf %916, %917 : vector<8x50xf32>
    %919 = math.tanh %918 : vector<8x50xf32>
    %920 = arith.mulf %915, %919 : vector<8x50xf32>
    %c28 = arith.constant 28 : index
    %c0_232 = arith.constant 0 : index
    %c0_233 = arith.constant 0 : index
    %921 = vector.load %arg15[%c28, %c0_232, %c0_233] : memref<30x8x50xf32, #tpu.memory_space<vmem>>, vector<1x8x50xf32>
    %922 = vector.shape_cast %921 : vector<1x8x50xf32> to vector<8x50xf32>
    %923 = vector.shape_cast %920 : vector<8x50xf32> to vector<1x8x50xf32>
    tpu.vector_store %arg15[%c28, %c0_232, %c0_233], %923 {strides = array<i32>} : memref<30x8x50xf32, #tpu.memory_space<vmem>>, vector<1x8x50xf32>,
    %c232 = arith.constant 232 : index
    %c0_234 = arith.constant 0 : index
    %924 = vector.load %arg14[%c232, %c0_234] : memref<240x512xf32, #tpu.memory_space<vmem>>, vector<8x512xf32>
    %cst_235 = arith.constant dense<0.000000e+00> : vector<8x512xf32>
    %925 = tpu.matmul %920, %22, %cst_235 {dimension_numbers = #tpu.dot_dimension_numbers<[1], [0], [0], [1], [0, 0, 1, 1], [], []>} : vector<8x50xf32>, vector<50x512xf32>, vector<8x512xf32> -> vector<8x512xf32>
    %926 = arith.addf %924, %925 : vector<8x512xf32>
    %927 = vector.extract_strided_slice %926 {offsets = [0, 0], sizes = [8, 50], strides = [1, 1]} : vector<8x512xf32> to vector<8x50xf32>
    %928 = arith.negf %927 : vector<8x50xf32>
    %929 = math.exp %928 : vector<8x50xf32>
    %cst_236 = arith.constant 1.000000e+00 : f32
    %930 = vector.broadcast %cst_236 : f32 to vector<8x50xf32>
    %931 = arith.addf %930, %929 : vector<8x50xf32>
    %932 = arith.divf %930, %931 : vector<8x50xf32>
    %933 = vector.extract_strided_slice %926 {offsets = [0, 128], sizes = [8, 50], strides = [1, 1]} : vector<8x512xf32> to vector<8x50xf32>
    %934 = arith.negf %933 : vector<8x50xf32>
    %935 = math.exp %934 : vector<8x50xf32>
    %cst_237 = arith.constant 1.000000e+00 : f32
    %936 = vector.broadcast %cst_237 : f32 to vector<8x50xf32>
    %937 = arith.addf %936, %935 : vector<8x50xf32>
    %938 = arith.divf %936, %937 : vector<8x50xf32>
    %939 = vector.extract_strided_slice %926 {offsets = [0, 256], sizes = [8, 50], strides = [1, 1]} : vector<8x512xf32> to vector<8x50xf32>
    %940 = math.tanh %939 : vector<8x50xf32>
    %941 = vector.extract_strided_slice %926 {offsets = [0, 384], sizes = [8, 50], strides = [1, 1]} : vector<8x512xf32> to vector<8x50xf32>
    %942 = arith.negf %941 : vector<8x50xf32>
    %943 = math.exp %942 : vector<8x50xf32>
    %cst_238 = arith.constant 1.000000e+00 : f32
    %944 = vector.broadcast %cst_238 : f32 to vector<8x50xf32>
    %945 = arith.addf %944, %943 : vector<8x50xf32>
    %946 = arith.divf %944, %945 : vector<8x50xf32>
    %947 = arith.mulf %938, %918 : vector<8x50xf32>
    %948 = arith.mulf %932, %940 : vector<8x50xf32>
    %949 = arith.addf %947, %948 : vector<8x50xf32>
    %950 = math.tanh %949 : vector<8x50xf32>
    %951 = arith.mulf %946, %950 : vector<8x50xf32>
    %c29 = arith.constant 29 : index
    %c0_239 = arith.constant 0 : index
    %c0_240 = arith.constant 0 : index
    %952 = vector.load %arg15[%c29, %c0_239, %c0_240] : memref<30x8x50xf32, #tpu.memory_space<vmem>>, vector<1x8x50xf32>
    %953 = vector.shape_cast %952 : vector<1x8x50xf32> to vector<8x50xf32>
    %954 = vector.shape_cast %951 : vector<8x50xf32> to vector<1x8x50xf32>
    tpu.vector_store %arg15[%c29, %c0_239, %c0_240], %954 {strides = array<i32>} : memref<30x8x50xf32, #tpu.memory_space<vmem>>, vector<1x8x50xf32>,
    %c0_241 = arith.constant 0 : index
    %c0_242 = arith.constant 0 : index
    %955 = vector.load %arg4[%c0_241, %c0_242] : memref<30x30xf32, #tpu.memory_space<vmem>>, vector<30x30xf32>
    %c0_243 = arith.constant 0 : index
    %c0_244 = arith.constant 0 : index
    %956 = vector.load %arg5[%c0_243, %c0_244] : memref<30x1xf32, #tpu.memory_space<vmem>>, vector<30x1xf32>
    %c0_245 = arith.constant 0 : index
    %c0_246 = arith.constant 0 : index
    %c0_247 = arith.constant 0 : index
    %957 = vector.load %arg15[%c0_245, %c0_246, %c0_247] : memref<30x8x50xf32, #tpu.memory_space<vmem>>, vector<30x1x50xf32>
    %958 = vector.shape_cast %957 : vector<30x1x50xf32> to vector<30x50xf32>
    %cst_248 = arith.constant dense<0.000000e+00> : vector<30x50xf32>
    %959 = tpu.matmul %955, %958, %cst_248 {dimension_numbers = #tpu.dot_dimension_numbers<[1], [0], [0], [1], [0, 0, 1, 1], [], []>} : vector<30x30xf32>, vector<30x50xf32>, vector<30x50xf32> -> vector<30x50xf32>
    %960 = vector.broadcast %956 : vector<30x1xf32> to vector<30x50xf32>
    %961 = arith.addf %959, %960 : vector<30x50xf32>
    %cst_249 = arith.constant dense<0xFF800000> : vector<50xf32>
    %962 = vector.multi_reduction <maximumf>, %961, %cst_249 [0] : vector<30x50xf32> to vector<50xf32>
    %963 = vector.shape_cast %962 : vector<50xf32> to vector<1x50xf32>
    %964 = vector.broadcast %963 : vector<1x50xf32> to vector<30x50xf32>
    %965 = arith.subf %961, %964 : vector<30x50xf32>
    %966 = math.exp %965 : vector<30x50xf32>
    %cst_250 = arith.constant dense<0.000000e+00> : vector<50xf32>
    %967 = vector.multi_reduction <add>, %966, %cst_250 [0] : vector<30x50xf32> to vector<50xf32>
    %968 = vector.shape_cast %967 : vector<50xf32> to vector<1x50xf32>
    %969 = vector.broadcast %968 : vector<1x50xf32> to vector<30x50xf32>
    %970 = arith.divf %966, %969 : vector<30x50xf32>
    %971 = arith.mulf %970, %958 : vector<30x50xf32>
    %c0_251 = arith.constant 0 : index
    %c0_252 = arith.constant 0 : index
    %c0_253 = arith.constant 0 : index
    %972 = vector.load %arg15[%c0_251, %c0_252, %c0_253] : memref<30x8x50xf32, #tpu.memory_space<vmem>>, vector<30x1x50xf32>
    %973 = vector.shape_cast %972 : vector<30x1x50xf32> to vector<30x50xf32>
    %974 = vector.shape_cast %971 : vector<30x50xf32> to vector<30x1x50xf32>
    tpu.vector_store %arg15[%c0_251, %c0_252, %c0_253], %974 {strides = array<i32>} : memref<30x8x50xf32, #tpu.memory_space<vmem>>, vector<30x1x50xf32>,
    %c0_254 = arith.constant 0 : index
    %c1_255 = arith.constant 1 : index
    %c0_256 = arith.constant 0 : index
    %975 = vector.load %arg15[%c0_254, %c1_255, %c0_256] : memref<30x8x50xf32, #tpu.memory_space<vmem>>, vector<30x1x50xf32>
    %976 = vector.shape_cast %975 : vector<30x1x50xf32> to vector<30x50xf32>
    %cst_257 = arith.constant dense<0.000000e+00> : vector<30x50xf32>
    %977 = tpu.matmul %955, %976, %cst_257 {dimension_numbers = #tpu.dot_dimension_numbers<[1], [0], [0], [1], [0, 0, 1, 1], [], []>} : vector<30x30xf32>, vector<30x50xf32>, vector<30x50xf32> -> vector<30x50xf32>
    %978 = vector.broadcast %956 : vector<30x1xf32> to vector<30x50xf32>
    %979 = arith.addf %977, %978 : vector<30x50xf32>
    %cst_258 = arith.constant dense<0xFF800000> : vector<50xf32>
    %980 = vector.multi_reduction <maximumf>, %979, %cst_258 [0] : vector<30x50xf32> to vector<50xf32>
    %981 = vector.shape_cast %980 : vector<50xf32> to vector<1x50xf32>
    %982 = vector.broadcast %981 : vector<1x50xf32> to vector<30x50xf32>
    %983 = arith.subf %979, %982 : vector<30x50xf32>
    %984 = math.exp %983 : vector<30x50xf32>
    %cst_259 = arith.constant dense<0.000000e+00> : vector<50xf32>
    %985 = vector.multi_reduction <add>, %984, %cst_259 [0] : vector<30x50xf32> to vector<50xf32>
    %986 = vector.shape_cast %985 : vector<50xf32> to vector<1x50xf32>
    %987 = vector.broadcast %986 : vector<1x50xf32> to vector<30x50xf32>
    %988 = arith.divf %984, %987 : vector<30x50xf32>
    %989 = arith.mulf %988, %976 : vector<30x50xf32>
    %c0_260 = arith.constant 0 : index
    %c1_261 = arith.constant 1 : index
    %c0_262 = arith.constant 0 : index
    %990 = vector.load %arg15[%c0_260, %c1_261, %c0_262] : memref<30x8x50xf32, #tpu.memory_space<vmem>>, vector<30x1x50xf32>
    %991 = vector.shape_cast %990 : vector<30x1x50xf32> to vector<30x50xf32>
    %992 = vector.shape_cast %989 : vector<30x50xf32> to vector<30x1x50xf32>
    tpu.vector_store %arg15[%c0_260, %c1_261, %c0_262], %992 {strides = array<i32>} : memref<30x8x50xf32, #tpu.memory_space<vmem>>, vector<30x1x50xf32>,
    %cst_263 = arith.constant 0.000000e+00 : f32
    %993 = vector.broadcast %cst_263 : f32 to vector<8x50xf32>
    %c0_i32 = arith.constant 0 : i32
    %c30_i32 = arith.constant 30 : i32
    %994 = arith.addi %c0_i32, %c30_i32 : i32
    %c1_i32 = arith.constant 1 : i32
    %995 = scf.for %arg16 = %c0_i32 to %994 step %c1_i32 iter_args(%arg17 = %993) -> (vector<8x50xf32>)  : i32 {
      %1019 = arith.index_cast %arg16 : i32 to index
      %c0_286 = arith.constant 0 : index
      %c0_287 = arith.constant 0 : index
      %1020 = vector.load %arg15[%1019, %c0_286, %c0_287] : memref<30x8x50xf32, #tpu.memory_space<vmem>>, vector<1x8x50xf32>
      %1021 = vector.shape_cast %1020 : vector<1x8x50xf32> to vector<8x50xf32>
      %1022 = arith.index_cast %arg16 : i32 to index
      %c0_288 = arith.constant 0 : index
      %c0_289 = arith.constant 0 : index
      %1023 = vector.load %arg6[%1022, %c0_288, %c0_289] : memref<30x50x50xf32, #tpu.memory_space<vmem>>, vector<1x50x50xf32>
      %1024 = vector.shape_cast %1023 : vector<1x50x50xf32> to vector<50x50xf32>
      %cst_290 = arith.constant dense<0.000000e+00> : vector<8x50xf32>
      %1025 = tpu.matmul %1021, %1024, %cst_290 {dimension_numbers = #tpu.dot_dimension_numbers<[1], [0], [0], [1], [0, 0, 1, 1], [], []>} : vector<8x50xf32>, vector<50x50xf32>, vector<8x50xf32> -> vector<8x50xf32>
      %1026 = arith.addf %arg17, %1025 : vector<8x50xf32>
      scf.yield %1026 : vector<8x50xf32>
    }
    %c30_i32_264 = arith.constant 30 : i32
    %c0_265 = arith.constant 0 : index
    %c0_266 = arith.constant 0 : index
    %996 = vector.load %arg7[%c0_265, %c0_266] : memref<1x50xf32, #tpu.memory_space<vmem>>, vector<1x50xf32>
    %997 = vector.broadcast %996 : vector<1x50xf32> to vector<8x50xf32>
    %998 = arith.addf %995, %997 : vector<8x50xf32>
    %cst_267 = arith.constant 0.000000e+00 : f32
    %999 = vector.broadcast %cst_267 : f32 to vector<8x50xf32>
    %1000 = arith.maximumf %998, %999 : vector<8x50xf32>
    %c0_268 = arith.constant 0 : index
    %c0_269 = arith.constant 0 : index
    %1001 = vector.load %arg8[%c0_268, %c0_269] : memref<50x10xf32, #tpu.memory_space<vmem>>, vector<50x10xf32>
    %cst_270 = arith.constant dense<0.000000e+00> : vector<8x10xf32>
    %1002 = tpu.matmul %1000, %1001, %cst_270 {dimension_numbers = #tpu.dot_dimension_numbers<[1], [0], [0], [1], [0, 0, 1, 1], [], []>} : vector<8x50xf32>, vector<50x10xf32>, vector<8x10xf32> -> vector<8x10xf32>
    %c0_271 = arith.constant 0 : index
    %c0_272 = arith.constant 0 : index
    %1003 = vector.load %arg9[%c0_271, %c0_272] : memref<1x10xf32, #tpu.memory_space<vmem>>, vector<1x10xf32>
    %1004 = vector.broadcast %1003 : vector<1x10xf32> to vector<8x10xf32>
    %1005 = arith.addf %1002, %1004 : vector<8x10xf32>
    %cst_273 = arith.constant 0.000000e+00 : f32
    %1006 = vector.broadcast %cst_273 : f32 to vector<8x10xf32>
    %1007 = arith.maximumf %1005, %1006 : vector<8x10xf32>
    %c0_274 = arith.constant 0 : index
    %c0_275 = arith.constant 0 : index
    %1008 = vector.load %arg10[%c0_274, %c0_275] : memref<2x20xf32, #tpu.memory_space<vmem>>, vector<2x20xf32>
    %c0_276 = arith.constant 0 : index
    %c0_277 = arith.constant 0 : index
    %1009 = vector.load %arg11[%c0_276, %c0_277] : memref<20x10xf32, #tpu.memory_space<vmem>>, vector<20x10xf32>
    %cst_278 = arith.constant dense<0.000000e+00> : vector<2x10xf32>
    %1010 = tpu.matmul %1008, %1009, %cst_278 {dimension_numbers = #tpu.dot_dimension_numbers<[1], [0], [0], [1], [0, 0, 1, 1], [], []>} : vector<2x20xf32>, vector<20x10xf32>, vector<2x10xf32> -> vector<2x10xf32>
    %c0_279 = arith.constant 0 : index
    %c0_280 = arith.constant 0 : index
    %1011 = vector.load %arg12[%c0_279, %c0_280] : memref<1x10xf32, #tpu.memory_space<vmem>>, vector<1x10xf32>
    %1012 = vector.broadcast %1011 : vector<1x10xf32> to vector<2x10xf32>
    %1013 = arith.addf %1010, %1012 : vector<2x10xf32>
    %cst_281 = arith.constant 0.000000e+00 : f32
    %1014 = vector.broadcast %cst_281 : f32 to vector<2x10xf32>
    %1015 = arith.maximumf %1013, %1014 : vector<2x10xf32>
    %1016 = vector.extract_strided_slice %1007 {offsets = [0, 0], sizes = [2, 10], strides = [1, 1]} : vector<8x10xf32> to vector<2x10xf32>
    %c0_282 = arith.constant 0 : index
    %c0_283 = arith.constant 0 : index
    %1017 = vector.load %arg13[%c0_282, %c0_283] : memref<2x20xf32, #tpu.memory_space<vmem>>, vector<2x10xf32>
    tpu.vector_store %arg13[%c0_282, %c0_283], %1016 {strides = array<i32>} : memref<2x20xf32, #tpu.memory_space<vmem>>, vector<2x10xf32>,
    %c0_284 = arith.constant 0 : index
    %c10_285 = arith.constant 10 : index
    %1018 = vector.load %arg13[%c0_284, %c10_285] : memref<2x20xf32, #tpu.memory_space<vmem>>, vector<2x10xf32>
    tpu.vector_store %arg13[%c0_284, %c10_285], %1015 {strides = array<i32>} : memref<2x20xf32, #tpu.memory_space<vmem>>, vector<2x10xf32>,
    return
  }
}

</mosaic_0001>

<bundles_post_ra>
// kernel: lstm_model_forward.1
= control target key start
LH: loop header
LB: loop body
LE: loop exit
PB: predicated region body
PF: predicated region fallthrough
CT: control target
= control target key end

     0   :  { %18 = vsyncpa [#allocation5], 0  ;;  %vm108_vm0 = vcmask 1041408   ;;  %vm10107_vm1 = vmmov 1   ;;  %v10108_v10 = vmov 0.0   ;;  %vm83_vm3 = vcmask 80896   ;;  %s11884_s0 = inlined_call_operand.vmem [shape: f32[240,10], index: 0, kind: input, shape index: {}]   ;;  %s11885_s1 = inlined_call_operand.vmem [shape: f32[10,512], index: 1, kind: input, shape index: {}]   ;;  %s11886_s2 = inlined_call_operand.vmem [shape: f32[50,512], index: 2, kind: input, shape index: {}]   ;;  %s11887_s3 = inlined_call_operand.vmem [shape: f32[1,512], index: 3, kind: input, shape index: {}]   ;;  %s11888_s4 = inlined_call_operand.vmem [shape: f32[30,30], index: 4, kind: input, shape index: {}]   ;;  %s11889_s5 = inlined_call_operand.vmem [shape: f32[30,1], index: 5, kind: input, shape index: {}]   ;;  %s11890_s6 = inlined_call_operand.vmem [shape: f32[30,50,50], index: 6, kind: input, shape index: {}]   ;;  %s11891_s7 = inlined_call_operand.vmem [shape: f32[1,50], index: 7, kind: input, shape index: {}]   ;;  %s11892_s8 = inlined_call_operand.vmem [shape: f32[50,10], index: 8, kind: input, shape index: {}]   ;;  %s11893_s9 = inlined_call_operand.vmem [shape: f32[1,10], index: 9, kind: input, shape index: {}]   ;;  %s11894_s10 = inlined_call_operand.vmem [shape: f32[2,20], index: 10, kind: input, shape index: {}]   ;;  %s11895_s11 = inlined_call_operand.vmem [shape: f32[20,10], index: 11, kind: input, shape index: {}]   ;;  %s11896_s12 = inlined_call_operand.vmem [shape: f32[1,10], index: 12, kind: input, shape index: {}]   ;;  %s11897_s13 = inlined_call_operand.hbm [shape: f32[2,20], index: 13, kind: output, shape index: {}]  }
   0x1   :  { %v46_v0 = vld [vmem:[%s11885_s1 + $0x8] sm:$0xff]  ;;  %v48_v3 = vld [vmem:[%s11885_s1 + $0x18] sm:$0xff]  ;;  %v45_v5 = vld [vmem:[%s11885_s1] sm:$0xff]  ;;  %185 = vmatprep.mubr.f32.mxu0 %v10108_v10  ;;  %298 = vmatprep.mubr.f32.mxu1 %v10108_v10  ;;  %vm1241_vm4 = vcmask 408576   ;;  %vm6708_vm5 = vcmask 1041409   ;;  %vm6711_vm6 = vcmask 1042434  }
   0x2   :  { %v50_v1 = vld [vmem:[%s11885_s1 + $0x28] sm:$0x3]  ;;  %v52_v4 = vld [vmem:[%s11885_s1 + $0x38] sm:$0x3]  ;;  %vm10207_vm2 = vmpackc.low %vm108_vm0, %vm10107_vm1  ;;  %vm6714_vm7 = vcmask 1043459   ;;  %vm6717_vm8 = vcmask 1044484  }
   0x3   :  { %v10194_v2 = vpack.c.bf16 %v50_v1, %v46_v0  ;;  %v10211_v7 = vpack.c.bf16 %v52_v4, %v48_v3  ;;  %v49_v8 = vld [vmem:[%s11885_s1 + $0x20] sm:$0x3]  ;;  %v47_v9 = vld [vmem:[%s11885_s1 + $0x10] sm:$0xff]  ;;  %v55_v15 = vld [vmem:[%s11884_s0 + $0x8] sm:$0xff]  ;;  %vm6720_vm9 = vcmask 1045509   ;;  %vm6723_vm10 = vcmask 1046534  }
   0x4   :  { %v10224_v11 = vpack.c.bf16 %v49_v8, %v45_v5  ;;  %v51_v12 = vld [vmem:[%s11885_s1 + $0x30] sm:$0x3]  ;;  %v54_v14 = vld [vmem:[%s11884_s0] sm:$0xff]  ;;  %v57_v17 = vld [vmem:[%s11884_s0 + $0x18] sm:$0xff]  ;;  %vm6726_vm11 = vcmask 1047559   ;;  %vm6769_vm12 = vcmask 244736  }
   0x5   :  { %8479 = vmatprep.subr.msk.bf16.mxu0 %vm10207_vm2, %v10194_v2  ;;  %8485 = vmatprep.subr.msk.bf16.mxu1 %vm10207_vm2, %v10211_v7  ;;  %v10232_v13 = vpack.c.bf16 %v51_v12, %v47_v9  ;;  %v56_v16 = vld [vmem:[%s11884_s0 + $0x10] sm:$0xff]  ;;  %v58_v18 = vld [vmem:[%s11884_s0 + $0x20] sm:$0xff]  ;;  %v59_v19 = vld [vmem:[%s11884_s0 + $0x28] sm:$0xff]  ;;  %vm6782_vm13 = vcmask 1045504   ;;  %vm6873_vm15 = vcmask 406528  }
   0x6   :  { %8482 = vmatpush1.bf16.msk.msra.mxu0 %vm10207_vm2, %v10224_v11  ;;  %v60_v20 = vld [vmem:[%s11884_s0 + $0x30] sm:$0xff]  ;;  %v61_v21 = vld [vmem:[%s11884_s0 + $0x38] sm:$0xff]  ;;  %v379_v22 = vld [vmem:[%s11884_s0 + $0x40] sm:$0xff] }
   0x7   :  { %8488 = vmatpush1.bf16.msk.msra.mxu1 %vm10207_vm2, %v10232_v13  ;;  %8491 = vmatprep.subr.msk.bf16.mxu0 %vm10207_vm2, %v10194_v2  ;;  %v380_v23 = vld [vmem:[%s11884_s0 + $0x48] sm:$0xff]  ;;  %v381_v24 = vld [vmem:[%s11884_s0 + $0x50] sm:$0xff]  ;;  %v382_v25 = vld [vmem:[%s11884_s0 + $0x58] sm:$0xff] }
   0x8   :  { %8497 = vmatprep.subr.msk.bf16.mxu1 %vm10207_vm2, %v10211_v7  ;;  %v383_v26 = vld [vmem:[%s11884_s0 + $0x60] sm:$0xff]  ;;  %v384_v27 = vld [vmem:[%s11884_s0 + $0x68] sm:$0xff]  ;;  %v385_v28 = vld [vmem:[%s11884_s0 + $0x70] sm:$0xff] }
   0x9   :  { %8008 = vmatmul.mubr.msk.f32.vlgmr.msra.gmra.mrb[0].mxu0 %vm83_vm3, %v54_v14  ;;  %v386_v29 = vld [vmem:[%s11884_s0 + $0x78] sm:$0xff]  ;;  %v1210_v30 = vld [vmem:[%s11886_s2 + $0x8] sm:$0xff]  ;;  %v669_v32 = vld [vmem:[%s11884_s0 + $0x80] sm:$0xff] }
   0xa   :  { %8018 = vmatmul.mubr.msk.f32.vlgmr.msra.gmra.mrb[0].mxu1 %vm83_vm3, %v54_v14  ;;  %8494 = vmatpush1.bf16.msk.msra.mxu0 %vm10207_vm2, %v10224_v11  ;;  %v1214_v31 = vld [vmem:[%s11886_s2 + $0x28] sm:$0xff]  ;;  %v1212_v33 = vld [vmem:[%s11886_s2 + $0x18] sm:$0xff]  ;;  %v671_v38 = vld [vmem:[%s11884_s0 + $0x90] sm:$0xff] }
   0xb   :  { %191 = vmatprep.mubr.f32.mxu0 %v10108_v10  ;;  %304 = vmatprep.mubr.f32.mxu1 %v10108_v10  ;;  %v1216_v34 = vld [vmem:[%s11886_s2 + $0x38] sm:$0xff]  ;;  %v10397_v35 = vpack.c.bf16 %v1214_v31, %v1210_v30  ;;  %v670_v37 = vld [vmem:[%s11884_s0 + $0x88] sm:$0xff]  ;;  %v673_v40 = vld [vmem:[%s11884_s0 + $0xa0] sm:$0xff] }
   0xc   :  { %8500 = vmatpush1.bf16.msk.msra.mxu1 %vm10207_vm2, %v10232_v13  ;;  %8503 = vmatprep.subr.msk.bf16.mxu0 %vm10207_vm2, %v10194_v2  ;;  %v10400_v36 = vpack.c.bf16 %v1216_v34, %v1212_v33  ;;  %v672_v39 = vld [vmem:[%s11884_s0 + $0x98] sm:$0xff]  ;;  %v674_v41 = vld [vmem:[%s11884_s0 + $0xa8] sm:$0xff]  ;;  %v675_v42 = vld [vmem:[%s11884_s0 + $0xb0] sm:$0xff] }
   0xd   :  { %8009 = vmatmul.mubr.msk.f32.gmra.mrb[2].mxu0 %vm83_vm3, %v55_v15  ;;  %8509 = vmatprep.subr.msk.bf16.mxu1 %vm10207_vm2, %v10211_v7  ;;  %v676_v43 = vld [vmem:[%s11884_s0 + $0xb8] sm:$0xff]  ;;  %v1209_v44 = vld [vmem:[%s11886_s2] sm:$0xff]  ;;  %v1218_v46 = vld [vmem:[%s11886_s2 + $0x48] sm:$0xff] }
   0xe   :  { %8019 = vmatmul.mubr.msk.f32.gmra.mrb[2].mxu1 %vm83_vm3, %v55_v15  ;;  %197 = vmatprep.mubr.f32.mxu0 %v10108_v10  ;;  %v1213_v45 = vld [vmem:[%s11886_s2 + $0x20] sm:$0xff]  ;;  %v1222_v47 = vld [vmem:[%s11886_s2 + $0x68] sm:$0xff]  ;;  %v1211_v48 = vld [vmem:[%s11886_s2 + $0x10] sm:$0xff] }
   0xf   :  { %310 = vmatprep.mubr.f32.mxu1 %v10108_v10  ;;  %v1215_v49 = vld [vmem:[%s11886_s2 + $0x30] sm:$0xff]  ;;  %v959_v50 = vld [vmem:[%s11884_s0 + $0xc0] sm:$0xff]  ;;  %v10482_v51 = vpack.c.bf16 %v1213_v45, %v1209_v44  ;;  %v1220_v52 = vld [vmem:[%s11886_s2 + $0x58] sm:$0xff]  ;;  %v10491_v54 = vpack.c.bf16 %v1222_v47, %v1218_v46 }
  0x10   :  { %v1224_v53 = vld [vmem:[%s11886_s2 + $0x78] sm:$0xff]  ;;  %v1217_v55 = vld [vmem:[%s11886_s2 + $0x40] sm:$0xff]  ;;  %v10499_v57 = vpack.c.bf16 %v1215_v49, %v1211_v48  ;;  %v1226_v58 = vld [vmem:[%s11886_s2 + $0x88] sm:$0xff] }
  0x11   :  { %8010 = vmatmul.mubr.msk.f32.gmra.mrb[4].mxu0 %vm83_vm3, %v56_v16  ;;  %v1221_v56 = vld [vmem:[%s11886_s2 + $0x60] sm:$0xff]  ;;  %v1230_v59 = vld [vmem:[%s11886_s2 + $0xa8] sm:$0xff]  ;;  %v10508_v60 = vpack.c.bf16 %v1224_v53, %v1220_v52  ;;  %v1219_v61 = vld [vmem:[%s11886_s2 + $0x50] sm:$0xff] }
  0x12   :  { %8020 = vmatmul.mubr.msk.f32.gmra.mrb[4].mxu1 %vm83_vm3, %v56_v16  ;;  %203 = vmatprep.mubr.f32.mxu0 %v10108_v10  ;;  %v1223_v62 = vld [vmem:[%s11886_s2 + $0x70] sm:$0xff]  ;;  %v960_v63 = vld [vmem:[%s11884_s0 + $0xc8] sm:$0xff]  ;;  %v1228_v0 = vld [vmem:[%s11886_s2 + $0x98] sm:$0xff]  ;;  %v10533_v3 = vpack.c.bf16 %v1230_v59, %v1226_v58 }
  0x13   :  { %316 = vmatprep.mubr.f32.mxu1 %v10108_v10  ;;  %v1232_v1 = vld [vmem:[%s11886_s2 + $0xb8] sm:$0xff]  ;;  %v1225_v4 = vld [vmem:[%s11886_s2 + $0x80] sm:$0xff]  ;;  %v10541_v6 = vpack.c.bf16 %v1223_v62, %v1219_v61  ;;  %v1227_v8 = vld [vmem:[%s11886_s2 + $0x90] sm:$0xff] }
  0x14   :  { %v1229_v5 = vld [vmem:[%s11886_s2 + $0xa0] sm:$0xff]  ;;  %v1231_v9 = vld [vmem:[%s11886_s2 + $0xb0] sm:$0xff]  ;;  %v10570_v14 = vld [vmem:[%s11886_s2 + $0xc8] sm:$0x3] }
  0x15   :  { %8011 = vmatmul.mubr.msk.f32.gmra.mrb[6].mxu0 %vm83_vm3, %v57_v17  ;;  %v10560_v12 = vpack.c.bf16 %v1229_v5, %v1225_v4  ;;  %v962_v15 = vld [vmem:[%s11884_s0 + $0xd8] sm:$0xff]  ;;  %vm9250_vm14 = vmpackc.low %vm6782_vm13, %vm10107_vm1  ;;  %vm7147_vm1 = vcmask 401408  }
  0x16   :  { %8021 = vmatmul.mubr.msk.f32.gmra.mrb[6].mxu1 %vm83_vm3, %v57_v17  ;;  %209 = vmatprep.mubr.f32.mxu0 %v10108_v10  ;;  %v10581_v16 = vld [vmem:[%s11886_s2 + $0xd8] sm:$0x3]  ;;  %v10590_v17 = vld [vmem:[%s11886_s2 + $0xc0] sm:$0x3] }
  0x17   :  { %322 = vmatprep.mubr.f32.mxu1 %v10108_v10 }
  0x19   :  { %8012 = vmatmul.mubr.msk.f32.gmra.mrb[8].mxu0 %vm83_vm3, %v58_v18 }
  0x1a   :  { %8022 = vmatmul.mubr.msk.f32.gmra.mrb[8].mxu1 %vm83_vm3, %v58_v18  ;;  %215 = vmatprep.mubr.f32.mxu0 %v10108_v10  ;;  %v10599_v18 = vld [vmem:[%s11886_s2 + $0xd0] sm:$0x3] }
  0x1b   :  { %328 = vmatprep.mubr.f32.mxu1 %v10108_v10 }
  0x1d   :  { %8013 = vmatmul.mubr.msk.f32.gmra.mrb[10].mxu0 %vm83_vm3, %v59_v19 }
  0x1e   :  { %8023 = vmatmul.mubr.msk.f32.gmra.mrb[10].mxu1 %vm83_vm3, %v59_v19  ;;  %221 = vmatprep.mubr.f32.mxu0 %v10108_v10  ;;  %v963_v19 = vld [vmem:[%s11884_s0 + $0xe0] sm:$0xff] }
  0x1f   :  { %334 = vmatprep.mubr.f32.mxu1 %v10108_v10 }
  0x21   :  { %8014 = vmatmul.mubr.msk.f32.gmra.mrb[12].mxu0 %vm83_vm3, %v60_v20 }
  0x22   :  { %8024 = vmatmul.mubr.msk.f32.gmra.mrb[12].mxu1 %vm83_vm3, %v60_v20  ;;  %227 = vmatprep.mubr.f32.mxu0 %v10108_v10  ;;  %v964_v20 = vld [vmem:[%s11884_s0 + $0xe8] sm:$0xff] }
  0x23   :  { %340 = vmatprep.mubr.f32.mxu1 %v10108_v10 }
  0x25   :  { %8015 = vmatmul.mubr.msk.f32.gmra.mrb[14].mxu0 %vm83_vm3, %v61_v21 }
  0x26   :  { %8025 = vmatmul.mubr.msk.f32.gmra.mrb[14].mxu1 %vm83_vm3, %v61_v21  ;;  %475 = vmatprep.mubr.f32.mxu0 %v10108_v10  ;;  %v63_v21 = vlaneseq }
  0x27   :  { %588 = vmatprep.mubr.f32.mxu1 %v10108_v10 }
  0x29   :  { %8028 = vmatmul.mubr.msk.f32.vlgmr.msra.gmra.mrb[16].mxu0 %vm83_vm3, %v379_v22 }
  0x2a   :  { %8038 = vmatmul.mubr.msk.f32.vlgmr.msra.gmra.mrb[16].mxu1 %vm83_vm3, %v379_v22  ;;  %8506 = vmatpush1.bf16.msk.msra.mxu0 %vm10207_vm2, %v10224_v11  ;;  %v10648_v22 = vshrl.u32 %v63_v21, 7 }
  0x2b   :  { %481 = vmatprep.mubr.f32.mxu0 %v10108_v10  ;;  %594 = vmatprep.mubr.f32.mxu1 %v10108_v10 }
  0x2c   :  { %8512 = vmatpush1.bf16.msk.msra.mxu1 %vm10207_vm2, %v10232_v13  ;;  %8515 = vmatprep.subr.msk.bf16.mxu0 %vm10207_vm2, %v10194_v2  ;;  %v10529_v2 = vpack.c.bf16 %v1221_v56, %v1217_v55 }
  0x2d   :  { %8029 = vmatmul.mubr.msk.f32.gmra.mrb[18].mxu0 %vm83_vm3, %v380_v23  ;;  %8521 = vmatprep.subr.msk.bf16.mxu1 %vm10207_vm2, %v10211_v7  ;;  %v10545_v7 = vpack.c.bf16 %v1232_v1, %v1228_v0 }
  0x2e   :  { %8039 = vmatmul.mubr.msk.f32.gmra.mrb[18].mxu1 %vm83_vm3, %v380_v23  ;;  %487 = vmatprep.mubr.f32.mxu0 %v10108_v10  ;;  %v65_v23 = vsub.s32 0, %v10648_v22 }
  0x2f   :  { %600 = vmatprep.mubr.f32.mxu1 %v10108_v10 }
  0x31   :  { %8030 = vmatmul.mubr.msk.f32.gmra.mrb[20].mxu0 %vm83_vm3, %v381_v24 }
  0x32   :  { %8040 = vmatmul.mubr.msk.f32.gmra.mrb[20].mxu1 %vm83_vm3, %v381_v24  ;;  %493 = vmatprep.mubr.f32.mxu0 %v10108_v10  ;;  %v53_v24 = vld [vmem:[%s11887_s3] sm:$0xf] }
  0x33   :  { %606 = vmatprep.mubr.f32.mxu1 %v10108_v10 }
  0x35   :  { %8031 = vmatmul.mubr.msk.f32.gmra.mrb[22].mxu0 %vm83_vm3, %v382_v25 }
  0x36   :  { %8041 = vmatmul.mubr.msk.f32.gmra.mrb[22].mxu1 %vm83_vm3, %v382_v25  ;;  %499 = vmatprep.mubr.f32.mxu0 %v10108_v10  ;;  %v69_v25 = vsub.s32 1, %v10648_v22 }
  0x37   :  { %612 = vmatprep.mubr.f32.mxu1 %v10108_v10 }
  0x39   :  { %8032 = vmatmul.mubr.msk.f32.gmra.mrb[24].mxu0 %vm83_vm3, %v383_v26 }
  0x3a   :  { %8042 = vmatmul.mubr.msk.f32.gmra.mrb[24].mxu1 %vm83_vm3, %v383_v26  ;;  %505 = vmatprep.mubr.f32.mxu0 %v10108_v10  ;;  %v10655_v26 = vrot.slane %v53_v24, %v65_v23 }
  0x3b   :  { %618 = vmatprep.mubr.f32.mxu1 %v10108_v10 }
  0x3d   :  { %8033 = vmatmul.mubr.msk.f32.gmra.mrb[26].mxu0 %vm83_vm3, %v384_v27 }
  0x3e   :  { %8043 = vmatmul.mubr.msk.f32.gmra.mrb[26].mxu1 %vm83_vm3, %v384_v27  ;;  %511 = vmatprep.mubr.f32.mxu0 %v10108_v10  ;;  %v10657_v27 = vrot.slane %v53_v24, %v69_v25 }
  0x3f   :  { %624 = vmatprep.mubr.f32.mxu1 %v10108_v10 }
  0x41   :  { %8034 = vmatmul.mubr.msk.f32.gmra.mrb[28].mxu0 %vm83_vm3, %v385_v28 }
  0x42   :  { %8044 = vmatmul.mubr.msk.f32.gmra.mrb[28].mxu1 %vm83_vm3, %v385_v28  ;;  %517 = vmatprep.mubr.f32.mxu0 %v10108_v10 }
  0x43   :  { %630 = vmatprep.mubr.f32.mxu1 %v10108_v10 }
  0x45   :  { %8035 = vmatmul.mubr.msk.f32.gmra.mrb[30].mxu0 %vm83_vm3, %v386_v29 }
  0x46   :  { %8045 = vmatmul.mubr.msk.f32.gmra.mrb[30].mxu1 %vm83_vm3, %v386_v29  ;;  %765 = vmatprep.mubr.f32.mxu0 %v10108_v10  ;;  %v77_v29 = vsub.s32 3, %v10648_v22 }
  0x47   :  { %878 = vmatprep.mubr.f32.mxu1 %v10108_v10 }
  0x49   :  { %8048 = vmatmul.mubr.msk.f32.vlgmr.msra.gmra.mrb[32].mxu0 %vm83_vm3, %v669_v32 }
  0x4a   :  { %8058 = vmatmul.mubr.msk.f32.vlgmr.msra.gmra.mrb[32].mxu1 %vm83_vm3, %v669_v32  ;;  %8518 = vmatpush1.bf16.msk.msra.mxu0 %vm10207_vm2, %v10224_v11  ;;  %v961_v11 = vld [vmem:[%s11884_s0 + $0xd0] sm:$0xff] }
  0x4b   :  { %771 = vmatprep.mubr.f32.mxu0 %v10108_v10  ;;  %884 = vmatprep.mubr.f32.mxu1 %v10108_v10 }
  0x4c   :  { %8524 = vmatpush1.bf16.msk.msra.mxu1 %vm10207_vm2, %v10232_v13  ;;  %8526 = vmatprep.subr.bf16.mxu0 %v10397_v35  ;;  %v10564_v13 = vpack.c.bf16 %v1231_v9, %v1227_v8 }
  0x4d   :  { %8049 = vmatmul.mubr.msk.f32.gmra.mrb[34].mxu0 %vm83_vm3, %v670_v37  ;;  %8538 = vmatprep.subr.bf16.mxu1 %v10400_v36 }
  0x4e   :  { %8059 = vmatmul.mubr.msk.f32.gmra.mrb[34].mxu1 %vm83_vm3, %v670_v37  ;;  %777 = vmatprep.mubr.f32.mxu0 %v10108_v10 }
  0x4f   :  { %890 = vmatprep.mubr.f32.mxu1 %v10108_v10 }
  0x51   :  { %8050 = vmatmul.mubr.msk.f32.gmra.mrb[36].mxu0 %vm83_vm3, %v671_v38 }
  0x52   :  { %8060 = vmatmul.mubr.msk.f32.gmra.mrb[36].mxu1 %vm83_vm3, %v671_v38  ;;  %783 = vmatprep.mubr.f32.mxu0 %v10108_v10 }
  0x53   :  { %896 = vmatprep.mubr.f32.mxu1 %v10108_v10 }
  0x55   :  { %8051 = vmatmul.mubr.msk.f32.gmra.mrb[38].mxu0 %vm83_vm3, %v672_v39 }
  0x56   :  { %8061 = vmatmul.mubr.msk.f32.gmra.mrb[38].mxu1 %vm83_vm3, %v672_v39  ;;  %789 = vmatprep.mubr.f32.mxu0 %v10108_v10  ;;  %v10662_v39 = vrot.slane %v53_v24, %v77_v29 }
  0x57   :  { %902 = vmatprep.mubr.f32.mxu1 %v10108_v10 }
  0x59   :  { %8052 = vmatmul.mubr.msk.f32.gmra.mrb[40].mxu0 %vm83_vm3, %v673_v40 }
  0x5a   :  { %8062 = vmatmul.mubr.msk.f32.gmra.mrb[40].mxu1 %vm83_vm3, %v673_v40  ;;  %795 = vmatprep.mubr.f32.mxu0 %v10108_v10  ;;  %v73_v40 = vsub.s32 2, %v10648_v22 }
  0x5b   :  { %908 = vmatprep.mubr.f32.mxu1 %v10108_v10 }
  0x5d   :  { %8053 = vmatmul.mubr.msk.f32.gmra.mrb[42].mxu0 %vm83_vm3, %v674_v41 }
  0x5e   :  { %8063 = vmatmul.mubr.msk.f32.gmra.mrb[42].mxu1 %vm83_vm3, %v674_v41  ;;  %801 = vmatprep.mubr.f32.mxu0 %v10108_v10 }
  0x5f   :  { %914 = vmatprep.mubr.f32.mxu1 %v10108_v10 }
  0x61   :  { %8054 = vmatmul.mubr.msk.f32.gmra.mrb[44].mxu0 %vm83_vm3, %v675_v42 }
  0x62   :  { %8064 = vmatmul.mubr.msk.f32.gmra.mrb[44].mxu1 %vm83_vm3, %v675_v42  ;;  %807 = vmatprep.mubr.f32.mxu0 %v10108_v10  ;;  %v10666_v42 = vrot.slane %v53_v24, %v73_v40 }
  0x63   :  { %920 = vmatprep.mubr.f32.mxu1 %v10108_v10 }
  0x65   :  { %8055 = vmatmul.mubr.msk.f32.gmra.mrb[46].mxu0 %vm83_vm3, %v676_v43 }
  0x66   :  { %8065 = vmatmul.mubr.msk.f32.gmra.mrb[46].mxu1 %vm83_vm3, %v676_v43  ;;  %1047 = vmatprep.mubr.f32.mxu0 %v10108_v10 }
  0x67   :  { %1148 = vmatprep.mubr.f32.mxu1 %v10108_v10 }
  0x69   :  { %8068 = vmatmul.mubr.msk.f32.vlgmr.msra.gmra.mrb[48].mxu0 %vm83_vm3, %v959_v50 }
  0x6a   :  { %8076 = vmatmul.mubr.msk.f32.vlgmr.msra.gmra.mrb[48].mxu1 %vm83_vm3, %v959_v50  ;;  %8528 = vmatpush1.bf16.msra.mxu0 %v10482_v51 }
  0x6b   :  { %1053 = vmatprep.mubr.f32.mxu0 %v10108_v10  ;;  %1154 = vmatprep.mubr.f32.mxu1 %v10108_v10 }
  0x6c   :  { %8530 = vmatprep.subr.bf16.mxu0 %v10491_v54  ;;  %8540 = vmatpush1.bf16.msra.mxu1 %v10499_v57 }
  0x6d   :  { %8069 = vmatmul.mubr.msk.f32.gmra.mrb[50].mxu0 %vm83_vm3, %v960_v63  ;;  %8542 = vmatprep.subr.bf16.mxu1 %v10508_v60 }
  0x6e   :  { %8077 = vmatmul.mubr.msk.f32.gmra.mrb[50].mxu1 %vm83_vm3, %v960_v63  ;;  %1059 = vmatprep.mubr.f32.mxu0 %v10108_v10 }
  0x6f   :  { %1160 = vmatprep.mubr.f32.mxu1 %v10108_v10  ;;  %8532 = vmatpush1.bf16.msra.mxu0 %v10529_v2 }
  0x70   :  { %8534 = vmatprep.subr.bf16.mxu0 %v10533_v3  ;;  %8544 = vmatpush1.bf16.msra.mxu1 %v10541_v6 }
  0x71   :  { %8070 = vmatmul.mubr.msk.f32.gmra.mrb[52].mxu0 %vm83_vm3, %v961_v11  ;;  %8546 = vmatprep.subr.bf16.mxu1 %v10545_v7 }
  0x72   :  { %8078 = vmatmul.mubr.msk.f32.gmra.mrb[52].mxu1 %vm83_vm3, %v961_v11  ;;  %1065 = vmatprep.mubr.f32.mxu0 %v10108_v10 }
  0x73   :  { %1166 = vmatprep.mubr.f32.mxu1 %v10108_v10  ;;  %8536 = vmatpush1.bf16.msra.mxu0 %v10560_v12 }
  0x74   :  { %8082 = vmatprep.subr.msk.mxu0 %vm108_vm0, %v10570_v14  ;;  %8548 = vmatpush1.bf16.msra.mxu1 %v10564_v13 }
  0x75   :  { %8071 = vmatmul.mubr.msk.f32.gmra.mrb[54].mxu0 %vm83_vm3, %v962_v15  ;;  %8084 = vmatprep.subr.msk.mxu1 %vm108_vm0, %v10581_v16 }
  0x76   :  { %8079 = vmatmul.mubr.msk.f32.gmra.mrb[54].mxu1 %vm83_vm3, %v962_v15  ;;  %1071 = vmatprep.mubr.f32.mxu0 %v10108_v10 }
  0x77   :  { %1172 = vmatprep.mubr.f32.mxu1 %v10108_v10  ;;  %8083 = vmatpush1.msk.msra.mxu0 %vm108_vm0, %v10590_v17 }
  0x78   :  { %8085 = vmatpush1.msk.msra.mxu1 %vm108_vm0, %v10599_v18  ;;  %8550 = vmatprep.subr.bf16.mxu0 %v10397_v35 }
  0x79   :  { %8072 = vmatmul.mubr.msk.f32.gmra.mrb[56].mxu0 %vm83_vm3, %v963_v19  ;;  %8562 = vmatprep.subr.bf16.mxu1 %v10400_v36 }
  0x7a   :  { %8080 = vmatmul.mubr.msk.f32.gmra.mrb[56].mxu1 %vm83_vm3, %v963_v19  ;;  %1077 = vmatprep.mubr.f32.mxu0 %v10108_v10 }
  0x7b   :  { %1178 = vmatprep.mubr.f32.mxu1 %v10108_v10 }
  0x7d   :  { %8073 = vmatmul.mubr.msk.f32.gmra.mrb[58].mxu0 %vm83_vm3, %v964_v20 }
  0x7e   :  { %8081 = vmatmul.mubr.msk.f32.gmra.mrb[58].mxu1 %vm83_vm3, %v964_v20  ;;  %1321 = vmatprep.mubr.f32.mxu0 %v10108_v10 }
  0x7f   :  { %1392 = vmatprep.mubr.f32.mxu1 %v10108_v10 }
  0x81   :  { %1322 = vmatmul.mubr.f32.vlgmr.msra.gmra.mrb[0].mxu0 %v10108_v10 }
  0x82   :  { %1393 = vmatmul.mubr.f32.vlgmr.msra.gmra.mrb[0].mxu1 %v10108_v10  ;;  %8552 = vmatpush1.bf16.msra.mxu0 %v10482_v51 }
  0x83   :  { %8564 = vmatpush1.bf16.msra.mxu1 %v10499_v57  ;;  %8554 = vmatprep.subr.bf16.mxu0 %v10491_v54 }
  0x84   :  { %8566 = vmatprep.subr.bf16.mxu1 %v10508_v60  ;;  %1499 = vmatprep.mubr.f32.mxu0 %v10108_v10 }
  0x85   :  { %1570 = vmatprep.mubr.f32.mxu1 %v10108_v10 }
  0x86   :  { %8556 = vmatpush1.bf16.msra.mxu0 %v10529_v2 }
  0x87   :  { %8568 = vmatpush1.bf16.msra.mxu1 %v10541_v6  ;;  %8558 = vmatprep.subr.bf16.mxu0 %v10533_v3 }
  0x88   :  { %8570 = vmatprep.subr.bf16.mxu1 %v10545_v7 }
  0x8a   :  { %8560 = vmatpush1.bf16.msra.mxu0 %v10560_v12 }
  0x8b   :  { %8572 = vmatpush1.bf16.msra.mxu1 %v10564_v13  ;;  %8089 = vmatprep.subr.msk.mxu0 %vm108_vm0, %v10570_v14 }
  0x8c   :  { %8092 = vmatprep.subr.msk.mxu1 %vm108_vm0, %v10581_v16 }
  0x8e   :  { %8090 = vmatpush1.msk.msra.mxu0 %vm108_vm0, %v10590_v17 }
  0x8f   :  { %8093 = vmatpush1.msk.msra.mxu1 %vm108_vm0, %v10599_v18  ;;  %8574 = vmatprep.subr.bf16.mxu0 %v10397_v35 }
  0x90   :  { %8586 = vmatprep.subr.bf16.mxu1 %v10400_v36 }
 0x154   :  { %v1323_v28 = vpop.f32.mrb[0].mxu0 }
 0x155   :  { %v9286_v30 = vadd.f32 %v1323_v28, %v10655_v26  ;;  %v1394_v31 = vpop.f32.mrb[0].mxu1  ;;  %v1325_v32 = vpop.f32.mrb[1].mxu0 }
 0x156   :  { %v9287_v33 = vadd.f32 %v1325_v32, %v10657_v27  ;;  %v1396_v34 = vpop.f32.mrb[1].mxu1  ;;  %v9302_v44 = vadd.f32 %v1394_v31, %v10666_v42 }
 0x157   :  { %v8086_v37 = vmul.f32 -1.442695, %v9286_v30  ;;  %v9303_v41 = vadd.f32 %v1396_v34, %v10662_v39 }
 0x158   :  { %v8087_v38 = vmul.f32 -1.442695, %v9287_v33 }
 0x159   :  { %9555 = vpow2.f32 %v8086_v37  ;;  %v8088_v43 = vmul.f32 -1.442695, %v9303_v41 }
 0x15a   :  { %9557 = vpow2.f32 %v8087_v38 }
 0x15b   :  { %9559 = vpow2.f32 %v8088_v43 }
 0x15c   :  { %9561 = vtanh.f32 %v9302_v44 }
 0x163   :  { %v9556_v45 = vpop.eup %9555 }
 0x164   :  { %v9558_v46 = vpop.eup %9557  ;;  %v1406_v47 = vadd.f32 1.0, %v9556_v45 }
 0x165   :  { %v1412_v48 = vadd.f32 1.0, %v9558_v46  ;;  %v9560_v49 = vpop.eup %9559 }
 0x166   :  { %9563 = vrcp.f32 %v1406_v47  ;;  %v9562_v50 = vpop.eup %9561  ;;  %v1419_v56 = vadd.f32 1.0, %v9560_v49 }
 0x167   :  { %9565 = vrcp.f32 %v1412_v48 }
 0x168   :  { %9567 = vrcp.f32 %v1419_v56 }
 0x170   :  { %v9564_v52 = vpop.eup %9563 }
 0x171   :  { %v9566_v53 = vpop.eup %9565  ;;  %v1423_v55 = vmul.f32 %v9564_v52, %v9562_v50 }
 0x172   :  { %v1422_v58 = vmul.f32 0.0, %v9566_v53  ;;  %v9568_v61 = vpop.eup %9567 }
 0x174   :  { %v1424_v59 = vadd.f32 %v1423_v55, %v1422_v58 }
 0x176   :  { %9569 = vtanh.f32 %v1424_v59 }
 0x180   :  { %v9570_v62 = vpop.eup %9569 }
 0x181   :  { %v1426_v63 = vmul.f32 %v9570_v62, %v9568_v61 }
 0x183   :  { %1427 = vst.msk [vmem:[#allocation3] sm:$0xff] %vm1241_vm4, %v1426_v63  ;;  %8091 = vmatmul.mubr.msk.f32.vlgmr.msra.gmra.mrb[2].mxu0 %vm1241_vm4, %v1426_v63  ;;  %8094 = vmatmul.mubr.msk.f32.vlgmr.msra.gmra.mrb[2].mxu1 %vm1241_vm4, %v1426_v63 }
 0x184   :  { %8576 = vmatpush1.bf16.msra.mxu0 %v10482_v51  ;;  %8588 = vmatpush1.bf16.msra.mxu1 %v10499_v57 }
 0x185   :  { %8578 = vmatprep.subr.bf16.mxu0 %v10491_v54  ;;  %8590 = vmatprep.subr.bf16.mxu1 %v10508_v60 }
 0x186   :  { %1678 = vmatprep.mubr.f32.mxu0 %v10108_v10  ;;  %1749 = vmatprep.mubr.f32.mxu1 %v10108_v10 }
 0x188   :  { %8580 = vmatpush1.bf16.msra.mxu0 %v10529_v2  ;;  %8592 = vmatpush1.bf16.msra.mxu1 %v10541_v6 }
 0x189   :  { %8582 = vmatprep.subr.bf16.mxu0 %v10533_v3  ;;  %8594 = vmatprep.subr.bf16.mxu1 %v10545_v7 }
 0x18c   :  { %8584 = vmatpush1.bf16.msra.mxu0 %v10560_v12  ;;  %8596 = vmatpush1.bf16.msra.mxu1 %v10564_v13 }
 0x18d   :  { %8098 = vmatprep.subr.msk.mxu0 %vm108_vm0, %v10570_v14  ;;  %8101 = vmatprep.subr.msk.mxu1 %vm108_vm0, %v10581_v16 }
 0x190   :  { %8099 = vmatpush1.msk.msra.mxu0 %vm108_vm0, %v10590_v17  ;;  %8102 = vmatpush1.msk.msra.mxu1 %vm108_vm0, %v10599_v18 }
 0x191   :  { %8598 = vmatprep.subr.bf16.mxu0 %v10397_v35  ;;  %8610 = vmatprep.subr.bf16.mxu1 %v10400_v36 }
 0x256   :  { %v1501_v0 = vpop.f32.mrb[2].mxu0  ;;  %v1572_v1 = vpop.f32.mrb[2].mxu1 }
 0x257   :  { %v9288_v4 = vadd.f32 %v1501_v0, %v10655_v26  ;;  %v1503_v5 = vpop.f32.mrb[3].mxu0  ;;  %v1574_v8 = vpop.f32.mrb[3].mxu1  ;;  %v9304_v21 = vadd.f32 %v1572_v1, %v10666_v42 }
 0x258   :  { %v9289_v9 = vadd.f32 %v1503_v5, %v10657_v27  ;;  %v9305_v19 = vadd.f32 %v1574_v8, %v10662_v39 }
 0x259   :  { %v8095_v11 = vmul.f32 -1.442695, %v9288_v4 }
 0x25a   :  { %v8096_v15 = vmul.f32 -1.442695, %v9289_v9  ;;  %v8097_v20 = vmul.f32 -1.442695, %v9305_v19 }
 0x25b   :  { %9571 = vpow2.f32 %v8095_v11 }
 0x25c   :  { %9573 = vpow2.f32 %v8096_v15 }
 0x25d   :  { %9575 = vpow2.f32 %v8097_v20 }
 0x25e   :  { %9577 = vtanh.f32 %v9304_v21 }
 0x265   :  { %v9572_v23 = vpop.eup %9571 }
 0x266   :  { %v9574_v24 = vpop.eup %9573  ;;  %v1584_v25 = vadd.f32 1.0, %v9572_v23 }
 0x267   :  { %v1590_v28 = vadd.f32 1.0, %v9574_v24  ;;  %v9576_v29 = vpop.eup %9575 }
 0x268   :  { %9579 = vrcp.f32 %v1584_v25  ;;  %v9578_v30 = vpop.eup %9577  ;;  %v1597_v34 = vadd.f32 1.0, %v9576_v29 }
 0x269   :  { %9581 = vrcp.f32 %v1590_v28 }
 0x26a   :  { %9583 = vrcp.f32 %v1597_v34 }
 0x272   :  { %v9580_v31 = vpop.eup %9579 }
 0x273   :  { %v9582_v32 = vpop.eup %9581  ;;  %v1601_v33 = vmul.f32 %v9580_v31, %v9578_v30 }
 0x274   :  { %v1600_v37 = vmul.f32 %v9582_v32, %v1424_v59  ;;  %v9584_v40 = vpop.eup %9583 }
 0x276   :  { %v1602_v38 = vadd.f32 %v1601_v33, %v1600_v37 }
 0x278   :  { %9585 = vtanh.f32 %v1602_v38 }
 0x282   :  { %v9586_v41 = vpop.eup %9585 }
 0x283   :  { %v1604_v43 = vmul.f32 %v9586_v41, %v9584_v40 }
 0x285   :  { %1606 = vst.msk [vmem:[#allocation3 + $0x8] sm:$0xff] %vm1241_vm4, %v1604_v43  ;;  %8100 = vmatmul.mubr.msk.f32.vlgmr.msra.gmra.mrb[4].mxu0 %vm1241_vm4, %v1604_v43  ;;  %8103 = vmatmul.mubr.msk.f32.vlgmr.msra.gmra.mrb[4].mxu1 %vm1241_vm4, %v1604_v43 }
 0x286   :  { %8600 = vmatpush1.bf16.msra.mxu0 %v10482_v51  ;;  %8612 = vmatpush1.bf16.msra.mxu1 %v10499_v57 }
 0x287   :  { %8602 = vmatprep.subr.bf16.mxu0 %v10491_v54  ;;  %8614 = vmatprep.subr.bf16.mxu1 %v10508_v60 }
 0x288   :  { %1857 = vmatprep.mubr.f32.mxu0 %v10108_v10  ;;  %1928 = vmatprep.mubr.f32.mxu1 %v10108_v10 }
 0x28a   :  { %8604 = vmatpush1.bf16.msra.mxu0 %v10529_v2  ;;  %8616 = vmatpush1.bf16.msra.mxu1 %v10541_v6 }
 0x28b   :  { %8606 = vmatprep.subr.bf16.mxu0 %v10533_v3  ;;  %8618 = vmatprep.subr.bf16.mxu1 %v10545_v7 }
 0x28e   :  { %8608 = vmatpush1.bf16.msra.mxu0 %v10560_v12  ;;  %8620 = vmatpush1.bf16.msra.mxu1 %v10564_v13 }
 0x28f   :  { %8107 = vmatprep.subr.msk.mxu0 %vm108_vm0, %v10570_v14  ;;  %8110 = vmatprep.subr.msk.mxu1 %vm108_vm0, %v10581_v16 }
 0x292   :  { %8108 = vmatpush1.msk.msra.mxu0 %vm108_vm0, %v10590_v17  ;;  %8111 = vmatpush1.msk.msra.mxu1 %vm108_vm0, %v10599_v18 }
 0x293   :  { %8622 = vmatprep.subr.bf16.mxu0 %v10397_v35  ;;  %8634 = vmatprep.subr.bf16.mxu1 %v10400_v36 }
 0x358   :  { %v1680_v44 = vpop.f32.mrb[4].mxu0  ;;  %v1751_v45 = vpop.f32.mrb[4].mxu1 }
 0x359   :  { %v9290_v46 = vadd.f32 %v1680_v44, %v10655_v26  ;;  %v1682_v47 = vpop.f32.mrb[5].mxu0  ;;  %v1753_v48 = vpop.f32.mrb[5].mxu1  ;;  %v9306_v56 = vadd.f32 %v1751_v45, %v10666_v42 }
 0x35a   :  { %v9291_v49 = vadd.f32 %v1682_v47, %v10657_v27  ;;  %v9307_v53 = vadd.f32 %v1753_v48, %v10662_v39 }
 0x35b   :  { %v8104_v50 = vmul.f32 -1.442695, %v9290_v46 }
 0x35c   :  { %v8105_v52 = vmul.f32 -1.442695, %v9291_v49  ;;  %v8106_v55 = vmul.f32 -1.442695, %v9307_v53 }
 0x35d   :  { %9587 = vpow2.f32 %v8104_v50 }
 0x35e   :  { %9589 = vpow2.f32 %v8105_v52 }
 0x35f   :  { %9591 = vpow2.f32 %v8106_v55 }
 0x360   :  { %9593 = vtanh.f32 %v9306_v56 }
 0x367   :  { %v9588_v58 = vpop.eup %9587 }
 0x368   :  { %v9590_v59 = vpop.eup %9589  ;;  %v1763_v61 = vadd.f32 1.0, %v9588_v58 }
 0x369   :  { %v1769_v62 = vadd.f32 1.0, %v9590_v59  ;;  %v9592_v63 = vpop.eup %9591 }
 0x36a   :  { %9595 = vrcp.f32 %v1763_v61  ;;  %v9594_v0 = vpop.eup %9593  ;;  %v1776_v8 = vadd.f32 1.0, %v9592_v63 }
 0x36b   :  { %9597 = vrcp.f32 %v1769_v62 }
 0x36c   :  { %9599 = vrcp.f32 %v1776_v8 }
 0x374   :  { %v9596_v1 = vpop.eup %9595 }
 0x375   :  { %v9598_v4 = vpop.eup %9597  ;;  %v1780_v5 = vmul.f32 %v9596_v1, %v9594_v0 }
 0x376   :  { %v1779_v9 = vmul.f32 %v9598_v4, %v1602_v38  ;;  %v9600_v15 = vpop.eup %9599 }
 0x378   :  { %v1781_v11 = vadd.f32 %v1780_v5, %v1779_v9 }
 0x37a   :  { %9601 = vtanh.f32 %v1781_v11 }
 0x384   :  { %v9602_v19 = vpop.eup %9601 }
 0x385   :  { %v1783_v20 = vmul.f32 %v9602_v19, %v9600_v15 }
 0x387   :  { %1785 = vst.msk [vmem:[#allocation3 + $0x10] sm:$0xff] %vm1241_vm4, %v1783_v20  ;;  %8109 = vmatmul.mubr.msk.f32.vlgmr.msra.gmra.mrb[6].mxu0 %vm1241_vm4, %v1783_v20  ;;  %8112 = vmatmul.mubr.msk.f32.vlgmr.msra.gmra.mrb[6].mxu1 %vm1241_vm4, %v1783_v20 }
 0x388   :  { %8624 = vmatpush1.bf16.msra.mxu0 %v10482_v51  ;;  %8636 = vmatpush1.bf16.msra.mxu1 %v10499_v57 }
 0x389   :  { %8626 = vmatprep.subr.bf16.mxu0 %v10491_v54  ;;  %8638 = vmatprep.subr.bf16.mxu1 %v10508_v60 }
 0x38a   :  { %2036 = vmatprep.mubr.f32.mxu0 %v10108_v10  ;;  %2107 = vmatprep.mubr.f32.mxu1 %v10108_v10 }
 0x38c   :  { %8628 = vmatpush1.bf16.msra.mxu0 %v10529_v2  ;;  %8640 = vmatpush1.bf16.msra.mxu1 %v10541_v6 }
 0x38d   :  { %8630 = vmatprep.subr.bf16.mxu0 %v10533_v3  ;;  %8642 = vmatprep.subr.bf16.mxu1 %v10545_v7 }
 0x390   :  { %8632 = vmatpush1.bf16.msra.mxu0 %v10560_v12  ;;  %8644 = vmatpush1.bf16.msra.mxu1 %v10564_v13 }
 0x391   :  { %8116 = vmatprep.subr.msk.mxu0 %vm108_vm0, %v10570_v14  ;;  %8119 = vmatprep.subr.msk.mxu1 %vm108_vm0, %v10581_v16 }
 0x394   :  { %8117 = vmatpush1.msk.msra.mxu0 %vm108_vm0, %v10590_v17  ;;  %8120 = vmatpush1.msk.msra.mxu1 %vm108_vm0, %v10599_v18 }
 0x395   :  { %8646 = vmatprep.subr.bf16.mxu0 %v10397_v35  ;;  %8658 = vmatprep.subr.bf16.mxu1 %v10400_v36 }
 0x45a   :  { %v1859_v21 = vpop.f32.mrb[6].mxu0  ;;  %v1930_v23 = vpop.f32.mrb[6].mxu1 }
 0x45b   :  { %v9292_v24 = vadd.f32 %v1859_v21, %v10655_v26  ;;  %v1861_v25 = vpop.f32.mrb[7].mxu0  ;;  %v1932_v28 = vpop.f32.mrb[7].mxu1  ;;  %v9308_v34 = vadd.f32 %v1930_v23, %v10666_v42 }
 0x45c   :  { %v9293_v29 = vadd.f32 %v1861_v25, %v10657_v27  ;;  %v9309_v32 = vadd.f32 %v1932_v28, %v10662_v39 }
 0x45d   :  { %v8113_v30 = vmul.f32 -1.442695, %v9292_v24 }
 0x45e   :  { %v8114_v31 = vmul.f32 -1.442695, %v9293_v29  ;;  %v8115_v33 = vmul.f32 -1.442695, %v9309_v32 }
 0x45f   :  { %9603 = vpow2.f32 %v8113_v30 }
 0x460   :  { %9605 = vpow2.f32 %v8114_v31 }
 0x461   :  { %9607 = vpow2.f32 %v8115_v33 }
 0x462   :  { %9609 = vtanh.f32 %v9308_v34 }
 0x469   :  { %v9604_v37 = vpop.eup %9603 }
 0x46a   :  { %v9606_v38 = vpop.eup %9605  ;;  %v1942_v40 = vadd.f32 1.0, %v9604_v37 }
 0x46b   :  { %v1948_v41 = vadd.f32 1.0, %v9606_v38  ;;  %v9608_v43 = vpop.eup %9607 }
 0x46c   :  { %9611 = vrcp.f32 %v1942_v40  ;;  %v9610_v44 = vpop.eup %9609  ;;  %v1955_v48 = vadd.f32 1.0, %v9608_v43 }
 0x46d   :  { %9613 = vrcp.f32 %v1948_v41 }
 0x46e   :  { %9615 = vrcp.f32 %v1955_v48 }
 0x476   :  { %v9612_v45 = vpop.eup %9611 }
 0x477   :  { %v9614_v46 = vpop.eup %9613  ;;  %v1959_v47 = vmul.f32 %v9612_v45, %v9610_v44 }
 0x478   :  { %v1958_v49 = vmul.f32 %v9614_v46, %v1781_v11  ;;  %v9616_v52 = vpop.eup %9615 }
 0x47a   :  { %v1960_v50 = vadd.f32 %v1959_v47, %v1958_v49 }
 0x47c   :  { %9617 = vtanh.f32 %v1960_v50 }
 0x486   :  { %v9618_v53 = vpop.eup %9617 }
 0x487   :  { %v1962_v55 = vmul.f32 %v9618_v53, %v9616_v52 }
 0x489   :  { %1964 = vst.msk [vmem:[#allocation3 + $0x18] sm:$0xff] %vm1241_vm4, %v1962_v55  ;;  %8118 = vmatmul.mubr.msk.f32.vlgmr.msra.gmra.mrb[8].mxu0 %vm1241_vm4, %v1962_v55  ;;  %8121 = vmatmul.mubr.msk.f32.vlgmr.msra.gmra.mrb[8].mxu1 %vm1241_vm4, %v1962_v55 }
 0x48a   :  { %8648 = vmatpush1.bf16.msra.mxu0 %v10482_v51  ;;  %8660 = vmatpush1.bf16.msra.mxu1 %v10499_v57 }
 0x48b   :  { %8650 = vmatprep.subr.bf16.mxu0 %v10491_v54  ;;  %8662 = vmatprep.subr.bf16.mxu1 %v10508_v60 }
 0x48c   :  { %2215 = vmatprep.mubr.f32.mxu0 %v10108_v10  ;;  %2286 = vmatprep.mubr.f32.mxu1 %v10108_v10 }
 0x48e   :  { %8652 = vmatpush1.bf16.msra.mxu0 %v10529_v2  ;;  %8664 = vmatpush1.bf16.msra.mxu1 %v10541_v6 }
 0x48f   :  { %8654 = vmatprep.subr.bf16.mxu0 %v10533_v3  ;;  %8666 = vmatprep.subr.bf16.mxu1 %v10545_v7 }
 0x492   :  { %8656 = vmatpush1.bf16.msra.mxu0 %v10560_v12  ;;  %8668 = vmatpush1.bf16.msra.mxu1 %v10564_v13 }
 0x493   :  { %8125 = vmatprep.subr.msk.mxu0 %vm108_vm0, %v10570_v14  ;;  %8128 = vmatprep.subr.msk.mxu1 %vm108_vm0, %v10581_v16 }
 0x496   :  { %8126 = vmatpush1.msk.msra.mxu0 %vm108_vm0, %v10590_v17  ;;  %8129 = vmatpush1.msk.msra.mxu1 %vm108_vm0, %v10599_v18 }
 0x497   :  { %8670 = vmatprep.subr.bf16.mxu0 %v10397_v35  ;;  %8682 = vmatprep.subr.bf16.mxu1 %v10400_v36 }
 0x55c   :  { %v2038_v56 = vpop.f32.mrb[8].mxu0  ;;  %v2109_v58 = vpop.f32.mrb[8].mxu1 }
 0x55d   :  { %v9294_v59 = vadd.f32 %v2038_v56, %v10655_v26  ;;  %v2040_v61 = vpop.f32.mrb[9].mxu0  ;;  %v2111_v62 = vpop.f32.mrb[9].mxu1  ;;  %v9310_v8 = vadd.f32 %v2109_v58, %v10666_v42 }
 0x55e   :  { %v9295_v63 = vadd.f32 %v2040_v61, %v10657_v27  ;;  %v9311_v4 = vadd.f32 %v2111_v62, %v10662_v39 }
 0x55f   :  { %v8122_v0 = vmul.f32 -1.442695, %v9294_v59 }
 0x560   :  { %v8123_v1 = vmul.f32 -1.442695, %v9295_v63  ;;  %v8124_v5 = vmul.f32 -1.442695, %v9311_v4 }
 0x561   :  { %9619 = vpow2.f32 %v8122_v0 }
 0x562   :  { %9621 = vpow2.f32 %v8123_v1 }
 0x563   :  { %9623 = vpow2.f32 %v8124_v5 }
 0x564   :  { %9625 = vtanh.f32 %v9310_v8 }
 0x56b   :  { %v9620_v9 = vpop.eup %9619 }
 0x56c   :  { %v9622_v11 = vpop.eup %9621  ;;  %v2121_v15 = vadd.f32 1.0, %v9620_v9 }
 0x56d   :  { %v2127_v19 = vadd.f32 1.0, %v9622_v11  ;;  %v9624_v20 = vpop.eup %9623 }
 0x56e   :  { %9627 = vrcp.f32 %v2121_v15  ;;  %v9626_v21 = vpop.eup %9625  ;;  %v2134_v28 = vadd.f32 1.0, %v9624_v20 }
 0x56f   :  { %9629 = vrcp.f32 %v2127_v19 }
 0x570   :  { %9631 = vrcp.f32 %v2134_v28 }
 0x578   :  { %v9628_v23 = vpop.eup %9627 }
 0x579   :  { %v9630_v24 = vpop.eup %9629  ;;  %v2138_v25 = vmul.f32 %v9628_v23, %v9626_v21 }
 0x57a   :  { %v2137_v29 = vmul.f32 %v9630_v24, %v1960_v50  ;;  %v9632_v31 = vpop.eup %9631 }
 0x57c   :  { %v2139_v30 = vadd.f32 %v2138_v25, %v2137_v29 }
 0x57e   :  { %9633 = vtanh.f32 %v2139_v30 }
 0x588   :  { %v9634_v32 = vpop.eup %9633 }
 0x589   :  { %v2141_v33 = vmul.f32 %v9634_v32, %v9632_v31 }
 0x58b   :  { %2143 = vst.msk [vmem:[#allocation3 + $0x20] sm:$0xff] %vm1241_vm4, %v2141_v33  ;;  %8127 = vmatmul.mubr.msk.f32.vlgmr.msra.gmra.mrb[10].mxu0 %vm1241_vm4, %v2141_v33  ;;  %8130 = vmatmul.mubr.msk.f32.vlgmr.msra.gmra.mrb[10].mxu1 %vm1241_vm4, %v2141_v33 }
 0x58c   :  { %8672 = vmatpush1.bf16.msra.mxu0 %v10482_v51  ;;  %8684 = vmatpush1.bf16.msra.mxu1 %v10499_v57 }
 0x58d   :  { %8674 = vmatprep.subr.bf16.mxu0 %v10491_v54  ;;  %8686 = vmatprep.subr.bf16.mxu1 %v10508_v60 }
 0x58e   :  { %2394 = vmatprep.mubr.f32.mxu0 %v10108_v10  ;;  %2465 = vmatprep.mubr.f32.mxu1 %v10108_v10 }
 0x590   :  { %8676 = vmatpush1.bf16.msra.mxu0 %v10529_v2  ;;  %8688 = vmatpush1.bf16.msra.mxu1 %v10541_v6 }
 0x591   :  { %8678 = vmatprep.subr.bf16.mxu0 %v10533_v3  ;;  %8690 = vmatprep.subr.bf16.mxu1 %v10545_v7 }
 0x594   :  { %8680 = vmatpush1.bf16.msra.mxu0 %v10560_v12  ;;  %8692 = vmatpush1.bf16.msra.mxu1 %v10564_v13 }
 0x595   :  { %8134 = vmatprep.subr.msk.mxu0 %vm108_vm0, %v10570_v14  ;;  %8137 = vmatprep.subr.msk.mxu1 %vm108_vm0, %v10581_v16 }
 0x598   :  { %8135 = vmatpush1.msk.msra.mxu0 %vm108_vm0, %v10590_v17  ;;  %8138 = vmatpush1.msk.msra.mxu1 %vm108_vm0, %v10599_v18 }
 0x599   :  { %8694 = vmatprep.subr.bf16.mxu0 %v10397_v35  ;;  %8706 = vmatprep.subr.bf16.mxu1 %v10400_v36 }
 0x65e   :  { %v2217_v34 = vpop.f32.mrb[10].mxu0  ;;  %v2288_v37 = vpop.f32.mrb[10].mxu1 }
 0x65f   :  { %v9296_v38 = vadd.f32 %v2217_v34, %v10655_v26  ;;  %v2219_v40 = vpop.f32.mrb[11].mxu0  ;;  %v2290_v41 = vpop.f32.mrb[11].mxu1  ;;  %v9312_v48 = vadd.f32 %v2288_v37, %v10666_v42 }
 0x660   :  { %v9297_v43 = vadd.f32 %v2219_v40, %v10657_v27  ;;  %v9313_v46 = vadd.f32 %v2290_v41, %v10662_v39 }
 0x661   :  { %v8131_v44 = vmul.f32 -1.442695, %v9296_v38 }
 0x662   :  { %v8132_v45 = vmul.f32 -1.442695, %v9297_v43  ;;  %v8133_v47 = vmul.f32 -1.442695, %v9313_v46 }
 0x663   :  { %9635 = vpow2.f32 %v8131_v44 }
 0x664   :  { %9637 = vpow2.f32 %v8132_v45 }
 0x665   :  { %9639 = vpow2.f32 %v8133_v47 }
 0x666   :  { %9641 = vtanh.f32 %v9312_v48 }
 0x66d   :  { %v9636_v49 = vpop.eup %9635 }
 0x66e   :  { %v9638_v50 = vpop.eup %9637  ;;  %v2300_v52 = vadd.f32 1.0, %v9636_v49 }
 0x66f   :  { %v2306_v53 = vadd.f32 1.0, %v9638_v50  ;;  %v9640_v55 = vpop.eup %9639 }
 0x670   :  { %9643 = vrcp.f32 %v2300_v52  ;;  %v9642_v56 = vpop.eup %9641  ;;  %v2313_v62 = vadd.f32 1.0, %v9640_v55 }
 0x671   :  { %9645 = vrcp.f32 %v2306_v53 }
 0x672   :  { %9647 = vrcp.f32 %v2313_v62 }
 0x67a   :  { %v9644_v58 = vpop.eup %9643 }
 0x67b   :  { %v9646_v59 = vpop.eup %9645  ;;  %v2317_v61 = vmul.f32 %v9644_v58, %v9642_v56 }
 0x67c   :  { %v2316_v63 = vmul.f32 %v9646_v59, %v2139_v30  ;;  %v9648_v1 = vpop.eup %9647 }
 0x67e   :  { %v2318_v0 = vadd.f32 %v2317_v61, %v2316_v63 }
 0x680   :  { %9649 = vtanh.f32 %v2318_v0 }
 0x68a   :  { %v9650_v4 = vpop.eup %9649 }
 0x68b   :  { %v2320_v5 = vmul.f32 %v9650_v4, %v9648_v1 }
 0x68d   :  { %2322 = vst.msk [vmem:[#allocation3 + $0x28] sm:$0xff] %vm1241_vm4, %v2320_v5  ;;  %8136 = vmatmul.mubr.msk.f32.vlgmr.msra.gmra.mrb[12].mxu0 %vm1241_vm4, %v2320_v5  ;;  %8139 = vmatmul.mubr.msk.f32.vlgmr.msra.gmra.mrb[12].mxu1 %vm1241_vm4, %v2320_v5 }
 0x68e   :  { %8696 = vmatpush1.bf16.msra.mxu0 %v10482_v51  ;;  %8708 = vmatpush1.bf16.msra.mxu1 %v10499_v57 }
 0x68f   :  { %8698 = vmatprep.subr.bf16.mxu0 %v10491_v54  ;;  %8710 = vmatprep.subr.bf16.mxu1 %v10508_v60 }
 0x690   :  { %2573 = vmatprep.mubr.f32.mxu0 %v10108_v10  ;;  %2644 = vmatprep.mubr.f32.mxu1 %v10108_v10 }
 0x692   :  { %8700 = vmatpush1.bf16.msra.mxu0 %v10529_v2  ;;  %8712 = vmatpush1.bf16.msra.mxu1 %v10541_v6 }
 0x693   :  { %8702 = vmatprep.subr.bf16.mxu0 %v10533_v3  ;;  %8714 = vmatprep.subr.bf16.mxu1 %v10545_v7 }
 0x696   :  { %8704 = vmatpush1.bf16.msra.mxu0 %v10560_v12  ;;  %8716 = vmatpush1.bf16.msra.mxu1 %v10564_v13 }
 0x697   :  { %8143 = vmatprep.subr.msk.mxu0 %vm108_vm0, %v10570_v14  ;;  %8146 = vmatprep.subr.msk.mxu1 %vm108_vm0, %v10581_v16 }
 0x69a   :  { %8144 = vmatpush1.msk.msra.mxu0 %vm108_vm0, %v10590_v17  ;;  %8147 = vmatpush1.msk.msra.mxu1 %vm108_vm0, %v10599_v18 }
 0x69b   :  { %8718 = vmatprep.subr.bf16.mxu0 %v10397_v35  ;;  %8730 = vmatprep.subr.bf16.mxu1 %v10400_v36 }
 0x760   :  { %v2396_v8 = vpop.f32.mrb[12].mxu0  ;;  %v2467_v9 = vpop.f32.mrb[12].mxu1 }
 0x761   :  { %v9298_v11 = vadd.f32 %v2396_v8, %v10655_v26  ;;  %v2398_v15 = vpop.f32.mrb[13].mxu0  ;;  %v2469_v19 = vpop.f32.mrb[13].mxu1  ;;  %v9314_v28 = vadd.f32 %v2467_v9, %v10666_v42 }
 0x762   :  { %v9299_v20 = vadd.f32 %v2398_v15, %v10657_v27  ;;  %v9315_v24 = vadd.f32 %v2469_v19, %v10662_v39 }
 0x763   :  { %v8140_v21 = vmul.f32 -1.442695, %v9298_v11 }
 0x764   :  { %v8141_v23 = vmul.f32 -1.442695, %v9299_v20  ;;  %v8142_v25 = vmul.f32 -1.442695, %v9315_v24 }
 0x765   :  { %9651 = vpow2.f32 %v8140_v21 }
 0x766   :  { %9653 = vpow2.f32 %v8141_v23 }
 0x767   :  { %9655 = vpow2.f32 %v8142_v25 }
 0x768   :  { %9657 = vtanh.f32 %v9314_v28 }
 0x76f   :  { %v9652_v29 = vpop.eup %9651 }
 0x770   :  { %v9654_v30 = vpop.eup %9653  ;;  %v2479_v31 = vadd.f32 1.0, %v9652_v29 }
 0x771   :  { %v2485_v32 = vadd.f32 1.0, %v9654_v30  ;;  %v9656_v33 = vpop.eup %9655 }
 0x772   :  { %9659 = vrcp.f32 %v2479_v31  ;;  %v9658_v34 = vpop.eup %9657  ;;  %v2492_v41 = vadd.f32 1.0, %v9656_v33 }
 0x773   :  { %9661 = vrcp.f32 %v2485_v32 }
 0x774   :  { %9663 = vrcp.f32 %v2492_v41 }
 0x77c   :  { %v9660_v37 = vpop.eup %9659 }
 0x77d   :  { %v9662_v38 = vpop.eup %9661  ;;  %v2496_v40 = vmul.f32 %v9660_v37, %v9658_v34 }
 0x77e   :  { %v2495_v43 = vmul.f32 %v9662_v38, %v2318_v0  ;;  %v9664_v45 = vpop.eup %9663 }
 0x780   :  { %v2497_v44 = vadd.f32 %v2496_v40, %v2495_v43 }
 0x782   :  { %9665 = vtanh.f32 %v2497_v44 }
 0x78c   :  { %v9666_v46 = vpop.eup %9665 }
 0x78d   :  { %v2499_v47 = vmul.f32 %v9666_v46, %v9664_v45 }
 0x78f   :  { %2501 = vst.msk [vmem:[#allocation3 + $0x30] sm:$0xff] %vm1241_vm4, %v2499_v47  ;;  %8145 = vmatmul.mubr.msk.f32.vlgmr.msra.gmra.mrb[14].mxu0 %vm1241_vm4, %v2499_v47  ;;  %8148 = vmatmul.mubr.msk.f32.vlgmr.msra.gmra.mrb[14].mxu1 %vm1241_vm4, %v2499_v47 }
 0x790   :  { %8720 = vmatpush1.bf16.msra.mxu0 %v10482_v51  ;;  %8732 = vmatpush1.bf16.msra.mxu1 %v10499_v57 }
 0x791   :  { %8722 = vmatprep.subr.bf16.mxu0 %v10491_v54  ;;  %8734 = vmatprep.subr.bf16.mxu1 %v10508_v60 }
 0x792   :  { %2752 = vmatprep.mubr.f32.mxu0 %v10108_v10  ;;  %2823 = vmatprep.mubr.f32.mxu1 %v10108_v10 }
 0x794   :  { %8724 = vmatpush1.bf16.msra.mxu0 %v10529_v2  ;;  %8736 = vmatpush1.bf16.msra.mxu1 %v10541_v6 }
 0x795   :  { %8726 = vmatprep.subr.bf16.mxu0 %v10533_v3  ;;  %8738 = vmatprep.subr.bf16.mxu1 %v10545_v7 }
 0x798   :  { %8728 = vmatpush1.bf16.msra.mxu0 %v10560_v12  ;;  %8740 = vmatpush1.bf16.msra.mxu1 %v10564_v13 }
 0x799   :  { %8152 = vmatprep.subr.msk.mxu0 %vm108_vm0, %v10570_v14  ;;  %8155 = vmatprep.subr.msk.mxu1 %vm108_vm0, %v10581_v16 }
 0x79c   :  { %8153 = vmatpush1.msk.msra.mxu0 %vm108_vm0, %v10590_v17  ;;  %8156 = vmatpush1.msk.msra.mxu1 %vm108_vm0, %v10599_v18 }
 0x79d   :  { %8742 = vmatprep.subr.bf16.mxu0 %v10397_v35  ;;  %8754 = vmatprep.subr.bf16.mxu1 %v10400_v36 }
 0x862   :  { %v2575_v48 = vpop.f32.mrb[14].mxu0  ;;  %v2646_v49 = vpop.f32.mrb[14].mxu1 }
 0x863   :  { %v9300_v50 = vadd.f32 %v2575_v48, %v10655_v26  ;;  %v2577_v52 = vpop.f32.mrb[15].mxu0  ;;  %v2648_v53 = vpop.f32.mrb[15].mxu1  ;;  %v9316_v62 = vadd.f32 %v2646_v49, %v10666_v42 }
 0x864   :  { %v9301_v55 = vadd.f32 %v2577_v52, %v10657_v27  ;;  %v9317_v59 = vadd.f32 %v2648_v53, %v10662_v39 }
 0x865   :  { %v8149_v56 = vmul.f32 -1.442695, %v9300_v50 }
 0x866   :  { %v8150_v58 = vmul.f32 -1.442695, %v9301_v55  ;;  %v8151_v61 = vmul.f32 -1.442695, %v9317_v59  ;;  %v10933_v59 = vld [vmem:[%s11886_s2 + $0xc0] sm:$0x3] }
 0x867   :  { %9667 = vpow2.f32 %v8149_v56  ;;  %v10919_v56 = vld [vmem:[%s11886_s2 + $0xc8] sm:$0x3] }
 0x868   :  { %9669 = vpow2.f32 %v8150_v58  ;;  %v10926_v58 = vld [vmem:[%s11886_s2 + $0xd8] sm:$0x3] }
 0x869   :  { %9671 = vpow2.f32 %v8151_v61  ;;  %v10940_v61 = vld [vmem:[%s11886_s2 + $0xd0] sm:$0x3] }
 0x86a   :  { %9673 = vtanh.f32 %v9316_v62 }
 0x871   :  { %v9668_v63 = vpop.eup %9667 }
 0x872   :  { %v9670_v0 = vpop.eup %9669  ;;  %v2658_v1 = vadd.f32 1.0, %v9668_v63 }
 0x873   :  { %v2664_v4 = vadd.f32 1.0, %v9670_v0  ;;  %v9672_v5 = vpop.eup %9671 }
 0x874   :  { %9675 = vrcp.f32 %v2658_v1  ;;  %v9674_v8 = vpop.eup %9673  ;;  %v2671_v19 = vadd.f32 1.0, %v9672_v5 }
 0x875   :  { %9677 = vrcp.f32 %v2664_v4 }
 0x876   :  { %9679 = vrcp.f32 %v2671_v19 }
 0x87e   :  { %v9676_v9 = vpop.eup %9675 }
 0x87f   :  { %v9678_v11 = vpop.eup %9677  ;;  %v2675_v15 = vmul.f32 %v9676_v9, %v9674_v8 }
 0x880   :  { %v2674_v20 = vmul.f32 %v9678_v11, %v2497_v44  ;;  %v9680_v23 = vpop.eup %9679 }
 0x882   :  { %v2676_v21 = vadd.f32 %v2675_v15, %v2674_v20 }
 0x884   :  { %9681 = vtanh.f32 %v2676_v21 }
 0x88e   :  { %v9682_v24 = vpop.eup %9681 }
 0x88f   :  { %v2678_v25 = vmul.f32 %v9682_v24, %v9680_v23 }
 0x891   :  { %2680 = vst.msk [vmem:[#allocation3 + $0x38] sm:$0xff] %vm1241_vm4, %v2678_v25  ;;  %8154 = vmatmul.mubr.msk.f32.vlgmr.msra.gmra.mrb[16].mxu0 %vm1241_vm4, %v2678_v25  ;;  %8157 = vmatmul.mubr.msk.f32.vlgmr.msra.gmra.mrb[16].mxu1 %vm1241_vm4, %v2678_v25 }
 0x892   :  { %8744 = vmatpush1.bf16.msra.mxu0 %v10482_v51  ;;  %8756 = vmatpush1.bf16.msra.mxu1 %v10499_v57 }
 0x893   :  { %8746 = vmatprep.subr.bf16.mxu0 %v10491_v54  ;;  %8758 = vmatprep.subr.bf16.mxu1 %v10508_v60 }
 0x894   :  { %2931 = vmatprep.mubr.f32.mxu0 %v10108_v10  ;;  %3002 = vmatprep.mubr.f32.mxu1 %v10108_v10 }
 0x896   :  { %8748 = vmatpush1.bf16.msra.mxu0 %v10529_v2  ;;  %8760 = vmatpush1.bf16.msra.mxu1 %v10541_v6 }
 0x897   :  { %8750 = vmatprep.subr.bf16.mxu0 %v10533_v3  ;;  %8762 = vmatprep.subr.bf16.mxu1 %v10545_v7 }
 0x89a   :  { %8752 = vmatpush1.bf16.msra.mxu0 %v10560_v12  ;;  %8764 = vmatpush1.bf16.msra.mxu1 %v10564_v13 }
 0x89b   :  { %8161 = vmatprep.subr.msk.mxu0 %vm108_vm0, %v10570_v14  ;;  %8164 = vmatprep.subr.msk.mxu1 %vm108_vm0, %v10581_v16 }
 0x89e   :  { %8162 = vmatpush1.msk.msra.mxu0 %vm108_vm0, %v10590_v17  ;;  %8165 = vmatpush1.msk.msra.mxu1 %vm108_vm0, %v10599_v18 }
 0x89f   :  { %8766 = vmatprep.subr.bf16.mxu0 %v10397_v35  ;;  %8778 = vmatprep.subr.bf16.mxu1 %v10400_v36 }
 0x964   :  { %v2754_v28 = vpop.f32.mrb[16].mxu0  ;;  %v2825_v29 = vpop.f32.mrb[16].mxu1 }
 0x965   :  { %v9318_v30 = vadd.f32 %v2754_v28, %v10655_v26  ;;  %v2756_v31 = vpop.f32.mrb[17].mxu0  ;;  %v2827_v32 = vpop.f32.mrb[17].mxu1  ;;  %v9334_v18 = vadd.f32 %v2825_v29, %v10666_v42 }
 0x966   :  { %v9319_v14 = vadd.f32 %v2756_v31, %v10657_v27  ;;  %v9335_v17 = vadd.f32 %v2827_v32, %v10662_v39 }
 0x967   :  { %v8158_v33 = vmul.f32 -1.442695, %v9318_v30 }
 0x968   :  { %v8159_v16 = vmul.f32 -1.442695, %v9319_v14  ;;  %v8160_v34 = vmul.f32 -1.442695, %v9335_v17 }
 0x969   :  { %9683 = vpow2.f32 %v8158_v33 }
 0x96a   :  { %9685 = vpow2.f32 %v8159_v16 }
 0x96b   :  { %9687 = vpow2.f32 %v8160_v34 }
 0x96c   :  { %9689 = vtanh.f32 %v9334_v18 }
 0x973   :  { %v9684_v37 = vpop.eup %9683 }
 0x974   :  { %v9686_v38 = vpop.eup %9685  ;;  %v2837_v40 = vadd.f32 1.0, %v9684_v37 }
 0x975   :  { %v2843_v41 = vadd.f32 1.0, %v9686_v38  ;;  %v9688_v43 = vpop.eup %9687 }
 0x976   :  { %9691 = vrcp.f32 %v2837_v40  ;;  %v9690_v44 = vpop.eup %9689  ;;  %v2850_v48 = vadd.f32 1.0, %v9688_v43 }
 0x977   :  { %9693 = vrcp.f32 %v2843_v41 }
 0x978   :  { %9695 = vrcp.f32 %v2850_v48 }
 0x980   :  { %v9692_v45 = vpop.eup %9691 }
 0x981   :  { %v9694_v46 = vpop.eup %9693  ;;  %v2854_v47 = vmul.f32 %v9692_v45, %v9690_v44 }
 0x982   :  { %v2853_v49 = vmul.f32 %v9694_v46, %v2676_v21  ;;  %v9696_v52 = vpop.eup %9695 }
 0x984   :  { %v2855_v50 = vadd.f32 %v2854_v47, %v2853_v49 }
 0x986   :  { %9697 = vtanh.f32 %v2855_v50 }
 0x990   :  { %v9698_v53 = vpop.eup %9697 }
 0x991   :  { %v2857_v55 = vmul.f32 %v9698_v53, %v9696_v52 }
 0x993   :  { %2859 = vst.msk [vmem:[#allocation3 + $0x40] sm:$0xff] %vm1241_vm4, %v2857_v55  ;;  %8163 = vmatmul.mubr.msk.f32.vlgmr.msra.gmra.mrb[18].mxu0 %vm1241_vm4, %v2857_v55  ;;  %8166 = vmatmul.mubr.msk.f32.vlgmr.msra.gmra.mrb[18].mxu1 %vm1241_vm4, %v2857_v55 }
 0x994   :  { %8768 = vmatpush1.bf16.msra.mxu0 %v10482_v51  ;;  %8780 = vmatpush1.bf16.msra.mxu1 %v10499_v57 }
 0x995   :  { %8770 = vmatprep.subr.bf16.mxu0 %v10491_v54  ;;  %8782 = vmatprep.subr.bf16.mxu1 %v10508_v60 }
 0x996   :  { %3110 = vmatprep.mubr.f32.mxu0 %v10108_v10  ;;  %3181 = vmatprep.mubr.f32.mxu1 %v10108_v10 }
 0x998   :  { %8772 = vmatpush1.bf16.msra.mxu0 %v10529_v2  ;;  %8784 = vmatpush1.bf16.msra.mxu1 %v10541_v6 }
 0x999   :  { %8774 = vmatprep.subr.bf16.mxu0 %v10533_v3  ;;  %8786 = vmatprep.subr.bf16.mxu1 %v10545_v7 }
 0x99c   :  { %8776 = vmatpush1.bf16.msra.mxu0 %v10560_v12  ;;  %8788 = vmatpush1.bf16.msra.mxu1 %v10564_v13 }
 0x99d   :  { %8170 = vmatprep.subr.msk.mxu0 %vm108_vm0, %v10919_v56  ;;  %8173 = vmatprep.subr.msk.mxu1 %vm108_vm0, %v10926_v58 }
 0x9a0   :  { %8171 = vmatpush1.msk.msra.mxu0 %vm108_vm0, %v10933_v59  ;;  %8174 = vmatpush1.msk.msra.mxu1 %vm108_vm0, %v10940_v61 }
 0x9a1   :  { %8790 = vmatprep.subr.bf16.mxu0 %v10397_v35  ;;  %8802 = vmatprep.subr.bf16.mxu1 %v10400_v36 }
 0xa66   :  { %v2933_v62 = vpop.f32.mrb[18].mxu0  ;;  %v3004_v63 = vpop.f32.mrb[18].mxu1 }
 0xa67   :  { %v9320_v0 = vadd.f32 %v2933_v62, %v10655_v26  ;;  %v2935_v1 = vpop.f32.mrb[19].mxu0  ;;  %v3006_v4 = vpop.f32.mrb[19].mxu1  ;;  %v9336_v19 = vadd.f32 %v3004_v63, %v10666_v42 }
 0xa68   :  { %v9321_v5 = vadd.f32 %v2935_v1, %v10657_v27  ;;  %v9337_v11 = vadd.f32 %v3006_v4, %v10662_v39 }
 0xa69   :  { %v8167_v8 = vmul.f32 -1.442695, %v9320_v0 }
 0xa6a   :  { %v8168_v9 = vmul.f32 -1.442695, %v9321_v5  ;;  %v8169_v15 = vmul.f32 -1.442695, %v9337_v11 }
 0xa6b   :  { %9699 = vpow2.f32 %v8167_v8 }
 0xa6c   :  { %9701 = vpow2.f32 %v8168_v9 }
 0xa6d   :  { %9703 = vpow2.f32 %v8169_v15 }
 0xa6e   :  { %9705 = vtanh.f32 %v9336_v19 }
 0xa75   :  { %v9700_v20 = vpop.eup %9699 }
 0xa76   :  { %v9702_v21 = vpop.eup %9701  ;;  %v3016_v23 = vadd.f32 1.0, %v9700_v20 }
 0xa77   :  { %v3022_v24 = vadd.f32 1.0, %v9702_v21  ;;  %v9704_v25 = vpop.eup %9703 }
 0xa78   :  { %9707 = vrcp.f32 %v3016_v23  ;;  %v9706_v28 = vpop.eup %9705  ;;  %v3029_v32 = vadd.f32 1.0, %v9704_v25 }
 0xa79   :  { %9709 = vrcp.f32 %v3022_v24 }
 0xa7a   :  { %9711 = vrcp.f32 %v3029_v32 }
 0xa82   :  { %v9708_v29 = vpop.eup %9707 }
 0xa83   :  { %v9710_v30 = vpop.eup %9709  ;;  %v3033_v31 = vmul.f32 %v9708_v29, %v9706_v28 }
 0xa84   :  { %v3032_v14 = vmul.f32 %v9710_v30, %v2855_v50  ;;  %v9712_v16 = vpop.eup %9711 }
 0xa86   :  { %v3034_v33 = vadd.f32 %v3033_v31, %v3032_v14 }
 0xa88   :  { %9713 = vtanh.f32 %v3034_v33 }
 0xa92   :  { %v9714_v17 = vpop.eup %9713 }
 0xa93   :  { %v3036_v34 = vmul.f32 %v9714_v17, %v9712_v16 }
 0xa95   :  { %3038 = vst.msk [vmem:[#allocation3 + $0x48] sm:$0xff] %vm1241_vm4, %v3036_v34  ;;  %8172 = vmatmul.mubr.msk.f32.vlgmr.msra.gmra.mrb[20].mxu0 %vm1241_vm4, %v3036_v34  ;;  %8175 = vmatmul.mubr.msk.f32.vlgmr.msra.gmra.mrb[20].mxu1 %vm1241_vm4, %v3036_v34 }
 0xa96   :  { %8792 = vmatpush1.bf16.msra.mxu0 %v10482_v51  ;;  %8804 = vmatpush1.bf16.msra.mxu1 %v10499_v57 }
 0xa97   :  { %8794 = vmatprep.subr.bf16.mxu0 %v10491_v54  ;;  %8806 = vmatprep.subr.bf16.mxu1 %v10508_v60 }
 0xa98   :  { %3289 = vmatprep.mubr.f32.mxu0 %v10108_v10  ;;  %3360 = vmatprep.mubr.f32.mxu1 %v10108_v10 }
 0xa9a   :  { %8796 = vmatpush1.bf16.msra.mxu0 %v10529_v2  ;;  %8808 = vmatpush1.bf16.msra.mxu1 %v10541_v6 }
 0xa9b   :  { %8798 = vmatprep.subr.bf16.mxu0 %v10533_v3  ;;  %8810 = vmatprep.subr.bf16.mxu1 %v10545_v7 }
 0xa9e   :  { %8800 = vmatpush1.bf16.msra.mxu0 %v10560_v12  ;;  %8812 = vmatpush1.bf16.msra.mxu1 %v10564_v13 }
 0xa9f   :  { %8179 = vmatprep.subr.msk.mxu0 %vm108_vm0, %v10919_v56  ;;  %8182 = vmatprep.subr.msk.mxu1 %vm108_vm0, %v10926_v58 }
 0xaa2   :  { %8180 = vmatpush1.msk.msra.mxu0 %vm108_vm0, %v10933_v59  ;;  %8183 = vmatpush1.msk.msra.mxu1 %vm108_vm0, %v10940_v61 }
 0xaa3   :  { %8814 = vmatprep.subr.bf16.mxu0 %v10397_v35  ;;  %8826 = vmatprep.subr.bf16.mxu1 %v10400_v36 }
 0xb68   :  { %v3112_v18 = vpop.f32.mrb[20].mxu0  ;;  %v3183_v37 = vpop.f32.mrb[20].mxu1 }
 0xb69   :  { %v9322_v38 = vadd.f32 %v3112_v18, %v10655_v26  ;;  %v3114_v40 = vpop.f32.mrb[21].mxu0  ;;  %v3185_v41 = vpop.f32.mrb[21].mxu1  ;;  %v9338_v48 = vadd.f32 %v3183_v37, %v10666_v42 }
 0xb6a   :  { %v9323_v43 = vadd.f32 %v3114_v40, %v10657_v27  ;;  %v9339_v46 = vadd.f32 %v3185_v41, %v10662_v39 }
 0xb6b   :  { %v8176_v44 = vmul.f32 -1.442695, %v9322_v38 }
 0xb6c   :  { %v8177_v45 = vmul.f32 -1.442695, %v9323_v43  ;;  %v8178_v47 = vmul.f32 -1.442695, %v9339_v46 }
 0xb6d   :  { %9715 = vpow2.f32 %v8176_v44 }
 0xb6e   :  { %9717 = vpow2.f32 %v8177_v45 }
 0xb6f   :  { %9719 = vpow2.f32 %v8178_v47 }
 0xb70   :  { %9721 = vtanh.f32 %v9338_v48 }
 0xb77   :  { %v9716_v49 = vpop.eup %9715 }
 0xb78   :  { %v9718_v50 = vpop.eup %9717  ;;  %v3195_v52 = vadd.f32 1.0, %v9716_v49 }
 0xb79   :  { %v3201_v53 = vadd.f32 1.0, %v9718_v50  ;;  %v9720_v55 = vpop.eup %9719 }
 0xb7a   :  { %9723 = vrcp.f32 %v3195_v52  ;;  %v9722_v62 = vpop.eup %9721  ;;  %v3208_v4 = vadd.f32 1.0, %v9720_v55 }
 0xb7b   :  { %9725 = vrcp.f32 %v3201_v53 }
 0xb7c   :  { %9727 = vrcp.f32 %v3208_v4 }
 0xb84   :  { %v9724_v63 = vpop.eup %9723 }
 0xb85   :  { %v9726_v0 = vpop.eup %9725  ;;  %v3212_v1 = vmul.f32 %v9724_v63, %v9722_v62 }
 0xb86   :  { %v3211_v5 = vmul.f32 %v9726_v0, %v3034_v33  ;;  %v9728_v9 = vpop.eup %9727 }
 0xb88   :  { %v3213_v8 = vadd.f32 %v3212_v1, %v3211_v5 }
 0xb8a   :  { %9729 = vtanh.f32 %v3213_v8 }
 0xb94   :  { %v9730_v11 = vpop.eup %9729 }
 0xb95   :  { %v3215_v15 = vmul.f32 %v9730_v11, %v9728_v9 }
 0xb97   :  { %3217 = vst.msk [vmem:[#allocation3 + $0x50] sm:$0xff] %vm1241_vm4, %v3215_v15  ;;  %8181 = vmatmul.mubr.msk.f32.vlgmr.msra.gmra.mrb[22].mxu0 %vm1241_vm4, %v3215_v15  ;;  %8184 = vmatmul.mubr.msk.f32.vlgmr.msra.gmra.mrb[22].mxu1 %vm1241_vm4, %v3215_v15 }
 0xb98   :  { %8816 = vmatpush1.bf16.msra.mxu0 %v10482_v51  ;;  %8828 = vmatpush1.bf16.msra.mxu1 %v10499_v57 }
 0xb99   :  { %8818 = vmatprep.subr.bf16.mxu0 %v10491_v54  ;;  %8830 = vmatprep.subr.bf16.mxu1 %v10508_v60 }
 0xb9a   :  { %3468 = vmatprep.mubr.f32.mxu0 %v10108_v10  ;;  %3539 = vmatprep.mubr.f32.mxu1 %v10108_v10 }
 0xb9c   :  { %8820 = vmatpush1.bf16.msra.mxu0 %v10529_v2  ;;  %8832 = vmatpush1.bf16.msra.mxu1 %v10541_v6 }
 0xb9d   :  { %8822 = vmatprep.subr.bf16.mxu0 %v10533_v3  ;;  %8834 = vmatprep.subr.bf16.mxu1 %v10545_v7 }
 0xba0   :  { %8824 = vmatpush1.bf16.msra.mxu0 %v10560_v12  ;;  %8836 = vmatpush1.bf16.msra.mxu1 %v10564_v13 }
 0xba1   :  { %8188 = vmatprep.subr.msk.mxu0 %vm108_vm0, %v10919_v56  ;;  %8191 = vmatprep.subr.msk.mxu1 %vm108_vm0, %v10926_v58 }
 0xba4   :  { %8189 = vmatpush1.msk.msra.mxu0 %vm108_vm0, %v10933_v59  ;;  %8192 = vmatpush1.msk.msra.mxu1 %vm108_vm0, %v10940_v61 }
 0xba5   :  { %8838 = vmatprep.subr.bf16.mxu0 %v10397_v35  ;;  %8850 = vmatprep.subr.bf16.mxu1 %v10400_v36 }
 0xc6a   :  { %v3291_v19 = vpop.f32.mrb[22].mxu0  ;;  %v3362_v20 = vpop.f32.mrb[22].mxu1 }
 0xc6b   :  { %v9324_v21 = vadd.f32 %v3291_v19, %v10655_v26  ;;  %v3293_v23 = vpop.f32.mrb[23].mxu0  ;;  %v3364_v24 = vpop.f32.mrb[23].mxu1  ;;  %v9340_v32 = vadd.f32 %v3362_v20, %v10666_v42 }
 0xc6c   :  { %v9325_v25 = vadd.f32 %v3293_v23, %v10657_v27  ;;  %v9341_v30 = vadd.f32 %v3364_v24, %v10662_v39 }
 0xc6d   :  { %v8185_v28 = vmul.f32 -1.442695, %v9324_v21 }
 0xc6e   :  { %v8186_v29 = vmul.f32 -1.442695, %v9325_v25  ;;  %v8187_v31 = vmul.f32 -1.442695, %v9341_v30 }
 0xc6f   :  { %9731 = vpow2.f32 %v8185_v28 }
 0xc70   :  { %9733 = vpow2.f32 %v8186_v29 }
 0xc71   :  { %9735 = vpow2.f32 %v8187_v31 }
 0xc72   :  { %9737 = vtanh.f32 %v9340_v32 }
 0xc79   :  { %v9732_v14 = vpop.eup %9731 }
 0xc7a   :  { %v9734_v33 = vpop.eup %9733  ;;  %v3374_v16 = vadd.f32 1.0, %v9732_v14 }
 0xc7b   :  { %v3380_v17 = vadd.f32 1.0, %v9734_v33  ;;  %v9736_v34 = vpop.eup %9735 }
 0xc7c   :  { %9739 = vrcp.f32 %v3374_v16  ;;  %v9738_v18 = vpop.eup %9737  ;;  %v3387_v41 = vadd.f32 1.0, %v9736_v34 }
 0xc7d   :  { %9741 = vrcp.f32 %v3380_v17 }
 0xc7e   :  { %9743 = vrcp.f32 %v3387_v41 }
 0xc86   :  { %v9740_v37 = vpop.eup %9739 }
 0xc87   :  { %v9742_v38 = vpop.eup %9741  ;;  %v3391_v40 = vmul.f32 %v9740_v37, %v9738_v18 }
 0xc88   :  { %v3390_v43 = vmul.f32 %v9742_v38, %v3213_v8  ;;  %v9744_v45 = vpop.eup %9743 }
 0xc8a   :  { %v3392_v44 = vadd.f32 %v3391_v40, %v3390_v43 }
 0xc8c   :  { %9745 = vtanh.f32 %v3392_v44 }
 0xc96   :  { %v9746_v46 = vpop.eup %9745 }
 0xc97   :  { %v3394_v47 = vmul.f32 %v9746_v46, %v9744_v45 }
 0xc99   :  { %3396 = vst.msk [vmem:[#allocation3 + $0x58] sm:$0xff] %vm1241_vm4, %v3394_v47  ;;  %8190 = vmatmul.mubr.msk.f32.vlgmr.msra.gmra.mrb[24].mxu0 %vm1241_vm4, %v3394_v47  ;;  %8193 = vmatmul.mubr.msk.f32.vlgmr.msra.gmra.mrb[24].mxu1 %vm1241_vm4, %v3394_v47 }
 0xc9a   :  { %8840 = vmatpush1.bf16.msra.mxu0 %v10482_v51  ;;  %8852 = vmatpush1.bf16.msra.mxu1 %v10499_v57 }
 0xc9b   :  { %8842 = vmatprep.subr.bf16.mxu0 %v10491_v54  ;;  %8854 = vmatprep.subr.bf16.mxu1 %v10508_v60 }
 0xc9c   :  { %3647 = vmatprep.mubr.f32.mxu0 %v10108_v10  ;;  %3718 = vmatprep.mubr.f32.mxu1 %v10108_v10 }
 0xc9e   :  { %8844 = vmatpush1.bf16.msra.mxu0 %v10529_v2  ;;  %8856 = vmatpush1.bf16.msra.mxu1 %v10541_v6 }
 0xc9f   :  { %8846 = vmatprep.subr.bf16.mxu0 %v10533_v3  ;;  %8858 = vmatprep.subr.bf16.mxu1 %v10545_v7 }
 0xca2   :  { %8848 = vmatpush1.bf16.msra.mxu0 %v10560_v12  ;;  %8860 = vmatpush1.bf16.msra.mxu1 %v10564_v13 }
 0xca3   :  { %8197 = vmatprep.subr.msk.mxu0 %vm108_vm0, %v10919_v56  ;;  %8200 = vmatprep.subr.msk.mxu1 %vm108_vm0, %v10926_v58 }
 0xca6   :  { %8198 = vmatpush1.msk.msra.mxu0 %vm108_vm0, %v10933_v59  ;;  %8201 = vmatpush1.msk.msra.mxu1 %vm108_vm0, %v10940_v61 }
 0xca7   :  { %8862 = vmatprep.subr.bf16.mxu0 %v10397_v35  ;;  %8874 = vmatprep.subr.bf16.mxu1 %v10400_v36 }
 0xd6c   :  { %v3470_v48 = vpop.f32.mrb[24].mxu0  ;;  %v3541_v49 = vpop.f32.mrb[24].mxu1 }
 0xd6d   :  { %v9326_v50 = vadd.f32 %v3470_v48, %v10655_v26  ;;  %v3472_v52 = vpop.f32.mrb[25].mxu0  ;;  %v3543_v53 = vpop.f32.mrb[25].mxu1  ;;  %v9342_v4 = vadd.f32 %v3541_v49, %v10666_v42 }
 0xd6e   :  { %v9327_v55 = vadd.f32 %v3472_v52, %v10657_v27  ;;  %v9343_v0 = vadd.f32 %v3543_v53, %v10662_v39 }
 0xd6f   :  { %v8194_v62 = vmul.f32 -1.442695, %v9326_v50 }
 0xd70   :  { %v8195_v63 = vmul.f32 -1.442695, %v9327_v55  ;;  %v8196_v1 = vmul.f32 -1.442695, %v9343_v0 }
 0xd71   :  { %9747 = vpow2.f32 %v8194_v62 }
 0xd72   :  { %9749 = vpow2.f32 %v8195_v63 }
 0xd73   :  { %9751 = vpow2.f32 %v8196_v1 }
 0xd74   :  { %9753 = vtanh.f32 %v9342_v4 }
 0xd7b   :  { %v9748_v5 = vpop.eup %9747 }
 0xd7c   :  { %v9750_v8 = vpop.eup %9749  ;;  %v3553_v9 = vadd.f32 1.0, %v9748_v5 }
 0xd7d   :  { %v3559_v11 = vadd.f32 1.0, %v9750_v8  ;;  %v9752_v15 = vpop.eup %9751 }
 0xd7e   :  { %9755 = vrcp.f32 %v3553_v9  ;;  %v9754_v19 = vpop.eup %9753  ;;  %v3566_v24 = vadd.f32 1.0, %v9752_v15 }
 0xd7f   :  { %9757 = vrcp.f32 %v3559_v11 }
 0xd80   :  { %9759 = vrcp.f32 %v3566_v24 }
 0xd88   :  { %v9756_v20 = vpop.eup %9755 }
 0xd89   :  { %v9758_v21 = vpop.eup %9757  ;;  %v3570_v23 = vmul.f32 %v9756_v20, %v9754_v19 }
 0xd8a   :  { %v3569_v25 = vmul.f32 %v9758_v21, %v3392_v44  ;;  %v9760_v29 = vpop.eup %9759 }
 0xd8c   :  { %v3571_v28 = vadd.f32 %v3570_v23, %v3569_v25 }
 0xd8e   :  { %9761 = vtanh.f32 %v3571_v28 }
 0xd98   :  { %v9762_v30 = vpop.eup %9761 }
 0xd99   :  { %v3573_v31 = vmul.f32 %v9762_v30, %v9760_v29 }
 0xd9b   :  { %3575 = vst.msk [vmem:[#allocation3 + $0x60] sm:$0xff] %vm1241_vm4, %v3573_v31  ;;  %8199 = vmatmul.mubr.msk.f32.vlgmr.msra.gmra.mrb[26].mxu0 %vm1241_vm4, %v3573_v31  ;;  %8202 = vmatmul.mubr.msk.f32.vlgmr.msra.gmra.mrb[26].mxu1 %vm1241_vm4, %v3573_v31 }
 0xd9c   :  { %8864 = vmatpush1.bf16.msra.mxu0 %v10482_v51  ;;  %8876 = vmatpush1.bf16.msra.mxu1 %v10499_v57 }
 0xd9d   :  { %8866 = vmatprep.subr.bf16.mxu0 %v10491_v54  ;;  %8878 = vmatprep.subr.bf16.mxu1 %v10508_v60 }
 0xd9e   :  { %3826 = vmatprep.mubr.f32.mxu0 %v10108_v10  ;;  %3897 = vmatprep.mubr.f32.mxu1 %v10108_v10 }
 0xda0   :  { %8868 = vmatpush1.bf16.msra.mxu0 %v10529_v2  ;;  %8880 = vmatpush1.bf16.msra.mxu1 %v10541_v6 }
 0xda1   :  { %8870 = vmatprep.subr.bf16.mxu0 %v10533_v3  ;;  %8882 = vmatprep.subr.bf16.mxu1 %v10545_v7 }
 0xda4   :  { %8872 = vmatpush1.bf16.msra.mxu0 %v10560_v12  ;;  %8884 = vmatpush1.bf16.msra.mxu1 %v10564_v13 }
 0xda5   :  { %8206 = vmatprep.subr.msk.mxu0 %vm108_vm0, %v10919_v56  ;;  %8209 = vmatprep.subr.msk.mxu1 %vm108_vm0, %v10926_v58 }
 0xda8   :  { %8207 = vmatpush1.msk.msra.mxu0 %vm108_vm0, %v10933_v59  ;;  %8210 = vmatpush1.msk.msra.mxu1 %vm108_vm0, %v10940_v61 }
 0xda9   :  { %8886 = vmatprep.subr.bf16.mxu0 %v10397_v35  ;;  %8898 = vmatprep.subr.bf16.mxu1 %v10400_v36 }
 0xe6e   :  { %v3649_v32 = vpop.f32.mrb[26].mxu0  ;;  %v3720_v14 = vpop.f32.mrb[26].mxu1 }
 0xe6f   :  { %v9328_v33 = vadd.f32 %v3649_v32, %v10655_v26  ;;  %v3651_v16 = vpop.f32.mrb[27].mxu0  ;;  %v3722_v17 = vpop.f32.mrb[27].mxu1  ;;  %v9344_v41 = vadd.f32 %v3720_v14, %v10666_v42 }
 0xe70   :  { %v9329_v34 = vadd.f32 %v3651_v16, %v10657_v27  ;;  %v9345_v38 = vadd.f32 %v3722_v17, %v10662_v39 }
 0xe71   :  { %v8203_v18 = vmul.f32 -1.442695, %v9328_v33 }
 0xe72   :  { %v8204_v37 = vmul.f32 -1.442695, %v9329_v34  ;;  %v8205_v40 = vmul.f32 -1.442695, %v9345_v38 }
 0xe73   :  { %9763 = vpow2.f32 %v8203_v18 }
 0xe74   :  { %9765 = vpow2.f32 %v8204_v37 }
 0xe75   :  { %9767 = vpow2.f32 %v8205_v40 }
 0xe76   :  { %9769 = vtanh.f32 %v9344_v41 }
 0xe7d   :  { %v9764_v43 = vpop.eup %9763 }
 0xe7e   :  { %v9766_v44 = vpop.eup %9765  ;;  %v3732_v45 = vadd.f32 1.0, %v9764_v43 }
 0xe7f   :  { %v3738_v46 = vadd.f32 1.0, %v9766_v44  ;;  %v9768_v47 = vpop.eup %9767 }
 0xe80   :  { %9771 = vrcp.f32 %v3732_v45  ;;  %v9770_v48 = vpop.eup %9769  ;;  %v3745_v53 = vadd.f32 1.0, %v9768_v47 }
 0xe81   :  { %9773 = vrcp.f32 %v3738_v46 }
 0xe82   :  { %9775 = vrcp.f32 %v3745_v53 }
 0xe8a   :  { %v9772_v49 = vpop.eup %9771 }
 0xe8b   :  { %v9774_v50 = vpop.eup %9773  ;;  %v3749_v52 = vmul.f32 %v9772_v49, %v9770_v48 }
 0xe8c   :  { %v3748_v55 = vmul.f32 %v9774_v50, %v3571_v28  ;;  %v9776_v63 = vpop.eup %9775 }
 0xe8e   :  { %v3750_v62 = vadd.f32 %v3749_v52, %v3748_v55 }
 0xe90   :  { %9777 = vtanh.f32 %v3750_v62 }
 0xe9a   :  { %v9778_v0 = vpop.eup %9777 }
 0xe9b   :  { %v3752_v1 = vmul.f32 %v9778_v0, %v9776_v63 }
 0xe9d   :  { %3754 = vst.msk [vmem:[#allocation3 + $0x68] sm:$0xff] %vm1241_vm4, %v3752_v1  ;;  %8208 = vmatmul.mubr.msk.f32.vlgmr.msra.gmra.mrb[28].mxu0 %vm1241_vm4, %v3752_v1  ;;  %8211 = vmatmul.mubr.msk.f32.vlgmr.msra.gmra.mrb[28].mxu1 %vm1241_vm4, %v3752_v1 }
 0xe9e   :  { %8888 = vmatpush1.bf16.msra.mxu0 %v10482_v51  ;;  %8900 = vmatpush1.bf16.msra.mxu1 %v10499_v57 }
 0xe9f   :  { %8890 = vmatprep.subr.bf16.mxu0 %v10491_v54  ;;  %8902 = vmatprep.subr.bf16.mxu1 %v10508_v60 }
 0xea0   :  { %4005 = vmatprep.mubr.f32.mxu0 %v10108_v10  ;;  %4076 = vmatprep.mubr.f32.mxu1 %v10108_v10 }
 0xea2   :  { %8892 = vmatpush1.bf16.msra.mxu0 %v10529_v2  ;;  %8904 = vmatpush1.bf16.msra.mxu1 %v10541_v6 }
 0xea3   :  { %8894 = vmatprep.subr.bf16.mxu0 %v10533_v3  ;;  %8906 = vmatprep.subr.bf16.mxu1 %v10545_v7 }
 0xea6   :  { %8896 = vmatpush1.bf16.msra.mxu0 %v10560_v12  ;;  %8908 = vmatpush1.bf16.msra.mxu1 %v10564_v13 }
 0xea7   :  { %8215 = vmatprep.subr.msk.mxu0 %vm108_vm0, %v10919_v56  ;;  %8218 = vmatprep.subr.msk.mxu1 %vm108_vm0, %v10926_v58 }
 0xeaa   :  { %8216 = vmatpush1.msk.msra.mxu0 %vm108_vm0, %v10933_v59  ;;  %8219 = vmatpush1.msk.msra.mxu1 %vm108_vm0, %v10940_v61 }
 0xeab   :  { %8910 = vmatprep.subr.bf16.mxu0 %v10397_v35  ;;  %8922 = vmatprep.subr.bf16.mxu1 %v10400_v36 }
 0xf70   :  { %v3828_v4 = vpop.f32.mrb[28].mxu0  ;;  %v3899_v5 = vpop.f32.mrb[28].mxu1 }
 0xf71   :  { %v9330_v8 = vadd.f32 %v3828_v4, %v10655_v26  ;;  %v3830_v9 = vpop.f32.mrb[29].mxu0  ;;  %v3901_v11 = vpop.f32.mrb[29].mxu1  ;;  %v9346_v24 = vadd.f32 %v3899_v5, %v10666_v42 }
 0xf72   :  { %v9331_v15 = vadd.f32 %v3830_v9, %v10657_v27  ;;  %v9347_v21 = vadd.f32 %v3901_v11, %v10662_v39 }
 0xf73   :  { %v8212_v19 = vmul.f32 -1.442695, %v9330_v8 }
 0xf74   :  { %v8213_v20 = vmul.f32 -1.442695, %v9331_v15  ;;  %v8214_v23 = vmul.f32 -1.442695, %v9347_v21 }
 0xf75   :  { %9779 = vpow2.f32 %v8212_v19 }
 0xf76   :  { %9781 = vpow2.f32 %v8213_v20 }
 0xf77   :  { %9783 = vpow2.f32 %v8214_v23 }
 0xf78   :  { %9785 = vtanh.f32 %v9346_v24 }
 0xf7f   :  { %v9780_v25 = vpop.eup %9779 }
 0xf80   :  { %v9782_v28 = vpop.eup %9781  ;;  %v3911_v29 = vadd.f32 1.0, %v9780_v25 }
 0xf81   :  { %v3917_v30 = vadd.f32 1.0, %v9782_v28  ;;  %v9784_v31 = vpop.eup %9783 }
 0xf82   :  { %9787 = vrcp.f32 %v3911_v29  ;;  %v9786_v32 = vpop.eup %9785  ;;  %v3924_v17 = vadd.f32 1.0, %v9784_v31 }
 0xf83   :  { %9789 = vrcp.f32 %v3917_v30 }
 0xf84   :  { %9791 = vrcp.f32 %v3924_v17 }
 0xf8c   :  { %v9788_v14 = vpop.eup %9787 }
 0xf8d   :  { %v9790_v33 = vpop.eup %9789  ;;  %v3928_v16 = vmul.f32 %v9788_v14, %v9786_v32 }
 0xf8e   :  { %v3927_v34 = vmul.f32 %v9790_v33, %v3750_v62  ;;  %v9792_v37 = vpop.eup %9791 }
 0xf90   :  { %v3929_v18 = vadd.f32 %v3928_v16, %v3927_v34 }
 0xf92   :  { %9793 = vtanh.f32 %v3929_v18 }
 0xf9c   :  { %v9794_v38 = vpop.eup %9793 }
 0xf9d   :  { %v3931_v40 = vmul.f32 %v9794_v38, %v9792_v37 }
 0xf9f   :  { %3933 = vst.msk [vmem:[#allocation3 + $0x70] sm:$0xff] %vm1241_vm4, %v3931_v40  ;;  %8217 = vmatmul.mubr.msk.f32.vlgmr.msra.gmra.mrb[30].mxu0 %vm1241_vm4, %v3931_v40  ;;  %8220 = vmatmul.mubr.msk.f32.vlgmr.msra.gmra.mrb[30].mxu1 %vm1241_vm4, %v3931_v40 }
 0xfa0   :  { %8912 = vmatpush1.bf16.msra.mxu0 %v10482_v51  ;;  %8924 = vmatpush1.bf16.msra.mxu1 %v10499_v57 }
 0xfa1   :  { %8914 = vmatprep.subr.bf16.mxu0 %v10491_v54  ;;  %8926 = vmatprep.subr.bf16.mxu1 %v10508_v60 }
 0xfa2   :  { %4184 = vmatprep.mubr.f32.mxu0 %v10108_v10  ;;  %4255 = vmatprep.mubr.f32.mxu1 %v10108_v10 }
 0xfa4   :  { %8916 = vmatpush1.bf16.msra.mxu0 %v10529_v2  ;;  %8928 = vmatpush1.bf16.msra.mxu1 %v10541_v6 }
 0xfa5   :  { %8918 = vmatprep.subr.bf16.mxu0 %v10533_v3  ;;  %8930 = vmatprep.subr.bf16.mxu1 %v10545_v7 }
 0xfa8   :  { %8920 = vmatpush1.bf16.msra.mxu0 %v10560_v12  ;;  %8932 = vmatpush1.bf16.msra.mxu1 %v10564_v13 }
 0xfa9   :  { %8224 = vmatprep.subr.msk.mxu0 %vm108_vm0, %v10919_v56  ;;  %8227 = vmatprep.subr.msk.mxu1 %vm108_vm0, %v10926_v58 }
 0xfac   :  { %8225 = vmatpush1.msk.msra.mxu0 %vm108_vm0, %v10933_v59  ;;  %8228 = vmatpush1.msk.msra.mxu1 %vm108_vm0, %v10940_v61 }
 0xfad   :  { %8934 = vmatprep.subr.bf16.mxu0 %v10397_v35  ;;  %8946 = vmatprep.subr.bf16.mxu1 %v10400_v36 }
0x1072   :  { %v4007_v41 = vpop.f32.mrb[30].mxu0  ;;  %v4078_v43 = vpop.f32.mrb[30].mxu1 }
0x1073   :  { %v9332_v44 = vadd.f32 %v4007_v41, %v10655_v26  ;;  %v4009_v45 = vpop.f32.mrb[31].mxu0  ;;  %v4080_v46 = vpop.f32.mrb[31].mxu1  ;;  %v9348_v53 = vadd.f32 %v4078_v43, %v10666_v42 }
0x1074   :  { %v9333_v47 = vadd.f32 %v4009_v45, %v10657_v27  ;;  %v9349_v50 = vadd.f32 %v4080_v46, %v10662_v39 }
0x1075   :  { %v8221_v48 = vmul.f32 -1.442695, %v9332_v44 }
0x1076   :  { %v8222_v49 = vmul.f32 -1.442695, %v9333_v47  ;;  %v8223_v52 = vmul.f32 -1.442695, %v9349_v50 }
0x1077   :  { %9795 = vpow2.f32 %v8221_v48 }
0x1078   :  { %9797 = vpow2.f32 %v8222_v49 }
0x1079   :  { %9799 = vpow2.f32 %v8223_v52 }
0x107a   :  { %9801 = vtanh.f32 %v9348_v53 }
0x1081   :  { %v9796_v55 = vpop.eup %9795 }
0x1082   :  { %v9798_v62 = vpop.eup %9797  ;;  %v4090_v63 = vadd.f32 1.0, %v9796_v55 }
0x1083   :  { %v4096_v0 = vadd.f32 1.0, %v9798_v62  ;;  %v9800_v1 = vpop.eup %9799 }
0x1084   :  { %9803 = vrcp.f32 %v4090_v63  ;;  %v9802_v4 = vpop.eup %9801  ;;  %v4103_v11 = vadd.f32 1.0, %v9800_v1 }
0x1085   :  { %9805 = vrcp.f32 %v4096_v0 }
0x1086   :  { %9807 = vrcp.f32 %v4103_v11 }
0x108e   :  { %v9804_v5 = vpop.eup %9803 }
0x108f   :  { %v9806_v8 = vpop.eup %9805  ;;  %v4107_v9 = vmul.f32 %v9804_v5, %v9802_v4 }
0x1090   :  { %v4106_v15 = vmul.f32 %v9806_v8, %v3929_v18  ;;  %v9808_v20 = vpop.eup %9807 }
0x1092   :  { %v4108_v19 = vadd.f32 %v4107_v9, %v4106_v15 }
0x1094   :  { %9809 = vtanh.f32 %v4108_v19 }
0x109e   :  { %v9810_v21 = vpop.eup %9809 }
0x109f   :  { %v4110_v23 = vmul.f32 %v9810_v21, %v9808_v20 }
0x10a1   :  { %4112 = vst.msk [vmem:[#allocation3 + $0x78] sm:$0xff] %vm1241_vm4, %v4110_v23  ;;  %8226 = vmatmul.mubr.msk.f32.vlgmr.msra.gmra.mrb[32].mxu0 %vm1241_vm4, %v4110_v23  ;;  %8229 = vmatmul.mubr.msk.f32.vlgmr.msra.gmra.mrb[32].mxu1 %vm1241_vm4, %v4110_v23 }
0x10a2   :  { %8936 = vmatpush1.bf16.msra.mxu0 %v10482_v51  ;;  %8948 = vmatpush1.bf16.msra.mxu1 %v10499_v57 }
0x10a3   :  { %8938 = vmatprep.subr.bf16.mxu0 %v10491_v54  ;;  %8950 = vmatprep.subr.bf16.mxu1 %v10508_v60 }
0x10a4   :  { %4363 = vmatprep.mubr.f32.mxu0 %v10108_v10  ;;  %4434 = vmatprep.mubr.f32.mxu1 %v10108_v10 }
0x10a6   :  { %8940 = vmatpush1.bf16.msra.mxu0 %v10529_v2  ;;  %8952 = vmatpush1.bf16.msra.mxu1 %v10541_v6 }
0x10a7   :  { %8942 = vmatprep.subr.bf16.mxu0 %v10533_v3  ;;  %8954 = vmatprep.subr.bf16.mxu1 %v10545_v7 }
0x10aa   :  { %8944 = vmatpush1.bf16.msra.mxu0 %v10560_v12  ;;  %8956 = vmatpush1.bf16.msra.mxu1 %v10564_v13 }
0x10ab   :  { %8233 = vmatprep.subr.msk.mxu0 %vm108_vm0, %v10919_v56  ;;  %8236 = vmatprep.subr.msk.mxu1 %vm108_vm0, %v10926_v58 }
0x10ae   :  { %8234 = vmatpush1.msk.msra.mxu0 %vm108_vm0, %v10933_v59  ;;  %8237 = vmatpush1.msk.msra.mxu1 %vm108_vm0, %v10940_v61 }
0x10af   :  { %8958 = vmatprep.subr.bf16.mxu0 %v10397_v35  ;;  %8970 = vmatprep.subr.bf16.mxu1 %v10400_v36 }
0x1174   :  { %v4186_v24 = vpop.f32.mrb[32].mxu0  ;;  %v4257_v25 = vpop.f32.mrb[32].mxu1 }
0x1175   :  { %v9350_v28 = vadd.f32 %v4186_v24, %v10655_v26  ;;  %v4188_v29 = vpop.f32.mrb[33].mxu0  ;;  %v4259_v30 = vpop.f32.mrb[33].mxu1  ;;  %v9366_v17 = vadd.f32 %v4257_v25, %v10666_v42 }
0x1176   :  { %v9351_v31 = vadd.f32 %v4188_v29, %v10657_v27  ;;  %v9367_v33 = vadd.f32 %v4259_v30, %v10662_v39 }
0x1177   :  { %v8230_v32 = vmul.f32 -1.442695, %v9350_v28 }
0x1178   :  { %v8231_v14 = vmul.f32 -1.442695, %v9351_v31  ;;  %v8232_v16 = vmul.f32 -1.442695, %v9367_v33 }
0x1179   :  { %9811 = vpow2.f32 %v8230_v32 }
0x117a   :  { %9813 = vpow2.f32 %v8231_v14 }
0x117b   :  { %9815 = vpow2.f32 %v8232_v16 }
0x117c   :  { %9817 = vtanh.f32 %v9366_v17 }
0x1183   :  { %v9812_v34 = vpop.eup %9811 }
0x1184   :  { %v9814_v18 = vpop.eup %9813  ;;  %v4269_v37 = vadd.f32 1.0, %v9812_v34 }
0x1185   :  { %v4275_v38 = vadd.f32 1.0, %v9814_v18  ;;  %v9816_v40 = vpop.eup %9815 }
0x1186   :  { %9819 = vrcp.f32 %v4269_v37  ;;  %v9818_v41 = vpop.eup %9817  ;;  %v4282_v46 = vadd.f32 1.0, %v9816_v40 }
0x1187   :  { %9821 = vrcp.f32 %v4275_v38 }
0x1188   :  { %9823 = vrcp.f32 %v4282_v46 }
0x1190   :  { %v9820_v43 = vpop.eup %9819 }
0x1191   :  { %v9822_v44 = vpop.eup %9821  ;;  %v4286_v45 = vmul.f32 %v9820_v43, %v9818_v41 }
0x1192   :  { %v4285_v47 = vmul.f32 %v9822_v44, %v4108_v19  ;;  %v9824_v49 = vpop.eup %9823 }
0x1194   :  { %v4287_v48 = vadd.f32 %v4286_v45, %v4285_v47 }
0x1196   :  { %9825 = vtanh.f32 %v4287_v48 }
0x11a0   :  { %v9826_v50 = vpop.eup %9825 }
0x11a1   :  { %v4289_v52 = vmul.f32 %v9826_v50, %v9824_v49 }
0x11a3   :  { %4291 = vst.msk [vmem:[#allocation3 + $0x80] sm:$0xff] %vm1241_vm4, %v4289_v52  ;;  %8235 = vmatmul.mubr.msk.f32.vlgmr.msra.gmra.mrb[34].mxu0 %vm1241_vm4, %v4289_v52  ;;  %8238 = vmatmul.mubr.msk.f32.vlgmr.msra.gmra.mrb[34].mxu1 %vm1241_vm4, %v4289_v52 }
0x11a4   :  { %8960 = vmatpush1.bf16.msra.mxu0 %v10482_v51  ;;  %8972 = vmatpush1.bf16.msra.mxu1 %v10499_v57 }
0x11a5   :  { %8962 = vmatprep.subr.bf16.mxu0 %v10491_v54  ;;  %8974 = vmatprep.subr.bf16.mxu1 %v10508_v60 }
0x11a6   :  { %4542 = vmatprep.mubr.f32.mxu0 %v10108_v10  ;;  %4613 = vmatprep.mubr.f32.mxu1 %v10108_v10 }
0x11a8   :  { %8964 = vmatpush1.bf16.msra.mxu0 %v10529_v2  ;;  %8976 = vmatpush1.bf16.msra.mxu1 %v10541_v6 }
0x11a9   :  { %8966 = vmatprep.subr.bf16.mxu0 %v10533_v3  ;;  %8978 = vmatprep.subr.bf16.mxu1 %v10545_v7 }
0x11ac   :  { %8968 = vmatpush1.bf16.msra.mxu0 %v10560_v12  ;;  %8980 = vmatpush1.bf16.msra.mxu1 %v10564_v13 }
0x11ad   :  { %8242 = vmatprep.subr.msk.mxu0 %vm108_vm0, %v10919_v56  ;;  %8245 = vmatprep.subr.msk.mxu1 %vm108_vm0, %v10926_v58 }
0x11b0   :  { %8243 = vmatpush1.msk.msra.mxu0 %vm108_vm0, %v10933_v59  ;;  %8246 = vmatpush1.msk.msra.mxu1 %vm108_vm0, %v10940_v61 }
0x11b1   :  { %8982 = vmatprep.subr.bf16.mxu0 %v10397_v35  ;;  %8994 = vmatprep.subr.bf16.mxu1 %v10400_v36 }
0x1276   :  { %v4365_v53 = vpop.f32.mrb[34].mxu0  ;;  %v4436_v55 = vpop.f32.mrb[34].mxu1 }
0x1277   :  { %v9352_v62 = vadd.f32 %v4365_v53, %v10655_v26  ;;  %v4367_v63 = vpop.f32.mrb[35].mxu0  ;;  %v4438_v0 = vpop.f32.mrb[35].mxu1  ;;  %v9368_v11 = vadd.f32 %v4436_v55, %v10666_v42 }
0x1278   :  { %v9353_v1 = vadd.f32 %v4367_v63, %v10657_v27  ;;  %v9369_v8 = vadd.f32 %v4438_v0, %v10662_v39 }
0x1279   :  { %v8239_v4 = vmul.f32 -1.442695, %v9352_v62 }
0x127a   :  { %v8240_v5 = vmul.f32 -1.442695, %v9353_v1  ;;  %v8241_v9 = vmul.f32 -1.442695, %v9369_v8  ;;  %v11243_v8 = vld [vmem:[%s11886_s2 + $0xc0] sm:$0x3] }
0x127b   :  { %9827 = vpow2.f32 %v8239_v4  ;;  %v11229_v4 = vld [vmem:[%s11886_s2 + $0xc8] sm:$0x3] }
0x127c   :  { %9829 = vpow2.f32 %v8240_v5  ;;  %v11236_v5 = vld [vmem:[%s11886_s2 + $0xd8] sm:$0x3] }
0x127d   :  { %9831 = vpow2.f32 %v8241_v9  ;;  %v11250_v9 = vld [vmem:[%s11886_s2 + $0xd0] sm:$0x3] }
0x127e   :  { %9833 = vtanh.f32 %v9368_v11 }
0x1285   :  { %v9828_v15 = vpop.eup %9827 }
0x1286   :  { %v9830_v19 = vpop.eup %9829  ;;  %v4448_v20 = vadd.f32 1.0, %v9828_v15 }
0x1287   :  { %v4454_v21 = vadd.f32 1.0, %v9830_v19  ;;  %v9832_v23 = vpop.eup %9831 }
0x1288   :  { %9835 = vrcp.f32 %v4448_v20  ;;  %v9834_v24 = vpop.eup %9833  ;;  %v4461_v30 = vadd.f32 1.0, %v9832_v23 }
0x1289   :  { %9837 = vrcp.f32 %v4454_v21 }
0x128a   :  { %9839 = vrcp.f32 %v4461_v30 }
0x1292   :  { %v9836_v25 = vpop.eup %9835 }
0x1293   :  { %v9838_v28 = vpop.eup %9837  ;;  %v4465_v29 = vmul.f32 %v9836_v25, %v9834_v24 }
0x1294   :  { %v4464_v31 = vmul.f32 %v9838_v28, %v4287_v48  ;;  %v9840_v14 = vpop.eup %9839 }
0x1296   :  { %v4466_v32 = vadd.f32 %v4465_v29, %v4464_v31 }
0x1298   :  { %9841 = vtanh.f32 %v4466_v32 }
0x12a2   :  { %v9842_v33 = vpop.eup %9841 }
0x12a3   :  { %v4468_v16 = vmul.f32 %v9842_v33, %v9840_v14 }
0x12a5   :  { %4470 = vst.msk [vmem:[#allocation3 + $0x88] sm:$0xff] %vm1241_vm4, %v4468_v16  ;;  %8244 = vmatmul.mubr.msk.f32.vlgmr.msra.gmra.mrb[36].mxu0 %vm1241_vm4, %v4468_v16  ;;  %8247 = vmatmul.mubr.msk.f32.vlgmr.msra.gmra.mrb[36].mxu1 %vm1241_vm4, %v4468_v16 }
0x12a6   :  { %8984 = vmatpush1.bf16.msra.mxu0 %v10482_v51  ;;  %8996 = vmatpush1.bf16.msra.mxu1 %v10499_v57 }
0x12a7   :  { %8986 = vmatprep.subr.bf16.mxu0 %v10491_v54  ;;  %8998 = vmatprep.subr.bf16.mxu1 %v10508_v60 }
0x12a8   :  { %4721 = vmatprep.mubr.f32.mxu0 %v10108_v10  ;;  %4792 = vmatprep.mubr.f32.mxu1 %v10108_v10 }
0x12aa   :  { %8988 = vmatpush1.bf16.msra.mxu0 %v10529_v2  ;;  %9000 = vmatpush1.bf16.msra.mxu1 %v10541_v6 }
0x12ab   :  { %8990 = vmatprep.subr.bf16.mxu0 %v10533_v3  ;;  %9002 = vmatprep.subr.bf16.mxu1 %v10545_v7 }
0x12ae   :  { %8992 = vmatpush1.bf16.msra.mxu0 %v10560_v12  ;;  %9004 = vmatpush1.bf16.msra.mxu1 %v10564_v13 }
0x12af   :  { %8251 = vmatprep.subr.msk.mxu0 %vm108_vm0, %v10919_v56  ;;  %8254 = vmatprep.subr.msk.mxu1 %vm108_vm0, %v10926_v58 }
0x12b2   :  { %8252 = vmatpush1.msk.msra.mxu0 %vm108_vm0, %v10933_v59  ;;  %8255 = vmatpush1.msk.msra.mxu1 %vm108_vm0, %v10940_v61 }
0x12b3   :  { %9006 = vmatprep.subr.bf16.mxu0 %v10397_v35  ;;  %9018 = vmatprep.subr.bf16.mxu1 %v10400_v36 }
0x1378   :  { %v4544_v17 = vpop.f32.mrb[36].mxu0  ;;  %v4615_v34 = vpop.f32.mrb[36].mxu1 }
0x1379   :  { %v9354_v18 = vadd.f32 %v4544_v17, %v10655_v26  ;;  %v4546_v37 = vpop.f32.mrb[37].mxu0  ;;  %v4617_v38 = vpop.f32.mrb[37].mxu1  ;;  %v9370_v61 = vadd.f32 %v4615_v34, %v10666_v42 }
0x137a   :  { %v9355_v56 = vadd.f32 %v4546_v37, %v10657_v27  ;;  %v9371_v59 = vadd.f32 %v4617_v38, %v10662_v39 }
0x137b   :  { %v8248_v40 = vmul.f32 -1.442695, %v9354_v18 }
0x137c   :  { %v8249_v58 = vmul.f32 -1.442695, %v9355_v56  ;;  %v8250_v41 = vmul.f32 -1.442695, %v9371_v59 }
0x137d   :  { %9843 = vpow2.f32 %v8248_v40 }
0x137e   :  { %9845 = vpow2.f32 %v8249_v58 }
0x137f   :  { %9847 = vpow2.f32 %v8250_v41 }
0x1380   :  { %9849 = vtanh.f32 %v9370_v61 }
0x1387   :  { %v9844_v43 = vpop.eup %9843 }
0x1388   :  { %v9846_v44 = vpop.eup %9845  ;;  %v4627_v45 = vadd.f32 1.0, %v9844_v43 }
0x1389   :  { %v4633_v46 = vadd.f32 1.0, %v9846_v44  ;;  %v9848_v47 = vpop.eup %9847 }
0x138a   :  { %9851 = vrcp.f32 %v4627_v45  ;;  %v9850_v48 = vpop.eup %9849  ;;  %v4640_v53 = vadd.f32 1.0, %v9848_v47 }
0x138b   :  { %9853 = vrcp.f32 %v4633_v46 }
0x138c   :  { %9855 = vrcp.f32 %v4640_v53 }
0x1394   :  { %v9852_v49 = vpop.eup %9851 }
0x1395   :  { %v9854_v50 = vpop.eup %9853  ;;  %v4644_v52 = vmul.f32 %v9852_v49, %v9850_v48 }
0x1396   :  { %v4643_v55 = vmul.f32 %v9854_v50, %v4466_v32  ;;  %v9856_v63 = vpop.eup %9855 }
0x1398   :  { %v4645_v62 = vadd.f32 %v4644_v52, %v4643_v55 }
0x139a   :  { %9857 = vtanh.f32 %v4645_v62 }
0x13a4   :  { %v9858_v0 = vpop.eup %9857 }
0x13a5   :  { %v4647_v1 = vmul.f32 %v9858_v0, %v9856_v63 }
0x13a7   :  { %4649 = vst.msk [vmem:[#allocation3 + $0x90] sm:$0xff] %vm1241_vm4, %v4647_v1  ;;  %8253 = vmatmul.mubr.msk.f32.vlgmr.msra.gmra.mrb[38].mxu0 %vm1241_vm4, %v4647_v1  ;;  %8256 = vmatmul.mubr.msk.f32.vlgmr.msra.gmra.mrb[38].mxu1 %vm1241_vm4, %v4647_v1 }
0x13a8   :  { %9008 = vmatpush1.bf16.msra.mxu0 %v10482_v51  ;;  %9020 = vmatpush1.bf16.msra.mxu1 %v10499_v57 }
0x13a9   :  { %9010 = vmatprep.subr.bf16.mxu0 %v10491_v54  ;;  %9022 = vmatprep.subr.bf16.mxu1 %v10508_v60 }
0x13aa   :  { %4900 = vmatprep.mubr.f32.mxu0 %v10108_v10  ;;  %4971 = vmatprep.mubr.f32.mxu1 %v10108_v10 }
0x13ac   :  { %9012 = vmatpush1.bf16.msra.mxu0 %v10529_v2  ;;  %9024 = vmatpush1.bf16.msra.mxu1 %v10541_v6 }
0x13ad   :  { %9014 = vmatprep.subr.bf16.mxu0 %v10533_v3  ;;  %9026 = vmatprep.subr.bf16.mxu1 %v10545_v7 }
0x13b0   :  { %9016 = vmatpush1.bf16.msra.mxu0 %v10560_v12  ;;  %9028 = vmatpush1.bf16.msra.mxu1 %v10564_v13 }
0x13b1   :  { %8260 = vmatprep.subr.msk.mxu0 %vm108_vm0, %v11229_v4  ;;  %8263 = vmatprep.subr.msk.mxu1 %vm108_vm0, %v11236_v5 }
0x13b4   :  { %8261 = vmatpush1.msk.msra.mxu0 %vm108_vm0, %v11243_v8  ;;  %8264 = vmatpush1.msk.msra.mxu1 %vm108_vm0, %v11250_v9 }
0x13b5   :  { %9030 = vmatprep.subr.bf16.mxu0 %v10397_v35  ;;  %9042 = vmatprep.subr.bf16.mxu1 %v10400_v36 }
0x147a   :  { %v4723_v11 = vpop.f32.mrb[38].mxu0  ;;  %v4794_v15 = vpop.f32.mrb[38].mxu1 }
0x147b   :  { %v9356_v19 = vadd.f32 %v4723_v11, %v10655_v26  ;;  %v4725_v20 = vpop.f32.mrb[39].mxu0  ;;  %v4796_v21 = vpop.f32.mrb[39].mxu1  ;;  %v9372_v30 = vadd.f32 %v4794_v15, %v10666_v42 }
0x147c   :  { %v9357_v23 = vadd.f32 %v4725_v20, %v10657_v27  ;;  %v9373_v28 = vadd.f32 %v4796_v21, %v10662_v39 }
0x147d   :  { %v8257_v24 = vmul.f32 -1.442695, %v9356_v19 }
0x147e   :  { %v8258_v25 = vmul.f32 -1.442695, %v9357_v23  ;;  %v8259_v29 = vmul.f32 -1.442695, %v9373_v28 }
0x147f   :  { %9859 = vpow2.f32 %v8257_v24 }
0x1480   :  { %9861 = vpow2.f32 %v8258_v25 }
0x1481   :  { %9863 = vpow2.f32 %v8259_v29 }
0x1482   :  { %9865 = vtanh.f32 %v9372_v30 }
0x1489   :  { %v9860_v31 = vpop.eup %9859 }
0x148a   :  { %v9862_v32 = vpop.eup %9861  ;;  %v4806_v14 = vadd.f32 1.0, %v9860_v31 }
0x148b   :  { %v4812_v33 = vadd.f32 1.0, %v9862_v32  ;;  %v9864_v16 = vpop.eup %9863 }
0x148c   :  { %9867 = vrcp.f32 %v4806_v14  ;;  %v9866_v17 = vpop.eup %9865  ;;  %v4819_v38 = vadd.f32 1.0, %v9864_v16 }
0x148d   :  { %9869 = vrcp.f32 %v4812_v33 }
0x148e   :  { %9871 = vrcp.f32 %v4819_v38 }
0x1496   :  { %v9868_v34 = vpop.eup %9867 }
0x1497   :  { %v9870_v18 = vpop.eup %9869  ;;  %v4823_v37 = vmul.f32 %v9868_v34, %v9866_v17 }
0x1498   :  { %v4822_v56 = vmul.f32 %v9870_v18, %v4645_v62  ;;  %v9872_v58 = vpop.eup %9871 }
0x149a   :  { %v4824_v40 = vadd.f32 %v4823_v37, %v4822_v56 }
0x149c   :  { %9873 = vtanh.f32 %v4824_v40 }
0x14a6   :  { %v9874_v59 = vpop.eup %9873 }
0x14a7   :  { %v4826_v41 = vmul.f32 %v9874_v59, %v9872_v58 }
0x14a9   :  { %4828 = vst.msk [vmem:[#allocation3 + $0x98] sm:$0xff] %vm1241_vm4, %v4826_v41  ;;  %8262 = vmatmul.mubr.msk.f32.vlgmr.msra.gmra.mrb[40].mxu0 %vm1241_vm4, %v4826_v41  ;;  %8265 = vmatmul.mubr.msk.f32.vlgmr.msra.gmra.mrb[40].mxu1 %vm1241_vm4, %v4826_v41 }
0x14aa   :  { %9032 = vmatpush1.bf16.msra.mxu0 %v10482_v51  ;;  %9044 = vmatpush1.bf16.msra.mxu1 %v10499_v57 }
0x14ab   :  { %9034 = vmatprep.subr.bf16.mxu0 %v10491_v54  ;;  %9046 = vmatprep.subr.bf16.mxu1 %v10508_v60 }
0x14ac   :  { %5079 = vmatprep.mubr.f32.mxu0 %v10108_v10  ;;  %5150 = vmatprep.mubr.f32.mxu1 %v10108_v10 }
0x14ae   :  { %9036 = vmatpush1.bf16.msra.mxu0 %v10529_v2  ;;  %9048 = vmatpush1.bf16.msra.mxu1 %v10541_v6 }
0x14af   :  { %9038 = vmatprep.subr.bf16.mxu0 %v10533_v3  ;;  %9050 = vmatprep.subr.bf16.mxu1 %v10545_v7 }
0x14b2   :  { %9040 = vmatpush1.bf16.msra.mxu0 %v10560_v12  ;;  %9052 = vmatpush1.bf16.msra.mxu1 %v10564_v13 }
0x14b3   :  { %8269 = vmatprep.subr.msk.mxu0 %vm108_vm0, %v11229_v4  ;;  %8272 = vmatprep.subr.msk.mxu1 %vm108_vm0, %v11236_v5 }
0x14b6   :  { %8270 = vmatpush1.msk.msra.mxu0 %vm108_vm0, %v11243_v8  ;;  %8273 = vmatpush1.msk.msra.mxu1 %vm108_vm0, %v11250_v9 }
0x14b7   :  { %9054 = vmatprep.subr.bf16.mxu0 %v10397_v35  ;;  %9066 = vmatprep.subr.bf16.mxu1 %v10400_v36 }
0x157c   :  { %v4902_v61 = vpop.f32.mrb[40].mxu0  ;;  %v4973_v43 = vpop.f32.mrb[40].mxu1 }
0x157d   :  { %v9358_v44 = vadd.f32 %v4902_v61, %v10655_v26  ;;  %v4904_v45 = vpop.f32.mrb[41].mxu0  ;;  %v4975_v46 = vpop.f32.mrb[41].mxu1  ;;  %v9374_v53 = vadd.f32 %v4973_v43, %v10666_v42 }
0x157e   :  { %v9359_v47 = vadd.f32 %v4904_v45, %v10657_v27  ;;  %v9375_v50 = vadd.f32 %v4975_v46, %v10662_v39 }
0x157f   :  { %v8266_v48 = vmul.f32 -1.442695, %v9358_v44 }
0x1580   :  { %v8267_v49 = vmul.f32 -1.442695, %v9359_v47  ;;  %v8268_v52 = vmul.f32 -1.442695, %v9375_v50 }
0x1581   :  { %9875 = vpow2.f32 %v8266_v48 }
0x1582   :  { %9877 = vpow2.f32 %v8267_v49 }
0x1583   :  { %9879 = vpow2.f32 %v8268_v52 }
0x1584   :  { %9881 = vtanh.f32 %v9374_v53 }
0x158b   :  { %v9876_v55 = vpop.eup %9875 }
0x158c   :  { %v9878_v62 = vpop.eup %9877  ;;  %v4985_v63 = vadd.f32 1.0, %v9876_v55 }
0x158d   :  { %v4991_v0 = vadd.f32 1.0, %v9878_v62  ;;  %v9880_v1 = vpop.eup %9879 }
0x158e   :  { %9883 = vrcp.f32 %v4985_v63  ;;  %v9882_v11 = vpop.eup %9881  ;;  %v4998_v21 = vadd.f32 1.0, %v9880_v1 }
0x158f   :  { %9885 = vrcp.f32 %v4991_v0 }
0x1590   :  { %9887 = vrcp.f32 %v4998_v21 }
0x1598   :  { %v9884_v15 = vpop.eup %9883 }
0x1599   :  { %v9886_v19 = vpop.eup %9885  ;;  %v5002_v20 = vmul.f32 %v9884_v15, %v9882_v11 }
0x159a   :  { %v5001_v23 = vmul.f32 %v9886_v19, %v4824_v40  ;;  %v9888_v25 = vpop.eup %9887 }
0x159c   :  { %v5003_v24 = vadd.f32 %v5002_v20, %v5001_v23 }
0x159e   :  { %9889 = vtanh.f32 %v5003_v24 }
0x15a8   :  { %v9890_v28 = vpop.eup %9889 }
0x15a9   :  { %v5005_v29 = vmul.f32 %v9890_v28, %v9888_v25 }
0x15ab   :  { %5007 = vst.msk [vmem:[#allocation3 + $0xa0] sm:$0xff] %vm1241_vm4, %v5005_v29  ;;  %8271 = vmatmul.mubr.msk.f32.vlgmr.msra.gmra.mrb[42].mxu0 %vm1241_vm4, %v5005_v29  ;;  %8274 = vmatmul.mubr.msk.f32.vlgmr.msra.gmra.mrb[42].mxu1 %vm1241_vm4, %v5005_v29 }
0x15ac   :  { %9056 = vmatpush1.bf16.msra.mxu0 %v10482_v51  ;;  %9068 = vmatpush1.bf16.msra.mxu1 %v10499_v57 }
0x15ad   :  { %9058 = vmatprep.subr.bf16.mxu0 %v10491_v54  ;;  %9070 = vmatprep.subr.bf16.mxu1 %v10508_v60 }
0x15ae   :  { %5258 = vmatprep.mubr.f32.mxu0 %v10108_v10  ;;  %5329 = vmatprep.mubr.f32.mxu1 %v10108_v10 }
0x15b0   :  { %9060 = vmatpush1.bf16.msra.mxu0 %v10529_v2  ;;  %9072 = vmatpush1.bf16.msra.mxu1 %v10541_v6 }
0x15b1   :  { %9062 = vmatprep.subr.bf16.mxu0 %v10533_v3  ;;  %9074 = vmatprep.subr.bf16.mxu1 %v10545_v7 }
0x15b4   :  { %9064 = vmatpush1.bf16.msra.mxu0 %v10560_v12  ;;  %9076 = vmatpush1.bf16.msra.mxu1 %v10564_v13 }
0x15b5   :  { %8278 = vmatprep.subr.msk.mxu0 %vm108_vm0, %v11229_v4  ;;  %8281 = vmatprep.subr.msk.mxu1 %vm108_vm0, %v11236_v5 }
0x15b8   :  { %8279 = vmatpush1.msk.msra.mxu0 %vm108_vm0, %v11243_v8  ;;  %8282 = vmatpush1.msk.msra.mxu1 %vm108_vm0, %v11250_v9 }
0x15b9   :  { %9078 = vmatprep.subr.bf16.mxu0 %v10397_v35  ;;  %9090 = vmatprep.subr.bf16.mxu1 %v10400_v36 }
0x167e   :  { %v5081_v30 = vpop.f32.mrb[42].mxu0  ;;  %v5152_v31 = vpop.f32.mrb[42].mxu1 }
0x167f   :  { %v9360_v32 = vadd.f32 %v5081_v30, %v10655_v26  ;;  %v5083_v14 = vpop.f32.mrb[43].mxu0  ;;  %v5154_v33 = vpop.f32.mrb[43].mxu1  ;;  %v9376_v38 = vadd.f32 %v5152_v31, %v10666_v42 }
0x1680   :  { %v9361_v16 = vadd.f32 %v5083_v14, %v10657_v27  ;;  %v9377_v18 = vadd.f32 %v5154_v33, %v10662_v39 }
0x1681   :  { %v8275_v17 = vmul.f32 -1.442695, %v9360_v32 }
0x1682   :  { %v8276_v34 = vmul.f32 -1.442695, %v9361_v16  ;;  %v8277_v37 = vmul.f32 -1.442695, %v9377_v18 }
0x1683   :  { %9891 = vpow2.f32 %v8275_v17 }
0x1684   :  { %9893 = vpow2.f32 %v8276_v34 }
0x1685   :  { %9895 = vpow2.f32 %v8277_v37 }
0x1686   :  { %9897 = vtanh.f32 %v9376_v38 }
0x168d   :  { %v9892_v56 = vpop.eup %9891 }
0x168e   :  { %v9894_v40 = vpop.eup %9893  ;;  %v5164_v58 = vadd.f32 1.0, %v9892_v56 }
0x168f   :  { %v5170_v59 = vadd.f32 1.0, %v9894_v40  ;;  %v9896_v41 = vpop.eup %9895 }
0x1690   :  { %9899 = vrcp.f32 %v5164_v58  ;;  %v9898_v61 = vpop.eup %9897  ;;  %v5177_v46 = vadd.f32 1.0, %v9896_v41 }
0x1691   :  { %9901 = vrcp.f32 %v5170_v59 }
0x1692   :  { %9903 = vrcp.f32 %v5177_v46 }
0x169a   :  { %v9900_v43 = vpop.eup %9899 }
0x169b   :  { %v9902_v44 = vpop.eup %9901  ;;  %v5181_v45 = vmul.f32 %v9900_v43, %v9898_v61 }
0x169c   :  { %v5180_v47 = vmul.f32 %v9902_v44, %v5003_v24  ;;  %v9904_v49 = vpop.eup %9903 }
0x169e   :  { %v5182_v48 = vadd.f32 %v5181_v45, %v5180_v47 }
0x16a0   :  { %9905 = vtanh.f32 %v5182_v48 }
0x16aa   :  { %v9906_v50 = vpop.eup %9905 }
0x16ab   :  { %v5184_v52 = vmul.f32 %v9906_v50, %v9904_v49 }
0x16ad   :  { %5186 = vst.msk [vmem:[#allocation3 + $0xa8] sm:$0xff] %vm1241_vm4, %v5184_v52  ;;  %8280 = vmatmul.mubr.msk.f32.vlgmr.msra.gmra.mrb[44].mxu0 %vm1241_vm4, %v5184_v52  ;;  %8283 = vmatmul.mubr.msk.f32.vlgmr.msra.gmra.mrb[44].mxu1 %vm1241_vm4, %v5184_v52 }
0x16ae   :  { %9080 = vmatpush1.bf16.msra.mxu0 %v10482_v51  ;;  %9092 = vmatpush1.bf16.msra.mxu1 %v10499_v57 }
0x16af   :  { %9082 = vmatprep.subr.bf16.mxu0 %v10491_v54  ;;  %9094 = vmatprep.subr.bf16.mxu1 %v10508_v60 }
0x16b0   :  { %5437 = vmatprep.mubr.f32.mxu0 %v10108_v10  ;;  %5508 = vmatprep.mubr.f32.mxu1 %v10108_v10 }
0x16b2   :  { %9084 = vmatpush1.bf16.msra.mxu0 %v10529_v2  ;;  %9096 = vmatpush1.bf16.msra.mxu1 %v10541_v6 }
0x16b3   :  { %9086 = vmatprep.subr.bf16.mxu0 %v10533_v3  ;;  %9098 = vmatprep.subr.bf16.mxu1 %v10545_v7 }
0x16b6   :  { %9088 = vmatpush1.bf16.msra.mxu0 %v10560_v12  ;;  %9100 = vmatpush1.bf16.msra.mxu1 %v10564_v13 }
0x16b7   :  { %8287 = vmatprep.subr.msk.mxu0 %vm108_vm0, %v11229_v4  ;;  %8290 = vmatprep.subr.msk.mxu1 %vm108_vm0, %v11236_v5 }
0x16ba   :  { %8288 = vmatpush1.msk.msra.mxu0 %vm108_vm0, %v11243_v8  ;;  %8291 = vmatpush1.msk.msra.mxu1 %vm108_vm0, %v11250_v9 }
0x16bb   :  { %9102 = vmatprep.subr.bf16.mxu0 %v10397_v35  ;;  %9114 = vmatprep.subr.bf16.mxu1 %v10400_v36 }
0x1780   :  { %v5260_v53 = vpop.f32.mrb[44].mxu0  ;;  %v5331_v55 = vpop.f32.mrb[44].mxu1 }
0x1781   :  { %v9362_v62 = vadd.f32 %v5260_v53, %v10655_v26  ;;  %v5262_v63 = vpop.f32.mrb[45].mxu0  ;;  %v5333_v0 = vpop.f32.mrb[45].mxu1  ;;  %v9378_v21 = vadd.f32 %v5331_v55, %v10666_v42 }
0x1782   :  { %v9363_v1 = vadd.f32 %v5262_v63, %v10657_v27  ;;  %v9379_v19 = vadd.f32 %v5333_v0, %v10662_v39 }
0x1783   :  { %v8284_v11 = vmul.f32 -1.442695, %v9362_v62 }
0x1784   :  { %v8285_v15 = vmul.f32 -1.442695, %v9363_v1  ;;  %v8286_v20 = vmul.f32 -1.442695, %v9379_v19 }
0x1785   :  { %9907 = vpow2.f32 %v8284_v11 }
0x1786   :  { %9909 = vpow2.f32 %v8285_v15 }
0x1787   :  { %9911 = vpow2.f32 %v8286_v20 }
0x1788   :  { %9913 = vtanh.f32 %v9378_v21 }
0x178f   :  { %v9908_v23 = vpop.eup %9907 }
0x1790   :  { %v9910_v24 = vpop.eup %9909  ;;  %v5343_v25 = vadd.f32 1.0, %v9908_v23 }
0x1791   :  { %v5349_v28 = vadd.f32 1.0, %v9910_v24  ;;  %v9912_v29 = vpop.eup %9911 }
0x1792   :  { %9915 = vrcp.f32 %v5343_v25  ;;  %v9914_v30 = vpop.eup %9913  ;;  %v5356_v33 = vadd.f32 1.0, %v9912_v29 }
0x1793   :  { %9917 = vrcp.f32 %v5349_v28 }
0x1794   :  { %9919 = vrcp.f32 %v5356_v33 }
0x179c   :  { %v9916_v31 = vpop.eup %9915 }
0x179d   :  { %v9918_v32 = vpop.eup %9917  ;;  %v5360_v14 = vmul.f32 %v9916_v31, %v9914_v30 }
0x179e   :  { %v5359_v16 = vmul.f32 %v9918_v32, %v5182_v48  ;;  %v9920_v34 = vpop.eup %9919 }
0x17a0   :  { %v5361_v17 = vadd.f32 %v5360_v14, %v5359_v16 }
0x17a2   :  { %9921 = vtanh.f32 %v5361_v17 }
0x17ac   :  { %v9922_v18 = vpop.eup %9921 }
0x17ad   :  { %v5363_v37 = vmul.f32 %v9922_v18, %v9920_v34 }
0x17af   :  { %5365 = vst.msk [vmem:[#allocation3 + $0xb0] sm:$0xff] %vm1241_vm4, %v5363_v37  ;;  %8289 = vmatmul.mubr.msk.f32.vlgmr.msra.gmra.mrb[46].mxu0 %vm1241_vm4, %v5363_v37  ;;  %8292 = vmatmul.mubr.msk.f32.vlgmr.msra.gmra.mrb[46].mxu1 %vm1241_vm4, %v5363_v37 }
0x17b0   :  { %9104 = vmatpush1.bf16.msra.mxu0 %v10482_v51  ;;  %9116 = vmatpush1.bf16.msra.mxu1 %v10499_v57 }
0x17b1   :  { %9106 = vmatprep.subr.bf16.mxu0 %v10491_v54  ;;  %9118 = vmatprep.subr.bf16.mxu1 %v10508_v60 }
0x17b2   :  { %5616 = vmatprep.mubr.f32.mxu0 %v10108_v10  ;;  %5687 = vmatprep.mubr.f32.mxu1 %v10108_v10 }
0x17b4   :  { %9108 = vmatpush1.bf16.msra.mxu0 %v10529_v2  ;;  %9120 = vmatpush1.bf16.msra.mxu1 %v10541_v6 }
0x17b5   :  { %9110 = vmatprep.subr.bf16.mxu0 %v10533_v3  ;;  %9122 = vmatprep.subr.bf16.mxu1 %v10545_v7 }
0x17b8   :  { %9112 = vmatpush1.bf16.msra.mxu0 %v10560_v12  ;;  %9124 = vmatpush1.bf16.msra.mxu1 %v10564_v13 }
0x17b9   :  { %8296 = vmatprep.subr.msk.mxu0 %vm108_vm0, %v11229_v4  ;;  %8299 = vmatprep.subr.msk.mxu1 %vm108_vm0, %v11236_v5 }
0x17bc   :  { %8297 = vmatpush1.msk.msra.mxu0 %vm108_vm0, %v11243_v8  ;;  %8300 = vmatpush1.msk.msra.mxu1 %vm108_vm0, %v11250_v9 }
0x17bd   :  { %9126 = vmatprep.subr.bf16.mxu0 %v10397_v35  ;;  %9138 = vmatprep.subr.bf16.mxu1 %v10400_v36 }
0x1882   :  { %v5439_v38 = vpop.f32.mrb[46].mxu0  ;;  %v5510_v56 = vpop.f32.mrb[46].mxu1 }
0x1883   :  { %v9364_v40 = vadd.f32 %v5439_v38, %v10655_v26  ;;  %v5441_v58 = vpop.f32.mrb[47].mxu0  ;;  %v5512_v59 = vpop.f32.mrb[47].mxu1  ;;  %v9380_v46 = vadd.f32 %v5510_v56, %v10666_v42 }
0x1884   :  { %v9365_v41 = vadd.f32 %v5441_v58, %v10657_v27  ;;  %v9381_v44 = vadd.f32 %v5512_v59, %v10662_v39 }
0x1885   :  { %v8293_v61 = vmul.f32 -1.442695, %v9364_v40 }
0x1886   :  { %v8294_v43 = vmul.f32 -1.442695, %v9365_v41  ;;  %v8295_v45 = vmul.f32 -1.442695, %v9381_v44 }
0x1887   :  { %9923 = vpow2.f32 %v8293_v61 }
0x1888   :  { %9925 = vpow2.f32 %v8294_v43 }
0x1889   :  { %9927 = vpow2.f32 %v8295_v45 }
0x188a   :  { %9929 = vtanh.f32 %v9380_v46 }
0x1891   :  { %v9924_v47 = vpop.eup %9923 }
0x1892   :  { %v9926_v48 = vpop.eup %9925  ;;  %v5522_v49 = vadd.f32 1.0, %v9924_v47 }
0x1893   :  { %v5528_v50 = vadd.f32 1.0, %v9926_v48  ;;  %v9928_v52 = vpop.eup %9927 }
0x1894   :  { %9931 = vrcp.f32 %v5522_v49  ;;  %v9930_v53 = vpop.eup %9929  ;;  %v5535_v0 = vadd.f32 1.0, %v9928_v52 }
0x1895   :  { %9933 = vrcp.f32 %v5528_v50 }
0x1896   :  { %9935 = vrcp.f32 %v5535_v0 }
0x189e   :  { %v9932_v55 = vpop.eup %9931 }
0x189f   :  { %v9934_v62 = vpop.eup %9933  ;;  %v5539_v63 = vmul.f32 %v9932_v55, %v9930_v53 }
0x18a0   :  { %v5538_v1 = vmul.f32 %v9934_v62, %v5361_v17  ;;  %v9936_v15 = vpop.eup %9935 }
0x18a2   :  { %v5540_v11 = vadd.f32 %v5539_v63, %v5538_v1 }
0x18a4   :  { %9937 = vtanh.f32 %v5540_v11 }
0x18ae   :  { %v9938_v19 = vpop.eup %9937 }
0x18af   :  { %v5542_v20 = vmul.f32 %v9938_v19, %v9936_v15 }
0x18b1   :  { %5544 = vst.msk [vmem:[#allocation3 + $0xb8] sm:$0xff] %vm1241_vm4, %v5542_v20  ;;  %8298 = vmatmul.mubr.msk.f32.vlgmr.msra.gmra.mrb[48].mxu0 %vm1241_vm4, %v5542_v20  ;;  %8301 = vmatmul.mubr.msk.f32.vlgmr.msra.gmra.mrb[48].mxu1 %vm1241_vm4, %v5542_v20 }
0x18b2   :  { %9128 = vmatpush1.bf16.msra.mxu0 %v10482_v51  ;;  %9140 = vmatpush1.bf16.msra.mxu1 %v10499_v57 }
0x18b3   :  { %9130 = vmatprep.subr.bf16.mxu0 %v10491_v54  ;;  %9142 = vmatprep.subr.bf16.mxu1 %v10508_v60 }
0x18b4   :  { %5795 = vmatprep.mubr.f32.mxu0 %v10108_v10  ;;  %5866 = vmatprep.mubr.f32.mxu1 %v10108_v10 }
0x18b6   :  { %9132 = vmatpush1.bf16.msra.mxu0 %v10529_v2  ;;  %9144 = vmatpush1.bf16.msra.mxu1 %v10541_v6 }
0x18b7   :  { %9134 = vmatprep.subr.bf16.mxu0 %v10533_v3  ;;  %9146 = vmatprep.subr.bf16.mxu1 %v10545_v7 }
0x18ba   :  { %9136 = vmatpush1.bf16.msra.mxu0 %v10560_v12  ;;  %9148 = vmatpush1.bf16.msra.mxu1 %v10564_v13 }
0x18bb   :  { %8305 = vmatprep.subr.msk.mxu0 %vm108_vm0, %v11229_v4  ;;  %8308 = vmatprep.subr.msk.mxu1 %vm108_vm0, %v11236_v5 }
0x18be   :  { %8306 = vmatpush1.msk.msra.mxu0 %vm108_vm0, %v11243_v8  ;;  %8309 = vmatpush1.msk.msra.mxu1 %vm108_vm0, %v11250_v9 }
0x18bf   :  { %9150 = vmatprep.subr.bf16.mxu0 %v10397_v35  ;;  %9162 = vmatprep.subr.bf16.mxu1 %v10400_v36 }
0x1984   :  { %v5618_v21 = vpop.f32.mrb[48].mxu0  ;;  %v5689_v23 = vpop.f32.mrb[48].mxu1 }
0x1985   :  { %v9382_v24 = vadd.f32 %v5618_v21, %v10655_v26  ;;  %v5620_v25 = vpop.f32.mrb[49].mxu0  ;;  %v5691_v28 = vpop.f32.mrb[49].mxu1  ;;  %v9394_v33 = vadd.f32 %v5689_v23, %v10666_v42 }
0x1986   :  { %v9383_v29 = vadd.f32 %v5620_v25, %v10657_v27  ;;  %v9395_v32 = vadd.f32 %v5691_v28, %v10662_v39 }
0x1987   :  { %v8302_v30 = vmul.f32 -1.442695, %v9382_v24 }
0x1988   :  { %v8303_v31 = vmul.f32 -1.442695, %v9383_v29  ;;  %v8304_v14 = vmul.f32 -1.442695, %v9395_v32 }
0x1989   :  { %9939 = vpow2.f32 %v8302_v30 }
0x198a   :  { %9941 = vpow2.f32 %v8303_v31 }
0x198b   :  { %9943 = vpow2.f32 %v8304_v14 }
0x198c   :  { %9945 = vtanh.f32 %v9394_v33 }
0x1993   :  { %v9940_v16 = vpop.eup %9939 }
0x1994   :  { %v9942_v17 = vpop.eup %9941  ;;  %v5701_v34 = vadd.f32 1.0, %v9940_v16 }
0x1995   :  { %v5707_v18 = vadd.f32 1.0, %v9942_v17  ;;  %v9944_v37 = vpop.eup %9943 }
0x1996   :  { %9947 = vrcp.f32 %v5701_v34  ;;  %v9946_v38 = vpop.eup %9945  ;;  %v5714_v59 = vadd.f32 1.0, %v9944_v37 }
0x1997   :  { %9949 = vrcp.f32 %v5707_v18 }
0x1998   :  { %9951 = vrcp.f32 %v5714_v59 }
0x19a0   :  { %v9948_v56 = vpop.eup %9947 }
0x19a1   :  { %v9950_v40 = vpop.eup %9949  ;;  %v5718_v58 = vmul.f32 %v9948_v56, %v9946_v38 }
0x19a2   :  { %v5717_v41 = vmul.f32 %v9950_v40, %v5540_v11  ;;  %v9952_v43 = vpop.eup %9951 }
0x19a4   :  { %v5719_v61 = vadd.f32 %v5718_v58, %v5717_v41 }
0x19a6   :  { %9953 = vtanh.f32 %v5719_v61 }
0x19b0   :  { %v9954_v44 = vpop.eup %9953 }
0x19b1   :  { %v5721_v45 = vmul.f32 %v9954_v44, %v9952_v43 }
0x19b3   :  { %5723 = vst.msk [vmem:[#allocation3 + $0xc0] sm:$0xff] %vm1241_vm4, %v5721_v45  ;;  %8307 = vmatmul.mubr.msk.f32.vlgmr.msra.gmra.mrb[50].mxu0 %vm1241_vm4, %v5721_v45  ;;  %8310 = vmatmul.mubr.msk.f32.vlgmr.msra.gmra.mrb[50].mxu1 %vm1241_vm4, %v5721_v45 }
0x19b4   :  { %9152 = vmatpush1.bf16.msra.mxu0 %v10482_v51  ;;  %9164 = vmatpush1.bf16.msra.mxu1 %v10499_v57 }
0x19b5   :  { %9154 = vmatprep.subr.bf16.mxu0 %v10491_v54  ;;  %9166 = vmatprep.subr.bf16.mxu1 %v10508_v60 }
0x19b6   :  { %5974 = vmatprep.mubr.f32.mxu0 %v10108_v10  ;;  %6045 = vmatprep.mubr.f32.mxu1 %v10108_v10 }
0x19b8   :  { %9156 = vmatpush1.bf16.msra.mxu0 %v10529_v2  ;;  %9168 = vmatpush1.bf16.msra.mxu1 %v10541_v6 }
0x19b9   :  { %9158 = vmatprep.subr.bf16.mxu0 %v10533_v3  ;;  %9170 = vmatprep.subr.bf16.mxu1 %v10545_v7 }
0x19bc   :  { %9160 = vmatpush1.bf16.msra.mxu0 %v10560_v12  ;;  %9172 = vmatpush1.bf16.msra.mxu1 %v10564_v13 }
0x19bd   :  { %8314 = vmatprep.subr.msk.mxu0 %vm108_vm0, %v11229_v4  ;;  %8317 = vmatprep.subr.msk.mxu1 %vm108_vm0, %v11236_v5 }
0x19c0   :  { %8315 = vmatpush1.msk.msra.mxu0 %vm108_vm0, %v11243_v8  ;;  %8318 = vmatpush1.msk.msra.mxu1 %vm108_vm0, %v11250_v9 }
0x19c1   :  { %9174 = vmatprep.subr.bf16.mxu0 %v10397_v35  ;;  %9186 = vmatprep.subr.bf16.mxu1 %v10400_v36 }
0x1a86   :  { %v5797_v46 = vpop.f32.mrb[50].mxu0  ;;  %v5868_v47 = vpop.f32.mrb[50].mxu1 }
0x1a87   :  { %v9384_v48 = vadd.f32 %v5797_v46, %v10655_v26  ;;  %v5799_v49 = vpop.f32.mrb[51].mxu0  ;;  %v5870_v50 = vpop.f32.mrb[51].mxu1  ;;  %v9396_v0 = vadd.f32 %v5868_v47, %v10666_v42 }
0x1a88   :  { %v9385_v52 = vadd.f32 %v5799_v49, %v10657_v27  ;;  %v9397_v62 = vadd.f32 %v5870_v50, %v10662_v39 }
0x1a89   :  { %v8311_v53 = vmul.f32 -1.442695, %v9384_v48 }
0x1a8a   :  { %v8312_v55 = vmul.f32 -1.442695, %v9385_v52  ;;  %v8313_v63 = vmul.f32 -1.442695, %v9397_v62 }
0x1a8b   :  { %9955 = vpow2.f32 %v8311_v53 }
0x1a8c   :  { %9957 = vpow2.f32 %v8312_v55 }
0x1a8d   :  { %9959 = vpow2.f32 %v8313_v63 }
0x1a8e   :  { %9961 = vtanh.f32 %v9396_v0 }
0x1a95   :  { %v9956_v1 = vpop.eup %9955 }
0x1a96   :  { %v9958_v11 = vpop.eup %9957  ;;  %v5880_v15 = vadd.f32 1.0, %v9956_v1 }
0x1a97   :  { %v5886_v19 = vadd.f32 1.0, %v9958_v11  ;;  %v9960_v20 = vpop.eup %9959 }
0x1a98   :  { %9963 = vrcp.f32 %v5880_v15  ;;  %v9962_v21 = vpop.eup %9961  ;;  %v5893_v28 = vadd.f32 1.0, %v9960_v20 }
0x1a99   :  { %9965 = vrcp.f32 %v5886_v19 }
0x1a9a   :  { %9967 = vrcp.f32 %v5893_v28 }
0x1aa2   :  { %v9964_v23 = vpop.eup %9963 }
0x1aa3   :  { %v9966_v24 = vpop.eup %9965  ;;  %v5897_v25 = vmul.f32 %v9964_v23, %v9962_v21 }
0x1aa4   :  { %v5896_v29 = vmul.f32 %v9966_v24, %v5719_v61  ;;  %v9968_v31 = vpop.eup %9967 }
0x1aa6   :  { %v5898_v30 = vadd.f32 %v5897_v25, %v5896_v29 }
0x1aa8   :  { %9969 = vtanh.f32 %v5898_v30 }
0x1ab2   :  { %v9970_v32 = vpop.eup %9969 }
0x1ab3   :  { %v5900_v14 = vmul.f32 %v9970_v32, %v9968_v31 }
0x1ab5   :  { %5902 = vst.msk [vmem:[#allocation3 + $0xc8] sm:$0xff] %vm1241_vm4, %v5900_v14  ;;  %8316 = vmatmul.mubr.msk.f32.vlgmr.msra.gmra.mrb[52].mxu0 %vm1241_vm4, %v5900_v14  ;;  %8319 = vmatmul.mubr.msk.f32.vlgmr.msra.gmra.mrb[52].mxu1 %vm1241_vm4, %v5900_v14 }
0x1ab6   :  { %9176 = vmatpush1.bf16.msra.mxu0 %v10482_v51  ;;  %9188 = vmatpush1.bf16.msra.mxu1 %v10499_v57 }
0x1ab7   :  { %9178 = vmatprep.subr.bf16.mxu0 %v10491_v54  ;;  %9190 = vmatprep.subr.bf16.mxu1 %v10508_v60 }
0x1ab8   :  { %6153 = vmatprep.mubr.f32.mxu0 %v10108_v10  ;;  %6224 = vmatprep.mubr.f32.mxu1 %v10108_v10 }
0x1aba   :  { %9180 = vmatpush1.bf16.msra.mxu0 %v10529_v2  ;;  %9192 = vmatpush1.bf16.msra.mxu1 %v10541_v6 }
0x1abb   :  { %9182 = vmatprep.subr.bf16.mxu0 %v10533_v3  ;;  %9194 = vmatprep.subr.bf16.mxu1 %v10545_v7 }
0x1abe   :  { %9184 = vmatpush1.bf16.msra.mxu0 %v10560_v12  ;;  %9196 = vmatpush1.bf16.msra.mxu1 %v10564_v13 }
0x1abf   :  { %8323 = vmatprep.subr.msk.mxu0 %vm108_vm0, %v11229_v4  ;;  %8326 = vmatprep.subr.msk.mxu1 %vm108_vm0, %v11236_v5 }
0x1ac2   :  { %8324 = vmatpush1.msk.msra.mxu0 %vm108_vm0, %v11243_v8  ;;  %8327 = vmatpush1.msk.msra.mxu1 %vm108_vm0, %v11250_v9 }
0x1ac3   :  { %9198 = vmatprep.subr.bf16.mxu0 %v10397_v35  ;;  %9210 = vmatprep.subr.bf16.mxu1 %v10400_v36 }
0x1b88   :  { %v5976_v33 = vpop.f32.mrb[52].mxu0  ;;  %v6047_v16 = vpop.f32.mrb[52].mxu1 }
0x1b89   :  { %v9386_v17 = vadd.f32 %v5976_v33, %v10655_v26  ;;  %v5978_v34 = vpop.f32.mrb[53].mxu0  ;;  %v6049_v18 = vpop.f32.mrb[53].mxu1  ;;  %v9398_v59 = vadd.f32 %v6047_v16, %v10666_v42  ;;  %v6628_v16 = vld [vmem:[#allocation3 + $0x8] sm:$0x1] }
0x1b8a   :  { %v9387_v37 = vadd.f32 %v5978_v34, %v10657_v27  ;;  %v9399_v40 = vadd.f32 %v6049_v18, %v10662_v39  ;;  %v6629_v34 = vld [vmem:[#allocation3 + $0x10] sm:$0x1]  ;;  %v7180_v18 = vld [vmem:[#allocation3 + $0x11] sm:$0x1] }
0x1b8b   :  { %v8320_v38 = vmul.f32 -1.442695, %v9386_v17  ;;  %v7179_v17 = vld [vmem:[#allocation3 + $0x9] sm:$0x1] }
0x1b8c   :  { %v8321_v56 = vmul.f32 -1.442695, %v9387_v37  ;;  %v8322_v58 = vmul.f32 -1.442695, %v9399_v40  ;;  %v6630_v37 = vld [vmem:[#allocation3 + $0x18] sm:$0x1] }
0x1b8d   :  { %9971 = vpow2.f32 %v8320_v38  ;;  %v7181_v38 = vld [vmem:[#allocation3 + $0x19] sm:$0x1]  ;;  %v6707_v40 = vrot.slane %v6628_v16, 7 }
0x1b8e   :  { %9973 = vpow2.f32 %v8321_v56  ;;  %v6631_v56 = vld [vmem:[#allocation3 + $0x20] sm:$0x1] }
0x1b8f   :  { %9975 = vpow2.f32 %v8322_v58  ;;  %v7238_v58 = vrot.slane %v7179_v17, 7  ;;  %v7192_v17 = vld [vmem:[#allocation3 + $0x71] sm:$0x1] }
0x1b90   :  { %9977 = vtanh.f32 %v9398_v59  ;;  %v6710_v59 = vrot.slane %v6629_v34, 6 }
0x1b97   :  { %v9972_v41 = vpop.eup %9971 }
0x1b98   :  { %v9974_v61 = vpop.eup %9973  ;;  %v6059_v43 = vadd.f32 1.0, %v9972_v41  ;;  %v7182_v41 = vld [vmem:[#allocation3 + $0x21] sm:$0x1] }
0x1b99   :  { %v6065_v44 = vadd.f32 1.0, %v9974_v61  ;;  %v9976_v45 = vpop.eup %9975  ;;  %v7240_v61 = vrot.slane %v7180_v18, 6 }
0x1b9a   :  { %9979 = vrcp.f32 %v6059_v43  ;;  %v9978_v46 = vpop.eup %9977  ;;  %v6072_v50 = vadd.f32 1.0, %v9976_v45  ;;  %v11495_v43 = vld [vmem:[#allocation3 + $0x28] sm:$0x1]  ;;  %v11497_v45 = vld [vmem:[#allocation3 + $0x29] sm:$0x1] }
0x1b9b   :  { %9981 = vrcp.f32 %v6065_v44  ;;  %v6713_v44 = vrot.slane %v6630_v37, 5  ;;  %v6642_v37 = vld [vmem:[#allocation3 + $0x78] sm:$0x1] }
0x1b9c   :  { %9983 = vrcp.f32 %v6072_v50  ;;  %v6716_v50 = vrot.slane %v6631_v56, 4 }
0x1ba4   :  { %v9980_v47 = vpop.eup %9979 }
0x1ba5   :  { %v9982_v48 = vpop.eup %9981  ;;  %v6076_v49 = vmul.f32 %v9980_v47, %v9978_v46  ;;  %v7242_v46 = vrot.slane %v7181_v38, 5 }
0x1ba6   :  { %v6075_v52 = vmul.f32 %v9982_v48, %v5898_v30  ;;  %v9984_v55 = vpop.eup %9983  ;;  %v6627_v48 = vld [vmem:[#allocation3] sm:$0x1] }
0x1ba8   :  { %v6077_v53 = vadd.f32 %v6076_v49, %v6075_v52  ;;  %v6636_v49 = vld [vmem:[#allocation3 + $0x48] sm:$0x1]  ;;  %v7178_v52 = vld [vmem:[#allocation3 + $0x1] sm:$0x1] }
0x1baa   :  { %9985 = vtanh.f32 %v6077_v53 }
0x1bb4   :  { %v9986_v62 = vpop.eup %9985 }
0x1bb5   :  { %v6079_v63 = vmul.f32 %v9986_v62, %v9984_v55  ;;  %v6637_v62 = vld [vmem:[#allocation3 + $0x50] sm:$0x1] }
0x1bb7   :  { %6081 = vst.msk [vmem:[#allocation3 + $0xd0] sm:$0xff] %vm1241_vm4, %v6079_v63  ;;  %8325 = vmatmul.mubr.msk.f32.vlgmr.msra.gmra.mrb[54].mxu0 %vm1241_vm4, %v6079_v63  ;;  %8328 = vmatmul.mubr.msk.f32.vlgmr.msra.gmra.mrb[54].mxu1 %vm1241_vm4, %v6079_v63  ;;  %v7188_v63 = vld [vmem:[#allocation3 + $0x51] sm:$0x1] }
0x1bb8   :  { %9200 = vmatpush1.bf16.msra.mxu0 %v10482_v51  ;;  %9212 = vmatpush1.bf16.msra.mxu1 %v10499_v57 }
0x1bb9   :  { %9202 = vmatprep.subr.bf16.mxu0 %v10491_v54  ;;  %9214 = vmatprep.subr.bf16.mxu1 %v10508_v60 }
0x1bba   :  { %6332 = vmatprep.mubr.f32.mxu0 %v10108_v10  ;;  %6403 = vmatprep.mubr.f32.mxu1 %v10108_v10 }
0x1bbc   :  { %9204 = vmatpush1.bf16.msra.mxu0 %v10529_v2  ;;  %9216 = vmatpush1.bf16.msra.mxu1 %v10541_v6 }
0x1bbd   :  { %9206 = vmatprep.subr.bf16.mxu0 %v10533_v3  ;;  %9218 = vmatprep.subr.bf16.mxu1 %v10545_v7 }
0x1bc0   :  { %9208 = vmatpush1.bf16.msra.mxu0 %v10560_v12  ;;  %9220 = vmatpush1.bf16.msra.mxu1 %v10564_v13 }
0x1bc1   :  { %8332 = vmatprep.subr.msk.mxu0 %vm108_vm0, %v11229_v4  ;;  %8335 = vmatprep.subr.msk.mxu1 %vm108_vm0, %v11236_v5 }
0x1bc4   :  { %8333 = vmatpush1.msk.msra.mxu0 %vm108_vm0, %v11243_v8  ;;  %8336 = vmatpush1.msk.msra.mxu1 %vm108_vm0, %v11250_v9 }
0x1bc5   :  { %9222 = vmatprep.subr.bf16.mxu0 %v10397_v35  ;;  %9234 = vmatprep.subr.bf16.mxu1 %v10400_v36 }
0x1c8a   :  { %v6155_v0 = vpop.f32.mrb[54].mxu0  ;;  %v6226_v1 = vpop.f32.mrb[54].mxu1 }
0x1c8b   :  { %v9388_v11 = vadd.f32 %v6155_v0, %v10655_v26  ;;  %v6157_v15 = vpop.f32.mrb[55].mxu0  ;;  %v6228_v19 = vpop.f32.mrb[55].mxu1  ;;  %v9400_v9 = vadd.f32 %v6226_v1, %v10666_v42  ;;  %v7244_v0 = vrot.slane %v7182_v41, 4 }
0x1c8c   :  { %v9389_v4 = vadd.f32 %v6157_v15, %v10657_v27  ;;  %v9401_v8 = vadd.f32 %v6228_v19, %v10662_v39  ;;  %v6719_v15 = vrot.slane %v11495_v43, 3  ;;  %v7189_v19 = vld [vmem:[#allocation3 + $0x59] sm:$0x1] }
0x1c8d   :  { %v8329_v20 = vmul.f32 -1.442695, %v9388_v11  ;;  %v6638_v11 = vld [vmem:[#allocation3 + $0x58] sm:$0x1]  ;;  %v7256_v18 = vrot.slane %v7189_v19, 5 }
0x1c8e   :  { %v8330_v5 = vmul.f32 -1.442695, %v9389_v4  ;;  %v8331_v21 = vmul.f32 -1.442695, %v9401_v8  ;;  %v7246_v4 = vrot.slane %v11497_v45, 3  ;;  %v6728_v8 = vrot.slane %v6636_v49, 7 }
0x1c8f   :  { %9987 = vpow2.f32 %v8329_v20  ;;  %v6639_v20 = vld [vmem:[#allocation3 + $0x60] sm:$0x1]  ;;  %v6732_v16 = vrot.slane %v6638_v11, 5 }
0x1c90   :  { %9989 = vpow2.f32 %v8330_v5  ;;  %v6709_v5 = vsel %vm6708_vm5, %v6707_v40, %v6627_v48  ;;  %v6734_v56 = vrot.slane %v6639_v20, 4  ;;  %v7193_v40 = vld [vmem:[#allocation3 + $0x79] sm:$0x1] }
0x1c91   :  { %9991 = vpow2.f32 %v8331_v21  ;;  %v7190_v21 = vld [vmem:[#allocation3 + $0x61] sm:$0x1]  ;;  %v7185_v48 = vld [vmem:[#allocation3 + $0x39] sm:$0x1] }
0x1c92   :  { %9993 = vtanh.f32 %v9400_v9  ;;  %v7239_v9 = vsel %vm6708_vm5, %v7238_v58, %v7178_v52  ;;  %v6633_v58 = vld [vmem:[#allocation3 + $0x30] sm:$0x1] }
0x1c99   :  { %v9988_v35 = vpop.eup %9987 }
0x1c9a   :  { %v9990_v23 = vpop.eup %9989  ;;  %v6238_v36 = vadd.f32 1.0, %v9988_v35 }
0x1c9b   :  { %v6244_v24 = vadd.f32 1.0, %v9990_v23  ;;  %v9992_v25 = vpop.eup %9991  ;;  %v6635_v23 = vld [vmem:[#allocation3 + $0x40] sm:$0x1] }
0x1c9c   :  { %9995 = vrcp.f32 %v6238_v36  ;;  %v9994_v28 = vpop.eup %9993  ;;  %v6251_v32 = vadd.f32 1.0, %v9992_v25  ;;  %v6640_v36 = vld [vmem:[#allocation3 + $0x68] sm:$0x1]  ;;  %v6730_v25 = vrot.slane %v6637_v62, 6  ;;  %v7264_v62 = vrot.slane %v7193_v40, 1 }
0x1c9d   :  { %9997 = vrcp.f32 %v6244_v24  ;;  %v6712_v24 = vsel %vm6711_vm6, %v6710_v59, %v6709_v5  ;;  %v6729_v59 = vsel %vm6708_vm5, %v6728_v8, %v6635_v23  ;;  %v6736_v41 = vrot.slane %v6640_v36, 3  ;;  %v10065_v36 = vld [vmem:[%s11886_s2 + $0xc0] sm:$0x3] }
0x1c9e   :  { %9999 = vrcp.f32 %v6251_v32  ;;  %v6641_v32 = vld [vmem:[#allocation3 + $0x70] sm:$0x1] }
0x1ca6   :  { %v9996_v29 = vpop.eup %9995 }
0x1ca7   :  { %v9998_v30 = vpop.eup %9997  ;;  %v6255_v31 = vmul.f32 %v9996_v29, %v9994_v28  ;;  %v7186_v28 = vld [vmem:[#allocation3 + $0x41] sm:$0x1]  ;;  %v7191_v29 = vld [vmem:[#allocation3 + $0x69] sm:$0x1] }
0x1ca8   :  { %v6254_v14 = vmul.f32 %v9998_v30, %v6077_v53  ;;  %v10000_v47 = vpop.eup %9999  ;;  %v7187_v53 = vld [vmem:[#allocation3 + $0x49] sm:$0x1]  ;;  %v7241_v30 = vsel %vm6711_vm6, %v7240_v61, %v7239_v9  ;;  %v7184_v61 = vld [vmem:[#allocation3 + $0x31] sm:$0x1] }
0x1ca9   :  { %v7252_v35 = vrot.slane %v7187_v53, 7  ;;  %v7243_v34 = vsel %vm6714_vm7, %v7242_v46, %v7241_v30  ;;  %v7260_v46 = vrot.slane %v7191_v29, 3  ;;  %v6740_v53 = vrot.slane %v6642_v37, 1 }
0x1caa   :  { %v11492_v33 = vadd.f32 %v6255_v31, %v6254_v14  ;;  %v7254_v31 = vrot.slane %v7188_v63, 6  ;;  %v6715_v14 = vsel %vm6714_vm7, %v6713_v44, %v6712_v24  ;;  %v6722_v63 = vrot.slane %v6633_v58, 2  ;;  %v10066_v24 = vld [vmem:[%s11886_s2 + $0xd0] sm:$0x3] }
0x1cab   :  { %v6718_v38 = vsel %vm6717_vm8, %v6716_v50, %v6715_v14  ;;  %v7253_v44 = vsel %vm6708_vm5, %v7252_v35, %v7186_v28  ;;  %v7262_v50 = vrot.slane %v7192_v17, 2 }
0x1cac   :  { %10001 = vtanh.f32 %v11492_v33  ;;  %v7255_v49 = vsel %vm6711_vm6, %v7254_v31, %v7253_v44  ;;  %v6721_v5 = vsel %vm6720_vm9, %v6719_v15, %v6718_v38  ;;  %v10063_v15 = vld [vmem:[%s11886_s2 + $0xc8] sm:$0x3] }
0x1cb6   :  { %v10002_v55 = vpop.eup %10001 }
0x1cb7   :  { %v6258_v1 = vmul.f32 %v10002_v55, %v10000_v47  ;;  %v6738_v47 = vrot.slane %v6641_v32, 2  ;;  %v7257_v55 = vsel %vm6714_vm7, %v7256_v18, %v7255_v49  ;;  %v6625_v49 = vld [vmem:[%s11889_s5 + $0x10] sm:$0xff] }
0x1cb9   :  { %6260 = vst.msk [vmem:[#allocation3 + $0xd8] sm:$0xff] %vm1241_vm4, %v6258_v1  ;;  %8334 = vmatmul.mubr.msk.f32.vlgmr.msra.gmra.mrb[56].mxu0 %vm1241_vm4, %v6258_v1  ;;  %8337 = vmatmul.mubr.msk.f32.vlgmr.msra.gmra.mrb[56].mxu1 %vm1241_vm4, %v6258_v1  ;;  %v7248_v1 = vrot.slane %v7184_v61, 2 }
0x1cba   :  { %9224 = vmatpush1.bf16.msra.mxu0 %v10482_v51  ;;  %9236 = vmatpush1.bf16.msra.mxu1 %v10499_v57  ;;  %v7245_v51 = vsel %vm6717_vm8, %v7244_v0, %v7243_v34  ;;  %v7258_v57 = vrot.slane %v7190_v21, 4 }
0x1cbb   :  { %9226 = vmatprep.subr.bf16.mxu0 %v10491_v54  ;;  %9238 = vmatprep.subr.bf16.mxu1 %v10508_v60  ;;  %v6634_v54 = vld [vmem:[#allocation3 + $0x38] sm:$0x1]  ;;  %v6731_v60 = vsel %vm6711_vm6, %v6730_v25, %v6729_v59  ;;  %v7247_v21 = vsel %vm6720_vm9, %v7246_v4, %v7245_v51 }
0x1cbc   :  { %6511 = vmatprep.mubr.f32.mxu0 %v10108_v10  ;;  %6582 = vmatprep.mubr.f32.mxu1 %v10108_v10  ;;  %v6733_v52 = vsel %vm6714_vm7, %v6732_v16, %v6731_v60  ;;  %v7259_v11 = vsel %vm6717_vm8, %v7258_v57, %v7257_v55  ;;  %v6725_v19 = vrot.slane %v6634_v54, 1  ;;  %v7249_v45 = vsel %vm6723_vm10, %v7248_v1, %v7247_v21 }
0x1cbd   :  { %v6735_v0 = vsel %vm6717_vm8, %v6734_v56, %v6733_v52  ;;  %v7261_v20 = vsel %vm6720_vm9, %v7260_v46, %v7259_v11  ;;  %v6624_v52 = vld [vmem:[%s11889_s5 + $0x8] sm:$0xff] }
0x1cbe   :  { %9228 = vmatpush1.bf16.msra.mxu0 %v10529_v2  ;;  %9240 = vmatpush1.bf16.msra.mxu1 %v10541_v6  ;;  %v6737_v2 = vsel %vm6720_vm9, %v6736_v41, %v6735_v0  ;;  %v7250_v6 = vrot.slane %v7185_v48, 1  ;;  %v6619_v48 = vld [vmem:[%s11888_s4] sm:$0xff] }
0x1cbf   :  { %9230 = vmatprep.subr.bf16.mxu0 %v10533_v3  ;;  %9242 = vmatprep.subr.bf16.mxu1 %v10545_v7  ;;  %v6739_v3 = vsel %vm6723_vm10, %v6738_v47, %v6737_v2  ;;  %v7263_v7 = vsel %vm6723_vm10, %v7262_v50, %v7261_v20  ;;  %v10109_v50 = vmov 0  }
0x1cc0   :  { %v11540_v8 = vsel %vm6726_vm11, %v6740_v53, %v6739_v3  ;;  %v11546_v43 = vsel %vm6726_vm11, %v7264_v62, %v7263_v7  ;;  %v11562_v9 = vsel %vm6726_vm11, %v7250_v6, %v7249_v45  ;;  %9553 = vset.pattern.permute.xlu0 %v10109_v50  ;;  %9554 = vset.pattern.permute.xlu1 %v10109_v50  ;;  %v6626_v53 = vld [vmem:[%s11889_s5 + $0x18] sm:$0x3f] }
0x1cc1   :  { %v9255_v23 = vpack.c.bf16 %v11546_v43, %v11562_v9  ;;  %6669 = vperm.xlu1 %9554, %v6625_v49   ;;  %v6654_v49 = vld [vmem:[#allocation3 + $0xd8] sm:$0x1] }
0x1cc2   :  { %9232 = vmatpush1.bf16.msra.mxu0 %v10560_v12  ;;  %9244 = vmatpush1.bf16.msra.mxu1 %v10564_v13  ;;  %v10064_v12 = vld [vmem:[%s11886_s2 + $0xd8] sm:$0x3]  ;;  %v6724_v13 = vsel %vm6723_vm10, %v6722_v63, %v6721_v5 }
0x1cc3   :  { %8341 = vmatprep.subr.msk.mxu0 %vm108_vm0, %v10063_v15  ;;  %8344 = vmatprep.subr.msk.mxu1 %vm108_vm0, %v10064_v12  ;;  %v11559_v4 = vsel %vm6726_vm11, %v6725_v19, %v6724_v13 }
0x1cc4   :  { %v9245_v35 = vpack.c.bf16 %v11540_v8, %v11559_v4 }
0x1cc5   :  { %6674 = vperm.xlu1 %9554, %v6626_v53   ;;  %v7205_v53 = vld [vmem:[#allocation3 + $0xd9] sm:$0x1] }
0x1cc6   :  { %8342 = vmatpush1.msk.msra.mxu0 %vm108_vm0, %v10065_v36  ;;  %8345 = vmatpush1.msk.msra.mxu1 %vm108_vm0, %v10066_v24  ;;  %v6645_v24 = vld [vmem:[#allocation3 + $0x90] sm:$0x1] }
0x1cc7   :  { %9246 = vmatprep.subr.bf16.mxu0 %v9245_v35  ;;  %9256 = vmatprep.subr.bf16.mxu1 %v9255_v23 }
0x1d8c   :  { %v6334_v25 = vpop.f32.mrb[56].mxu0  ;;  %v6405_v28 = vpop.f32.mrb[56].mxu1 }
0x1d8d   :  { %v9390_v29 = vadd.f32 %v6334_v25, %v10655_v26  ;;  %v6336_v30 = vpop.f32.mrb[57].mxu0  ;;  %v6407_v31 = vpop.f32.mrb[57].mxu1  ;;  %v9402_v18 = vadd.f32 %v6405_v28, %v10666_v42  ;;  %v6646_v25 = vld [vmem:[#allocation3 + $0x98] sm:$0x1]  ;;  %v7196_v28 = vld [vmem:[#allocation3 + $0x91] sm:$0x1] }
0x1d8e   :  { %v9391_v32 = vadd.f32 %v6336_v30, %v10657_v27  ;;  %v9403_v17 = vadd.f32 %v6407_v31, %v10662_v39  ;;  %v7197_v30 = vld [vmem:[#allocation3 + $0x99] sm:$0x1]  ;;  %v7198_v31 = vld [vmem:[#allocation3 + $0xa1] sm:$0x1] }
0x1d8f   :  { %v8338_v14 = vmul.f32 -1.442695, %v9390_v29  ;;  %v6647_v29 = vld [vmem:[#allocation3 + $0xa0] sm:$0x1] }
0x1d90   :  { %v8339_v16 = vmul.f32 -1.442695, %v9391_v32  ;;  %v8340_v34 = vmul.f32 -1.442695, %v9403_v17  ;;  %v7199_v17 = vld [vmem:[#allocation3 + $0xa9] sm:$0x1] }
0x1d91   :  { %10003 = vpow2.f32 %v8338_v14  ;;  %v6648_v14 = vld [vmem:[#allocation3 + $0xa8] sm:$0x1] }
0x1d92   :  { %10005 = vpow2.f32 %v8339_v16 }
0x1d93   :  { %10007 = vpow2.f32 %v8340_v34 }
0x1d94   :  { %10009 = vtanh.f32 %v9402_v18  ;;  %v6643_v18 = vld [vmem:[#allocation3 + $0x80] sm:$0x1] }
0x1d9b   :  { %v10004_v37 = vpop.eup %10003 }
0x1d9c   :  { %v10006_v38 = vpop.eup %10005  ;;  %v6417_v56 = vadd.f32 1.0, %v10004_v37  ;;  %v6744_v37 = vrot.slane %v6645_v24, 6 }
0x1d9d   :  { %v6423_v40 = vadd.f32 1.0, %v10006_v38  ;;  %v10008_v51 = vpop.eup %10007  ;;  %v6746_v38 = vrot.slane %v6646_v25, 5 }
0x1d9e   :  { %10011 = vrcp.f32 %v6417_v56  ;;  %v10010_v57 = vpop.eup %10009  ;;  %v6430_v61 = vadd.f32 1.0, %v10008_v51 }
0x1d9f   :  { %10013 = vrcp.f32 %v6423_v40  ;;  %v7268_v40 = vrot.slane %v7196_v28, 6 }
0x1da0   :  { %10015 = vrcp.f32 %v6430_v61  ;;  %v6652_v61 = vld [vmem:[#allocation3 + $0xc8] sm:$0x1] }
0x1da8   :  { %v10012_v58 = vpop.eup %10011 }
0x1da9   :  { %v10014_v59 = vpop.eup %10013  ;;  %v6434_v41 = vmul.f32 %v10012_v58, %v10010_v57  ;;  %v6748_v57 = vrot.slane %v6647_v29, 4  ;;  %v7194_v58 = vld [vmem:[#allocation3 + $0x81] sm:$0x1] }
0x1daa   :  { %v6433_v44 = vmul.f32 %v10014_v59, %v11492_v33  ;;  %v10016_v54 = vpop.eup %10015  ;;  %v6623_v33 = vld [vmem:[%s11889_s5] sm:$0xff]  ;;  %v7270_v59 = vrot.slane %v7197_v30, 5 }
0x1dab   :  { %6659 = vperm.xlu0 %9553, %v6623_v33   ;;  %v7204_v33 = vld [vmem:[#allocation3 + $0xd1] sm:$0x1] }
0x1dac   :  { %v6435_v46 = vadd.f32 %v6434_v41, %v6433_v44  ;;  %v7272_v41 = vrot.slane %v7198_v31, 4  ;;  %v6750_v44 = vrot.slane %v6648_v14, 3 }
0x1dae   :  { %10017 = vtanh.f32 %v6435_v46 }
0x1daf   :  { %6664 = vperm.xlu0 %9553, %v6624_v52   ;;  %v7200_v52 = vld [vmem:[#allocation3 + $0xb1] sm:$0x1] }
0x1db8   :  { %v10018_v60 = vpop.eup %10017 }
0x1db9   :  { %v6437_v47 = vmul.f32 %v10018_v60, %v10016_v54  ;;  %v7274_v54 = vrot.slane %v7199_v17, 3  ;;  %v6649_v60 = vld [vmem:[#allocation3 + $0xb0] sm:$0x1] }
0x1dbb   :  { %6439 = vst.msk [vmem:[#allocation3 + $0xe0] sm:$0xff] %vm1241_vm4, %v6437_v47  ;;  %8343 = vmatmul.mubr.msk.f32.vlgmr.msra.gmra.mrb[58].mxu0 %vm1241_vm4, %v6437_v47  ;;  %8346 = vmatmul.mubr.msk.f32.vlgmr.msra.gmra.mrb[58].mxu1 %vm1241_vm4, %v6437_v47  ;;  %v6653_v47 = vld [vmem:[#allocation3 + $0xd0] sm:$0x1] }
0x1dbc   :  { %9248 = vmatpush3.bf16.msra.mxu0 %v9245_v35  ;;  %9258 = vmatpush3.bf16.msra.mxu1 %v9255_v23 }
0x1dbd   :  { %8414 = vmatprep.mubr.msk.f32.mxu0 %vm6769_vm12, %v6619_v48  ;;  %8428 = vmatprep.mubr.msk.f32.mxu1 %vm6769_vm12, %v6619_v48 }
0x1e8e   :  { %v6513_v55 = vpop.f32.mrb[58].mxu0  ;;  %v6584_v62 = vpop.f32.mrb[58].mxu1 }
0x1e8f   :  { %v9392_v63 = vadd.f32 %v6513_v55, %v10655_v26  ;;  %v6515_v0 = vpop.f32.mrb[59].mxu0  ;;  %v6586_v1 = vpop.f32.mrb[59].mxu1  ;;  %v9404_v5 = vadd.f32 %v6584_v62, %v10666_v42  ;;  %v7195_v42 = vld [vmem:[#allocation3 + $0x89] sm:$0x1]  ;;  %v6655_v62 = vld [vmem:[#allocation3 + $0xe0] sm:$0x1] }
0x1e90   :  { %v9393_v11 = vadd.f32 %v6515_v0, %v10657_v27  ;;  %v9405_v6 = vadd.f32 %v6586_v1, %v10662_v39  ;;  %v6644_v39 = vld [vmem:[#allocation3 + $0x88] sm:$0x1]  ;;  %v7266_v56 = vrot.slane %v7195_v42, 7  ;;  %v6756_v0 = vrot.slane %v6652_v61, 7  ;;  %v7206_v1 = vld [vmem:[#allocation3 + $0xe1] sm:$0x1] }
0x1e91   :  { %v8347_v19 = vmul.f32 -1.442695, %v9392_v63  ;;  %v6742_v16 = vrot.slane %v6644_v39, 7  ;;  %v6620_v61 = vld [vmem:[%s11888_s4 + $0x8] sm:$0xff] }
0x1e92   :  { %v8348_v2 = vmul.f32 -1.442695, %v9393_v11  ;;  %v8349_v20 = vmul.f32 -1.442695, %v9405_v6  ;;  %v7267_v55 = vsel %vm6708_vm5, %v7266_v56, %v7194_v58 }
0x1e93   :  { %10019 = vpow2.f32 %v8347_v19  ;;  %v6743_v48 = vsel %vm6708_vm5, %v6742_v16, %v6643_v18  ;;  %v7269_v11 = vsel %vm6711_vm6, %v7268_v40, %v7267_v55 }
0x1e94   :  { %10021 = vpow2.f32 %v8348_v2  ;;  %v6745_v50 = vsel %vm6711_vm6, %v6744_v37, %v6743_v48  ;;  %v6650_v2 = vld [vmem:[#allocation3 + $0xb8] sm:$0x1] }
0x1e95   :  { %10023 = vpow2.f32 %v8349_v20  ;;  %v6747_v63 = vsel %vm6714_vm7, %v6746_v38, %v6745_v50  ;;  %v6758_v20 = vrot.slane %v6653_v47, 6  ;;  %v6754_v39 = vrot.slane %v6650_v2, 1 }
0x1e96   :  { %10025 = vtanh.f32 %v9404_v5  ;;  %v6749_v6 = vsel %vm6717_vm8, %v6748_v57, %v6747_v63  ;;  %v7201_v5 = vld [vmem:[#allocation3 + $0xb9] sm:$0x1] }
0x1e97   :  { %v7278_v24 = vrot.slane %v7201_v5, 1 }
0x1e9d   :  { %v10020_v3 = vpop.eup %10019 }
0x1e9e   :  { %v10022_v7 = vpop.eup %10021  ;;  %v6596_v21 = vadd.f32 1.0, %v10020_v3  ;;  %v7271_v3 = vsel %vm6714_vm7, %v7270_v59, %v7269_v11 }
0x1e9f   :  { %v6602_v15 = vadd.f32 1.0, %v10022_v7  ;;  %v10024_v26 = vpop.eup %10023  ;;  %v7282_v7 = vrot.slane %v7204_v33, 6 }
0x1ea0   :  { %10027 = vrcp.f32 %v6596_v21  ;;  %v10026_v12 = vpop.eup %10025  ;;  %v6609_v35 = vadd.f32 1.0, %v10024_v26  ;;  %v6752_v21 = vrot.slane %v6649_v60, 2  ;;  %v7276_v26 = vrot.slane %v7200_v52, 2  ;;  %v6670_v60 = vpop.permute.xlu1 %6669 }
0x1ea1   :  { %10029 = vrcp.f32 %v6602_v15  ;;  %v6760_v15 = vrot.slane %v6654_v49, 5 }
0x1ea2   :  { %10031 = vrcp.f32 %v6609_v35  ;;  %v7202_v35 = vld [vmem:[#allocation3 + $0xc1] sm:$0x1] }
0x1eaa   :  { %v10028_v27 = vpop.eup %10027 }
0x1eab   :  { %v10030_v13 = vpop.eup %10029  ;;  %v6613_v45 = vmul.f32 %v10028_v27, %v10026_v12  ;;  %v7284_v12 = vrot.slane %v7205_v53, 5  ;;  %v6651_v27 = vld [vmem:[#allocation3 + $0xc0] sm:$0x1] }
0x1eac   :  { %v6612_v23 = vmul.f32 %v10030_v13, %v6435_v46  ;;  %v10032_v32 = vpop.eup %10031  ;;  %v7203_v46 = vld [vmem:[#allocation3 + $0xc9] sm:$0x1]  ;;  %v6751_v13 = vsel %vm6720_vm9, %v6750_v44, %v6749_v6  ;;  %v6757_v42 = vsel %vm6708_vm5, %v6756_v0, %v6651_v27  ;;  %v6621_v44 = vld [vmem:[%s11888_s4 + $0x10] sm:$0xff] }
0x1ead   :  { %v7280_v19 = vrot.slane %v7203_v46, 7  ;;  %v6759_v29 = vsel %vm6711_vm6, %v6758_v20, %v6757_v42  ;;  %v6753_v18 = vsel %vm6723_vm10, %v6752_v21, %v6751_v13  ;;  %v6622_v46 = vld [vmem:[%s11888_s4 + $0x18] sm:$0x3f]  ;;  %s11809_s4 = smov 0  }
0x1eae   :  { %v6614_v36 = vadd.f32 %v6613_v45, %v6612_v23  ;;  %v6762_v45 = vrot.slane %v6655_v62, 4  ;;  %v7273_v23 = vsel %vm6717_vm8, %v7272_v41, %v7271_v3  ;;  %v6761_v14 = vsel %vm6714_vm7, %v6760_v15, %v6759_v29 }
0x1eaf   :  { %v7281_v25 = vsel %vm6708_vm5, %v7280_v19, %v7202_v35  ;;  %v7275_v31 = vsel %vm6720_vm9, %v7274_v54, %v7273_v23  ;;  %v11627_v40 = vsel %vm6726_vm11, %v6754_v39, %v6753_v18  ;;  %v6660_v54 = vpop.permute.xlu0 %6659 }
0x1eb0   :  { %10033 = vtanh.f32 %v6614_v36  ;;  %v7286_v36 = vrot.slane %v7206_v1, 4  ;;  %v6763_v37 = vsel %vm6717_vm8, %v6762_v45, %v6761_v14  ;;  %v7277_v38 = vsel %vm6723_vm10, %v7276_v26, %v7275_v31  ;;  %v6675_v1 = vpop.permute.xlu1 %6674 }
0x1eb1   :  { %v11634_v57 = vsel %vm6726_vm11, %v7278_v24, %v7277_v38 }
0x1eb3   :  { %v6665_v47 = vpop.permute.xlu0 %6664 }
0x1eba   :  { %v10034_v34 = vpop.eup %10033 }
0x1ebb   :  { %v6616_v51 = vmul.f32 %v10034_v34, %v10032_v32  ;;  %v7283_v32 = vsel %vm6711_vm6, %v7282_v7, %v7281_v25 }
0x1ebc   :  { %v7285_v17 = vsel %vm6714_vm7, %v7284_v12, %v7283_v32 }
0x1ebd   :  { %6618 = vst.msk [vmem:[#allocation3 + $0xe8] sm:$0xff] %vm1241_vm4, %v6616_v51  ;;  %v7287_v56 = vsel %vm6717_vm8, %v7286_v36, %v7285_v17 }
0x1ec4   :  { %v6656_v28 = vld [vmem:[#allocation3 + $0xe8] sm:$0x1]  ;;  %v7207_v30 = vld [vmem:[#allocation3 + $0xe9] sm:$0x1] }
0x1ec5   :  { %v6764_v16 = vrot.slane %v6656_v28, 3  ;;  %v7288_v34 = vrot.slane %v7207_v30, 3 }
0x1ec7   :  { %v11630_v51 = vsel %vm6720_vm9, %v6764_v16, %v6763_v37  ;;  %v11637_v58 = vsel %vm6720_vm9, %v7288_v34, %v7287_v56 }
0x1ec8   :  { %v9249_v59 = vpack.c.bf16 %v11630_v51, %v11627_v40  ;;  %v9259_v41 = vpack.c.bf16 %v11637_v58, %v11634_v57 }
0x1eca   :  { %9251 = vmatprep.subr.msk.bf16.mxu0 %vm9250_vm14, %v9249_v59  ;;  %9261 = vmatprep.subr.msk.bf16.mxu1 %vm9250_vm14, %v9259_v41 }
0x1ecb   :  { %9254 = vmatpush3.bf16.msk.msra.mxu0 %vm9250_vm14, %v9249_v59  ;;  %9264 = vmatpush3.bf16.msk.msra.mxu1 %vm9250_vm14, %v9259_v41 }
0x1ece   :  { %8415 = vmatmul.mubr.msk.f32.vlgmr.msra.gmra.mrb[60].mxu0 %vm6769_vm12, %v6620_v61  ;;  %8429 = vmatmul.mubr.msk.f32.vlgmr.msra.gmra.mrb[60].mxu1 %vm6769_vm12, %v6620_v61 }
0x1ecf   :  { %8417 = vmatprep.mubr.msk.f32.mxu0 %vm6769_vm12, %v6621_v44  ;;  %8431 = vmatprep.mubr.msk.f32.mxu1 %vm6769_vm12, %v6621_v44 }
0x1ed2   :  { %8418 = vmatmul.mubr.msk.f32.gmra.mrb[62].mxu0 %vm6769_vm12, %v6622_v46  ;;  %8432 = vmatmul.mubr.msk.f32.gmra.mrb[62].mxu1 %vm6769_vm12, %v6622_v46 }
0x1fa1   :  { %v8416_v48 = vpop.f32.mrb[60].mxu0  ;;  %v8430_v33 = vpop.f32.mrb[60].mxu1 }
0x1fa2   :  { %v6857_v49 = vadd.f32 %v8416_v48, %v6665_v47  ;;  %v7367_v50 = vadd.f32 %v8430_v33, %v6665_v47  ;;  %v6851_v52 = vpop.f32.mrb[61].mxu0  ;;  %v7361_v53 = vpop.f32.mrb[61].mxu1 }
0x1fa3   :  { %v6852_v55 = vadd.f32 %v6851_v52, %v6660_v54  ;;  %v7362_v62 = vadd.f32 %v7361_v53, %v6660_v54 }
0x1fa4   :  { %v6871_v63 = vsel %vm1241_vm4, %v6857_v49, -inf  ;;  %v7381_v0 = vsel %vm1241_vm4, %v7367_v50, -inf }
0x1fa5   :  { %v6870_v11 = vsel %vm1241_vm4, %v6852_v55, -inf  ;;  %v7380_v19 = vsel %vm1241_vm4, %v7362_v62, -inf  ;;  %v8419_v2 = vpop.f32.mrb[62].mxu0  ;;  %v8433_v6 = vpop.f32.mrb[62].mxu1 }
0x1fa6   :  { %v6875_v20 = vmax.f32 %v6870_v11, %v6871_v63  ;;  %v7384_v5 = vmax.f32 %v7380_v19, %v7381_v0  ;;  %v6867_v3 = vadd.f32 %v8419_v2, %v6675_v1  ;;  %v7377_v7 = vadd.f32 %v8433_v6, %v6675_v1  ;;  %v6861_v21 = vpop.f32.mrb[63].mxu0  ;;  %v7371_v15 = vpop.f32.mrb[63].mxu1 }
0x1fa7   :  { %v6862_v26 = vadd.f32 %v6861_v21, %v6670_v60  ;;  %v7372_v12 = vadd.f32 %v7371_v15, %v6670_v60 }
0x1fa8   :  { %v6874_v27 = vsel %vm6873_vm15, %v6867_v3, -inf  ;;  %v7383_v13 = vsel %vm6873_vm15, %v7377_v7, -inf }
0x1fa9   :  { %v6872_v45 = vsel %vm1241_vm4, %v6862_v26, -inf  ;;  %v7382_v35 = vsel %vm1241_vm4, %v7372_v12, -inf }
0x1faa   :  { %v6876_v23 = vmax.f32 %v6872_v45, %v6874_v27  ;;  %v7385_v36 = vmax.f32 %v7382_v35, %v7383_v13 }
0x1fac   :  { %v6877_v39 = vmax.f32 %v6875_v20, %v6876_v23  ;;  %v7386_v42 = vmax.f32 %v7384_v5, %v7385_v36 }
0x1fae   :  { %v6878_v24 = vrot.slane %v6877_v39, 4  ;;  %v7387_v25 = vrot.slane %v7386_v42, 4 }
0x1fb0   :  { %v6879_v28 = vmax.f32 %v6877_v39, %v6878_v24  ;;  %v7388_v29 = vmax.f32 %v7386_v42, %v7387_v25 }
0x1fb2   :  { %v6880_v30 = vrot.slane %v6879_v28, 2  ;;  %v7389_v31 = vrot.slane %v7388_v29, 2 }
0x1fb4   :  { %v6881_v32 = vmax.f32 %v6879_v28, %v6880_v30  ;;  %v7390_v14 = vmax.f32 %v7388_v29, %v7389_v31 }
0x1fb6   :  { %v6882_v16 = vrot.slane %v6881_v32, 1  ;;  %v7391_v17 = vrot.slane %v7390_v14, 1 }
0x1fb8   :  { %v6883_v34 = vmax.f32 %v6881_v32, %v6882_v16  ;;  %v7392_v18 = vmax.f32 %v7390_v14, %v7391_v17  ;;  %v10110_v32 = vmov 1966171168  }
0x1fb9   :  { %v6925_v14 = vunpack.c.l.s4 %v10110_v32 }
0x1fba   :  { %v6884_v37 = vsub.f32 %v6852_v55, %v6883_v34  ;;  %v6885_v38 = vsub.f32 %v6857_v49, %v6883_v34  ;;  %v6886_v56 = vsub.f32 %v6862_v26, %v6883_v34  ;;  %v6887_v59 = vsub.f32 %v6867_v3, %v6883_v34 }
0x1fbb   :  { %v7393_v41 = vsub.f32 %v7362_v62, %v7392_v18  ;;  %v7394_v61 = vsub.f32 %v7367_v50, %v7392_v18  ;;  %v7395_v44 = vsub.f32 %v7372_v12, %v7392_v18  ;;  %v7396_v46 = vsub.f32 %v7377_v7, %v7392_v18 }
0x1fbc   :  { %v6888_v54 = vmul.f32 1.442695, %v6884_v37  ;;  %v6890_v60 = vmul.f32 1.442695, %v6885_v38  ;;  %v6892_v47 = vmul.f32 1.442695, %v6886_v56  ;;  %v6926_v17 = vunpack.c.0.s8 %v6925_v14 }
0x1fbd   :  { %v6894_v48 = vmul.f32 1.442695, %v6887_v59  ;;  %v7397_v33 = vmul.f32 1.442695, %v7393_v41  ;;  %v7399_v52 = vmul.f32 1.442695, %v7394_v61 }
0x1fbe   :  { %10035 = vpow2.f32 %v6888_v54  ;;  %v7401_v53 = vmul.f32 1.442695, %v7395_v44  ;;  %v7403_v63 = vmul.f32 1.442695, %v7396_v46  ;;  %v11687_v37 = vsub.s32 %v6926_v17, %v10648_v22 }
0x1fbf   :  { %10037 = vpow2.f32 %v6890_v60 }
0x1fc0   :  { %10039 = vpow2.f32 %v6892_v47 }
0x1fc1   :  { %10041 = vpow2.f32 %v6894_v48 }
0x1fc2   :  { %10043 = vpow2.f32 %v7397_v33 }
0x1fc3   :  { %10045 = vpow2.f32 %v7399_v52 }
0x1fc4   :  { %10047 = vpow2.f32 %v7401_v53 }
0x1fc5   :  { %10049 = vpow2.f32 %v7403_v63 }
0x1fc8   :  { %v10036_v49 = vpop.eup %10035 }
0x1fc9   :  { %v10038_v50 = vpop.eup %10037  ;;  %v6896_v55 = vsel %vm1241_vm4, %v10036_v49, 0.0 }
0x1fca   :  { %v10040_v62 = vpop.eup %10039  ;;  %v6897_v0 = vsel %vm1241_vm4, %v10038_v50, 0.0 }
0x1fcb   :  { %v10042_v1 = vpop.eup %10041  ;;  %v6898_v11 = vadd.f32 %v6897_v0, %v6896_v55  ;;  %v6899_v2 = vsel %vm1241_vm4, %v10040_v62, 0.0 }
0x1fcc   :  { %v11668_v19 = vpop.eup %10043  ;;  %v6901_v7 = vsel %vm6873_vm15, %v10042_v1, 0.0 }
0x1fcd   :  { %v11671_v6 = vpop.eup %10045  ;;  %v6900_v20 = vadd.f32 %v6899_v2, %v6898_v11  ;;  %v7405_v5 = vsel %vm1241_vm4, %v11668_v19, 0.0 }
0x1fce   :  { %v11675_v3 = vpop.eup %10047  ;;  %v7406_v21 = vsel %vm1241_vm4, %v11671_v6, 0.0 }
0x1fcf   :  { %v11680_v15 = vpop.eup %10049  ;;  %v6902_v26 = vadd.f32 %v6901_v7, %v6900_v20  ;;  %v7407_v12 = vadd.f32 %v7406_v21, %v7405_v5  ;;  %v7408_v27 = vsel %vm1241_vm4, %v11675_v3, 0.0 }
0x1fd0   :  { %v7410_v35 = vsel %vm6873_vm15, %v11680_v15, 0.0 }
0x1fd1   :  { %v6903_v13 = vrot.slane %v6902_v26, 4  ;;  %v7409_v45 = vadd.f32 %v7408_v27, %v7407_v12 }
0x1fd3   :  { %v6904_v23 = vadd.f32 %v6903_v13, %v6902_v26  ;;  %v7411_v36 = vadd.f32 %v7410_v35, %v7409_v45 }
0x1fd5   :  { %v6905_v39 = vrot.slane %v6904_v23, 2  ;;  %v7412_v42 = vrot.slane %v7411_v36, 4 }
0x1fd7   :  { %v6906_v24 = vadd.f32 %v6905_v39, %v6904_v23  ;;  %v7413_v25 = vadd.f32 %v7412_v42, %v7411_v36 }
0x1fd9   :  { %v6907_v28 = vrot.slane %v6906_v24, 1  ;;  %v7414_v29 = vrot.slane %v7413_v25, 2 }
0x1fdb   :  { %v6908_v30 = vadd.f32 %v6907_v28, %v6906_v24  ;;  %v7415_v31 = vadd.f32 %v7414_v29, %v7413_v25 }
0x1fdd   :  { %10051 = vrcp.f32 %v6908_v30  ;;  %v7416_v16 = vrot.slane %v7415_v31, 1 }
0x1fdf   :  { %v7417_v34 = vadd.f32 %v7416_v16, %v7415_v31 }
0x1fe1   :  { %10053 = vrcp.f32 %v7417_v34 }
0x1fe7   :  { %v10052_v18 = vpop.eup %10051 }
0x1fe8   :  { %v6910_v38 = vmul.f32 %v10052_v18, %v10036_v49  ;;  %v6911_v56 = vmul.f32 %v10052_v18, %v10038_v50  ;;  %v6912_v59 = vmul.f32 %v10052_v18, %v10040_v62  ;;  %v6913_v41 = vmul.f32 %v10052_v18, %v10042_v1 }
0x1fea   :  { %v6915_v61 = vmul.f32 %v6910_v38, %v11559_v4  ;;  %v6916_v44 = vmul.f32 %v6911_v56, %v11540_v8  ;;  %v6917_v46 = vmul.f32 %v6912_v59, %v11627_v40  ;;  %v6918_v54 = vmul.f32 %v6913_v41, %v11630_v51 }
0x1feb   :  { %v10054_v45 = vpop.eup %10053 }
0x1fec   :  { %v6923_v60 = vcombine.high %v6915_v61, %v6915_v61  ;;  %v6930_v47 = vrot.slane %v6915_v61, %v11687_v37  ;;  %v6972_v48 = vcombine.high %v6916_v44, %v6916_v44  ;;  %v6979_v22 = vrot.slane %v6916_v44, %v11687_v37 }
0x1fed   :  { %v7021_v33 = vcombine.high %v6917_v46, %v6917_v46  ;;  %v7028_v52 = vrot.slane %v6917_v46, %v11687_v37  ;;  %v7070_v53 = vcombine.high %v6918_v54, %v6918_v54  ;;  %v7077_v63 = vrot.slane %v6918_v54, %v11687_v37 }
0x1fee   :  { %v6937_v4 = vrot.slane %v6923_v60, %v11687_v37  ;;  %v6938_v8 = vcombine.high %v6930_v47, %v6930_v47  ;;  %v6946_v40 = vrot.slane %v6930_v47, %v11687_v37  ;;  %v6986_v51 = vrot.slane %v6972_v48, %v11687_v37 }
0x1fef   :  { %v6987_v49 = vcombine.high %v6979_v22, %v6979_v22  ;;  %v6995_v50 = vrot.slane %v6979_v22, %v11687_v37  ;;  %v7035_v55 = vrot.slane %v7021_v33, %v11687_v37  ;;  %v7036_v62 = vcombine.high %v7028_v52, %v7028_v52 }
0x1ff0   :  { %v6939_v0 = vcombine.high %v6937_v4, %v6937_v4  ;;  %v6953_v1 = vrot.slane %v6937_v4, %v11687_v37  ;;  %v6960_v11 = vrot.slane %v6938_v8, %v11687_v37  ;;  %v6968_v2 = vcombine.high %v6946_v40, %v6946_v40  ;;  %7148 = vst.msk [vmem:[#allocation3] sm:$0x1] %vm7147_vm1, %v6946_v40 }
0x1ff1   :  { %v6988_v20 = vcombine.high %v6986_v51, %v6986_v51  ;;  %v7002_v5 = vrot.slane %v6986_v51, %v11687_v37  ;;  %v7009_v7 = vrot.slane %v6987_v49, %v11687_v37  ;;  %v7017_v21 = vcombine.high %v6995_v50, %v6995_v50  ;;  %7156 = vst.msk [vmem:[#allocation3 + $0x40] sm:$0x1] %vm7147_vm1, %v6995_v50 }
0x1ff2   :  { %v6967_v26 = vrot.slane %v6939_v0, %v11687_v37  ;;  %v6969_v12 = vcombine.high %v6953_v1, %v6953_v1  ;;  %v6970_v27 = vcombine.high %v6960_v11, %v6960_v11  ;;  %v7037_v13 = vcombine.high %v7035_v55, %v7035_v55  ;;  %7149 = vst.msk [vmem:[#allocation3 + $0x8] sm:$0x1] %vm7147_vm1, %v6960_v11 }
0x1ff3   :  { %7150 = vst.msk [vmem:[#allocation3 + $0x10] sm:$0x1] %vm7147_vm1, %v6968_v2  ;;  %7152 = vst.msk [vmem:[#allocation3 + $0x20] sm:$0x1] %vm7147_vm1, %v6953_v1  ;;  %v7016_v35 = vrot.slane %v6988_v20, %v11687_v37  ;;  %v7018_v23 = vcombine.high %v7002_v5, %v7002_v5  ;;  %v7019_v36 = vcombine.high %v7009_v7, %v7009_v7 }
0x1ff4   :  { %v7044_v39 = vrot.slane %v7028_v52, %v11687_v37  ;;  %7157 = vst.msk [vmem:[#allocation3 + $0x48] sm:$0x1] %vm7147_vm1, %v7009_v7  ;;  %7158 = vst.msk [vmem:[#allocation3 + $0x50] sm:$0x1] %vm7147_vm1, %v7017_v21  ;;  %v6971_v42 = vcombine.high %v6967_v26, %v6967_v26  ;;  %v7051_v24 = vrot.slane %v7035_v55, %v11687_v37 }
0x1ff5   :  { %7160 = vst.msk [vmem:[#allocation3 + $0x60] sm:$0x1] %vm7147_vm1, %v7002_v5  ;;  %v7058_v25 = vrot.slane %v7036_v62, %v11687_v37  ;;  %v7065_v28 = vrot.slane %v7037_v13, %v11687_v37  ;;  %7151 = vst.msk [vmem:[#allocation3 + $0x18] sm:$0x1] %vm7147_vm1, %v6970_v27  ;;  %v7020_v29 = vcombine.high %v7016_v35, %v7016_v35 }
0x1ff6   :  { %7153 = vst.msk [vmem:[#allocation3 + $0x28] sm:$0x1] %vm7147_vm1, %v6967_v26  ;;  %7154 = vst.msk [vmem:[#allocation3 + $0x30] sm:$0x1] %vm7147_vm1, %v6969_v12  ;;  %v7066_v30 = vcombine.high %v7044_v39, %v7044_v39  ;;  %v7084_v31 = vrot.slane %v7070_v53, %v11687_v37  ;;  %v7085_v32 = vcombine.high %v7077_v63, %v7077_v63 }
0x1ff7   :  { %7159 = vst.msk [vmem:[#allocation3 + $0x58] sm:$0x1] %vm7147_vm1, %v7019_v36  ;;  %7161 = vst.msk [vmem:[#allocation3 + $0x68] sm:$0x1] %vm7147_vm1, %v7016_v35  ;;  %v7067_v14 = vcombine.high %v7051_v24, %v7051_v24  ;;  %v7068_v16 = vcombine.high %v7058_v25, %v7058_v25  ;;  %v7069_v17 = vcombine.high %v7065_v28, %v7065_v28 }
0x1ff8   :  { %7162 = vst.msk [vmem:[#allocation3 + $0x70] sm:$0x1] %vm7147_vm1, %v7018_v23  ;;  %7164 = vst.msk [vmem:[#allocation3 + $0x80] sm:$0x1] %vm7147_vm1, %v7044_v39  ;;  %v7093_v34 = vrot.slane %v7077_v63, %v11687_v37  ;;  %v7086_v18 = vcombine.high %v7084_v31, %v7084_v31  ;;  %v7100_v38 = vrot.slane %v7084_v31, %v11687_v37 }
0x1ff9   :  { %7155 = vst.msk [vmem:[#allocation3 + $0x38] sm:$0x1] %vm7147_vm1, %v6971_v42  ;;  %7165 = vst.msk [vmem:[#allocation3 + $0x88] sm:$0x1] %vm7147_vm1, %v7058_v25  ;;  %v7107_v56 = vrot.slane %v7085_v32, %v11687_v37  ;;  %v7419_v59 = vmul.f32 %v10054_v45, %v11668_v19  ;;  %v7420_v61 = vmul.f32 %v10054_v45, %v11671_v6 }
0x1ffa   :  { %7168 = vst.msk [vmem:[#allocation3 + $0xa0] sm:$0x1] %vm7147_vm1, %v7051_v24  ;;  %7169 = vst.msk [vmem:[#allocation3 + $0xa8] sm:$0x1] %vm7147_vm1, %v7065_v28  ;;  %v7115_v41 = vcombine.high %v7093_v34, %v7093_v34  ;;  %v7421_v44 = vmul.f32 %v10054_v45, %v11675_v3  ;;  %v7422_v46 = vmul.f32 %v10054_v45, %v11680_v15 }
0x1ffb   :  { %7163 = vst.msk [vmem:[#allocation3 + $0x78] sm:$0x1] %vm7147_vm1, %v7020_v29  ;;  %7166 = vst.msk [vmem:[#allocation3 + $0x90] sm:$0x1] %vm7147_vm1, %v7066_v30  ;;  %v7114_v54 = vrot.slane %v7086_v18, %v11687_v37  ;;  %v7116_v60 = vcombine.high %v7107_v56, %v7107_v56  ;;  %v7424_v19 = vmul.f32 %v7419_v59, %v11562_v9 }
0x1ffc   :  { %7167 = vst.msk [vmem:[#allocation3 + $0x98] sm:$0x1] %vm7147_vm1, %v7068_v16  ;;  %7170 = vst.msk [vmem:[#allocation3 + $0xb0] sm:$0x1] %vm7147_vm1, %v7067_v14  ;;  %v7425_v47 = vmul.f32 %v7420_v61, %v11546_v43  ;;  %v7426_v48 = vmul.f32 %v7421_v44, %v11634_v57  ;;  %v7427_v6 = vmul.f32 %v7422_v46, %v11637_v58 }
0x1ffd   :  { %7171 = vst.msk [vmem:[#allocation3 + $0xb8] sm:$0x1] %vm7147_vm1, %v7069_v17  ;;  %7172 = vst.msk [vmem:[#allocation3 + $0xc0] sm:$0x1] %vm7147_vm1, %v7093_v34  ;;  %v7432_v3 = vcombine.high %v7424_v19, %v7424_v19  ;;  %v7439_v15 = vrot.slane %v7424_v19, %v11687_v37 }
0x1ffe   :  { %7173 = vst.msk [vmem:[#allocation3 + $0xc8] sm:$0x1] %vm7147_vm1, %v7107_v56  ;;  %7176 = vst.msk [vmem:[#allocation3 + $0xe0] sm:$0x1] %vm7147_vm1, %v7100_v38  ;;  %v7481_v22 = vcombine.high %v7425_v47, %v7425_v47  ;;  %v7488_v33 = vrot.slane %v7425_v47, %v11687_v37  ;;  %v7530_v52 = vcombine.high %v7426_v48, %v7426_v48  ;;  %v10099_v56 = vmov 0.0  }
0x1fff   :  { %7174 = vst.msk [vmem:[#allocation3 + $0xd0] sm:$0x1] %vm7147_vm1, %v7115_v41  ;;  %7175 = vst.msk [vmem:[#allocation3 + $0xd8] sm:$0x1] %vm7147_vm1, %v7116_v60  ;;  %v7537_v9 = vrot.slane %v7426_v48, %v11687_v37  ;;  %v7446_v53 = vrot.slane %v7432_v3, %v11687_v37  ;;  %v7447_v43 = vcombine.high %v7439_v15, %v7439_v15 }
0x2000   :  { %7177 = vst.msk [vmem:[#allocation3 + $0xe8] sm:$0x1] %vm7147_vm1, %v7114_v54  ;;  %v7455_v57 = vrot.slane %v7439_v15, %v11687_v37  ;;  %v7579_v63 = vcombine.high %v7427_v6, %v7427_v6  ;;  %v7495_v58 = vrot.slane %v7481_v22, %v11687_v37  ;;  %v7496_v4 = vcombine.high %v7488_v33, %v7488_v33 }
0x2001   :  { %v7504_v8 = vrot.slane %v7488_v33, %v11687_v37  ;;  %v7544_v40 = vrot.slane %v7530_v52, %v11687_v37  ;;  %v7448_v51 = vcombine.high %v7446_v53, %v7446_v53  ;;  %v7462_v49 = vrot.slane %v7446_v53, %v11687_v37 }
0x2002   :  { %v7469_v50 = vrot.slane %v7447_v43, %v11687_v37  ;;  %v7477_v55 = vcombine.high %v7455_v57, %v7455_v57  ;;  %7656 = vst.msk [vmem:[#allocation3 + $0x1] sm:$0x1] %vm7147_vm1, %v7455_v57  ;;  %v7497_v62 = vcombine.high %v7495_v58, %v7495_v58  ;;  %v7511_v0 = vrot.slane %v7495_v58, %v11687_v37 }
0x2003   :  { %v7518_v1 = vrot.slane %v7496_v4, %v11687_v37  ;;  %v7526_v11 = vcombine.high %v7504_v8, %v7504_v8  ;;  %7664 = vst.msk [vmem:[#allocation3 + $0x41] sm:$0x1] %vm7147_vm1, %v7504_v8  ;;  %v7476_v2 = vrot.slane %v7448_v51, %v11687_v37  ;;  %v7478_v20 = vcombine.high %v7462_v49, %v7462_v49 }
0x2004   :  { %v7479_v5 = vcombine.high %v7469_v50, %v7469_v50  ;;  %v7545_v7 = vcombine.high %v7537_v9, %v7537_v9  ;;  %7657 = vst.msk [vmem:[#allocation3 + $0x9] sm:$0x1] %vm7147_vm1, %v7469_v50  ;;  %7658 = vst.msk [vmem:[#allocation3 + $0x11] sm:$0x1] %vm7147_vm1, %v7477_v55  ;;  %v7525_v21 = vrot.slane %v7497_v62, %v11687_v37 }
0x2005   :  { %7660 = vst.msk [vmem:[#allocation3 + $0x21] sm:$0x1] %vm7147_vm1, %v7462_v49  ;;  %v7527_v26 = vcombine.high %v7511_v0, %v7511_v0  ;;  %v7528_v12 = vcombine.high %v7518_v1, %v7518_v1  ;;  %v7546_v27 = vcombine.high %v7544_v40, %v7544_v40  ;;  %7665 = vst.msk [vmem:[#allocation3 + $0x49] sm:$0x1] %vm7147_vm1, %v7518_v1 }
0x2006   :  { %7666 = vst.msk [vmem:[#allocation3 + $0x51] sm:$0x1] %vm7147_vm1, %v7526_v11  ;;  %7668 = vst.msk [vmem:[#allocation3 + $0x61] sm:$0x1] %vm7147_vm1, %v7511_v0  ;;  %v7480_v13 = vcombine.high %v7476_v2, %v7476_v2  ;;  %v7553_v45 = vrot.slane %v7537_v9, %v11687_v37  ;;  %v7560_v35 = vrot.slane %v7544_v40, %v11687_v37 }
0x2007   :  { %v7567_v23 = vrot.slane %v7545_v7, %v11687_v37  ;;  %7659 = vst.msk [vmem:[#allocation3 + $0x19] sm:$0x1] %vm7147_vm1, %v7479_v5  ;;  %7661 = vst.msk [vmem:[#allocation3 + $0x29] sm:$0x1] %vm7147_vm1, %v7476_v2  ;;  %v7529_v36 = vcombine.high %v7525_v21, %v7525_v21  ;;  %v7574_v39 = vrot.slane %v7546_v27, %v11687_v37 }
0x2008   :  { %7662 = vst.msk [vmem:[#allocation3 + $0x31] sm:$0x1] %vm7147_vm1, %v7478_v20  ;;  %v7586_v42 = vrot.slane %v7427_v6, %v11687_v37  ;;  %v7593_v24 = vrot.slane %v7579_v63, %v11687_v37  ;;  %7667 = vst.msk [vmem:[#allocation3 + $0x59] sm:$0x1] %vm7147_vm1, %v7528_v12  ;;  %v7575_v25 = vcombine.high %v7553_v45, %v7553_v45 }
0x2009   :  { %7669 = vst.msk [vmem:[#allocation3 + $0x69] sm:$0x1] %vm7147_vm1, %v7525_v21  ;;  %7670 = vst.msk [vmem:[#allocation3 + $0x71] sm:$0x1] %vm7147_vm1, %v7527_v26  ;;  %v7576_v28 = vcombine.high %v7560_v35, %v7560_v35  ;;  %v7577_v29 = vcombine.high %v7567_v23, %v7567_v23  ;;  %v7578_v30 = vcombine.high %v7574_v39, %v7574_v39 }
0x200a   :  { %7663 = vst.msk [vmem:[#allocation3 + $0x39] sm:$0x1] %vm7147_vm1, %v7480_v13  ;;  %7672 = vst.msk [vmem:[#allocation3 + $0x81] sm:$0x1] %vm7147_vm1, %v7553_v45  ;;  %v7594_v31 = vcombine.high %v7586_v42, %v7586_v42  ;;  %v7595_v32 = vcombine.high %v7593_v24, %v7593_v24  ;;  %v7602_v14 = vrot.slane %v7586_v42, %v11687_v37 }
0x200b   :  { %7673 = vst.msk [vmem:[#allocation3 + $0x89] sm:$0x1] %vm7147_vm1, %v7567_v23  ;;  %7676 = vst.msk [vmem:[#allocation3 + $0xa1] sm:$0x1] %vm7147_vm1, %v7560_v35  ;;  %v7609_v16 = vrot.slane %v7593_v24, %v11687_v37 }
0x200c   :  { %7671 = vst.msk [vmem:[#allocation3 + $0x79] sm:$0x1] %vm7147_vm1, %v7529_v36  ;;  %7677 = vst.msk [vmem:[#allocation3 + $0xa9] sm:$0x1] %vm7147_vm1, %v7574_v39  ;;  %v7616_v17 = vrot.slane %v7594_v31, %v11687_v37  ;;  %v7623_v34 = vrot.slane %v7595_v32, %v11687_v37  ;;  %v7624_v18 = vcombine.high %v7602_v14, %v7602_v14 }
0x200d   :  { %7674 = vst.msk [vmem:[#allocation3 + $0x91] sm:$0x1] %vm7147_vm1, %v7575_v25  ;;  %7675 = vst.msk [vmem:[#allocation3 + $0x99] sm:$0x1] %vm7147_vm1, %v7577_v29 }
0x200e   :  { %7678 = vst.msk [vmem:[#allocation3 + $0xb1] sm:$0x1] %vm7147_vm1, %v7576_v28  ;;  %7679 = vst.msk [vmem:[#allocation3 + $0xb9] sm:$0x1] %vm7147_vm1, %v7578_v30  ;;  %v7625_v38 = vcombine.high %v7616_v17, %v7616_v17 }
0x200f   :  { %7680 = vst.msk [vmem:[#allocation3 + $0xc1] sm:$0x1] %vm7147_vm1, %v7602_v14  ;;  %7684 = vst.msk [vmem:[#allocation3 + $0xe1] sm:$0x1] %vm7147_vm1, %v7609_v16 }
0x2010   :  { %7681 = vst.msk [vmem:[#allocation3 + $0xc9] sm:$0x1] %vm7147_vm1, %v7616_v17  ;;  %7682 = vst.msk [vmem:[#allocation3 + $0xd1] sm:$0x1] %vm7147_vm1, %v7624_v18 }
0x2011   :  { %7685 = vst.msk [vmem:[#allocation3 + $0xe9] sm:$0x1] %vm7147_vm1, %v7623_v34  ;;  %7683 = vst.msk [vmem:[#allocation3 + $0xd9] sm:$0x1] %vm7147_vm1, %v7625_v38 }
0x2012 LB: > { %v10111_v37 = vmov 0.0|0.0   ;;  %vm10112_vm2 = vmmov 0   ;;  %v10113_v59 = vmov 0.0   ;;  %s7696_s0 = smul.u32 56, %s10105_s4  ;;  %s8360_s16 = sshll.u32 %s10105_s4, 3  ;;  %s10105_s4 = sphi %s11809_s4, %s7691_s4   ;;  %v10101_v56 = vphi %v10099_v56, %v10100_v56  }
0x2013   : > { %9265 = vmatprep.subr.bf16.mxu0 %v10111_v37  ;;  %8448 = vmatprep.mubr.msk.f32.mxu0 %vm10112_vm2, %v10113_v59  ;;  %s7694_s17 = scalar_lea.vmem [#allocation3], %s8360_s16  ;;  %s7691_s4 = sadd.s32 1, %s10105_s4  }
0x2014   : > { %s7697_s15 = scalar_lea.vmem %s11890_s6, %s7696_s0  ;;  %p7688_p0 = scmp.ge.s32.totalorder %s7691_s4, 30  }
0x2015   : > { %v7698_v41 = vld [vmem:[%s7697_s15] sm:$0xff]  ;;  %v7699_v61 = vld [vmem:[%s7697_s15 + $0x8] sm:$0xff]  ;;  %v7700_v44 = vld [vmem:[%s7697_s15 + $0x10] sm:$0xff]  ;;  %v10114_v53 = vmov (%p7688_p0), 0.0|0.0   ;;  %vm10115_vm3 = vmmov (%p7688_p0), 0   ;;  %vm7897_vm5 = vcmask (%p7688_p0), 1043456  }
0x2016   : > { %v9266_v46 = vpack.c.bf16 %v7699_v61, %v7698_v41  ;;  %v7701_v54 = vld [vmem:[%s7697_s15 + $0x18] sm:$0xff]  ;;  %v7702_v19 = vld [vmem:[%s7697_s15 + $0x20] sm:$0xff]  ;;  %v7703_v47 = vld [vmem:[%s7697_s15 + $0x28] sm:$0xff]  ;;  %9283 = vmatprep.subr.bf16.mxu1 (%p7688_p0), %v10114_v53  ;;  %8474 = vmatprep.mubr.msk.f32.mxu1 (%p7688_p0), %vm10115_vm3, %v10108_v10  ;;  %vm7893_vm6 = vcmask (%p7688_p0), 162816  }
0x2017   : > { %v9269_v60 = vpack.c.bf16 %v7701_v54, %v7700_v44  ;;  %v9272_v48 = vpack.c.bf16 %v7703_v47, %v7702_v19  ;;  %v7704_v6 = vld [vmem:[%s7697_s15 + $0x30] sm:$0x3]  ;;  %v7883_v52 = vld [vmem:[%s11895_s11] sm:$0xff] (%p7688_p0)  ;;  %v7884_v9 = vld [vmem:[%s11895_s11 + $0x8] sm:$0xff] (%p7688_p0) }
0x2018   : > { %9267 = vmatpush3.bf16.msra.mxu0 %v9266_v46  ;;  %v7695_v3 = vld [vmem:[%s7694_s17] sm:$0xff]  ;;  %v9284_v43 = vpack.c.bf16 (%p7688_p0), %v7884_v9, %v7883_v52  ;;  %v7792_v63 = vld [vmem:[%s11892_s8 + $0x8] sm:$0xff] (%p7688_p0)  ;;  %v7793_v4 = vld [vmem:[%s11892_s8 + $0x10] sm:$0xff] (%p7688_p0)  ;;  %s10116_s17 = smov (%p7688_p0), 10  }
0x2019   : > { %9268 = vmatprep.subr.bf16.mxu0 %v10111_v37  ;;  %v7791_v57 = vld [vmem:[%s11892_s8] sm:$0xff] (%p7688_p0)  ;;  %v7794_v8 = vld [vmem:[%s11892_s8 + $0x18] sm:$0xff] (%p7688_p0)  ;;  %v7885_v40 = vld [vmem:[%s11895_s11 + $0x10] sm:$0xf] (%p7688_p0) }
0x201a   :  { %v9275_v58 = vpack.c.bf16 (%p7688_p0), %v7792_v63, %v7791_v57  ;;  %9285 = vmatpush3.bf16.msra.mxu1 (%p7688_p0), %v9284_v43  ;;  %v9278_v51 = vpack.c.bf16 (%p7688_p0), %v7794_v8, %v7793_v4  ;;  %v7882_v49 = vld [vmem:[%s11894_s10] sm:$0x3] (%p7688_p0)  ;;  %v7796_v55 = vld [vmem:[%s11892_s8 + $0x28] sm:$0xff] (%p7688_p0)  ;;  %v7797_v11 = vld [vmem:[%s11892_s8 + $0x30] sm:$0x3] (%p7688_p0) }
0x201b   :  { %8472 = vmatprep.subr.mxu1 (%p7688_p0), %v10108_v10  ;;  %v7795_v50 = vld [vmem:[%s11892_s8 + $0x20] sm:$0xff] (%p7688_p0)  ;;  %s10117_s8 = smov (%p7688_p0), [#allocation4]  }
0x201c   : > { %9270 = vmatpush3.bf16.msra.mxu0 %v9269_v60  ;;  %v8363_v62 = vld [vmem:[%s11891_s7] ss:$0 sm:$0xff] (%p7688_p0)  ;;  %v9281_v0 = vpack.c.bf16 (%p7688_p0), %v7796_v55, %v7795_v50  ;;  %s7986_s19 = sshll.u32 (%p7688_p0), %s10117_s8, 4  ;;  %s7987_s19 = int_to_ptr.vmem [resolvable:$true] %s7986_s19 }
0x201d   : > { %9271 = vmatprep.subr.bf16.mxu0 %v10111_v37  ;;  %v8367_v20 = vld [vmem:[%s11896_s12] ss:$0 sm:$0xff] (%p7688_p0)  ;;  %s10067_s12 = scalar_lea.vmem (%p7688_p0), %s7987_s19, 32  ;;  %p10072_p2 = scmp.lt.s32.totalorder (%p7688_p0), %s7987_s19, %s7987_s19 }
0x201e   :  { %8473 = vmatpush3.msk.msra.mxu1 (%p7688_p0), %vm7897_vm5, %v7885_v40  ;;  %p10068_p1 = scmp.ne.s32.totalorder (%p7688_p0), %s7987_s19, %s10067_s12  ;;  %p10073_p3 = scmp.lt.s32.totalorder (%p7688_p0), %s10067_s12, %s10067_s12 }
0x201f   :  { %8475 = vmatmul.mubr.msk.f32.vlgmr.msra.gmra.mrb[0].mxu1 (%p7688_p0), %vm7893_vm6, %v7882_v49 }
0x2020   : > { %9273 = vmatpush3.bf16.msra.mxu0 %v9272_v48  ;;  %p10074_p4 = por (%p7688_p0), %p10073_p3, %p10072_p2 }
0x2021   : > { %8446 = vmatprep.subr.mxu0 %v10113_v59 }
0x2022   :  { %p10075_p5 = pnand (%p7688_p0), %p10074_p4, %p10068_p1 }
0x2024   : > { %8447 = vmatpush3.msk.msra.mxu0 %vm108_vm0, %v7704_v6 }
0x2025   : > { %8449 = vmatmul.mubr.msk.f32.vlgmr.msra.gmra.mrb[0].mxu0 %vm1241_vm4, %v7695_v3  ;;  %9274 = vmatprep.subr.bf16.mxu0 (%p7688_p0), %v10114_v53 }
0x2026   :  { %8465 = vmatprep.mubr.msk.f32.mxu0 (%p7688_p0), %vm10115_vm3, %v10108_v10  ;;  %9276 = vmatpush3.bf16.msra.mxu0 (%p7688_p0), %v9275_v58 }
0x2027   :  { %9277 = vmatprep.subr.bf16.mxu0 (%p7688_p0), %v10114_v53 }
0x202a   :  { %9279 = vmatpush3.bf16.msra.mxu0 (%p7688_p0), %v9278_v51 }
0x202b   :  { %9280 = vmatprep.subr.bf16.mxu0 (%p7688_p0), %v10114_v53 }
0x202e   :  { %9282 = vmatpush3.bf16.msra.mxu0 (%p7688_p0), %v9281_v0 }
0x202f   :  { %8463 = vmatprep.subr.mxu0 (%p7688_p0), %v10108_v10  ;;  %v8364_v10 = vld [vmem:[%s11893_s9] ss:$0 sm:$0xff] (%p7688_p0) }
0x2032   :  { %8464 = vmatpush3.msk.msra.mxu0 (%p7688_p0), %vm108_vm0, %v7797_v11  ;;  %vm7972_vm0 = vcmask (%p7688_p0), 74752  }
0x20f2   :  { %v7967_v5 = vpop.f32.mrb[0].mxu1 (%p7688_p0) }
0x20f3   :  { %v7968_v7 = vadd.f32 (%p7688_p0), %v8367_v20, %v7967_v5  ;;  %v8476_v21 = vpop.f32.mrb[1].mxu1 (%p7688_p0) }
0x20f5   :  { %7690 = sbr.rel (!%p7688_p0) target bundleno = 8210 (0x2012), region = 110  ;;  %v7971_v26 = vmax.f32 (%p7688_p0), %v7968_v7, 0.0 }
0x20f7   :  { %7975 = vrot.lane.b32.xlu0 (%p7688_p0), %v7971_v26, %s10116_s17 }
0x20f8   : > { %v7777_v15 = vpop.f32.mrb[0].mxu0 }
0x20f9   : > { %v7781_v22 = vadd.f32 %v10101_v56, %v7777_v15   ;;  %v8450_v33 = vpop.f32.mrb[1].mxu0 }
0x20fb   : > { %v10100_v56 = vmov %v7781_v22   ;;  %v7789_v1 = vadd.f32 (%p7688_p0), %v8363_v62, %v7781_v22 }
0x20fd   :  { %v7790_v2 = vmax.f32 %v7789_v1, 0.0 }
0x20ff   :  { %8466 = vmatmul.mubr.msk.f32.vlgmr.msra.gmra.mrb[0].mxu0 %vm1241_vm4, %v7790_v2  ;;  %vm7978_vm4 = vcmask 156752  }
0x2169   :  { %v7976_v35 = vpop.permute.xlu0 %7975 }
0x21d2   :  { %v7877_v12 = vpop.f32.mrb[0].mxu0 }
0x21d3   :  { %v7878_v27 = vadd.f32 %v8364_v10, %v7877_v12  ;;  %v8467_v13 = vpop.f32.mrb[1].mxu0 }
0x21d5   :  { %v7881_v45 = vmax.f32 %v7878_v27, 0.0 }
0x21d7   :  { %7973 = vst.msk [vmem:[#allocation4] sm:$0x3] %vm7972_vm0, %v7881_v45 }
0x21d8   :  { %7979 = vst.msk [vmem:[#allocation4] sm:$0x3] %vm7978_vm4, %v7976_v35 }
0x21d9   :  { %10078 = shalt.err (!%p10075_p5)
}
0x21da   :  { %s10079_s21 = scalar_lea.hbm %s11897_s13, 32 }
0x21db   :  { %p10080_p6 = scmp.ne.s32.totalorder %s11897_s13, %s10079_s21  ;;  %p10083_p7 = scmp.lt.u32.totalorder %s10079_s21, %s11897_s13 }
0x21dd   :  { %p10085_p8 = pnand %p10083_p7, %p10080_p6 }
0x21df   :  { %10088 = shalt.err (!%p10085_p8)
}
0x21e0   :  { %7989 = dma.vmem_to_hbm [thread:$0]  %s7987_s19, 32, %s11897_s13, [#allocation5]  }
0x21e1   :  { %10097 = dma.done.wait [#allocation5], 32  }
0x21e2   :  { %10098 = vsyncadd [#allocation5], 4294967264 }
0x21e3   :  { %7993 = vsyncpa [#allocation5], 1 }

</bundles_post_ra>
